<compile_context>
chip_gen: v6e
topology: v6e:2x2x1
jax: 0.10.0
libtpu: 0.0.40
codegen_flags: <defaults>
</compile_context>

<pallas_src>
import jax
import jax.numpy as jnp
from jax.experimental import pallas as pl
from jax.experimental.pallas import tpu as pltpu

LANE = 128        # lane width (last-dim alignment)
BF16_SUBLANE = 16  # bf16-packed sublane alignment for small batch tiles

# softplus^-1(1) = log(e - 1): padded sigma == 1, mu == 0, eps == 0
#   -> sampled padded weight == 0 and padded KL term == 0 (to ~1e-14/elem).
_RHO_PAD = 0.5413248546129181


def _round_up(x, m):
    return (x + m - 1) // m * m


def _softplus(x):
    # Numerically stable softplus: max(x, 0) + log1p(exp(-|x|)).
    return jnp.maximum(x, 0.0) + jnp.log1p(jnp.exp(-jnp.abs(x)))


def _pad2(a, rows, cols, val=0.0):
    return jnp.pad(a, ((0, rows - a.shape[0]), (0, cols - a.shape[1])),
                   constant_values=val)


def _pick_batch_tile(n):
    """Largest tile (DMA efficiency) that still gives >=2 grid steps (megacore)."""
    for tb in (1024, 512, 256, 128, 64, 32, 16):
        if n >= 2 * tb:
            return tb
    return _round_up(max(n, 1), BF16_SUBLANE)


# ---------------------------------------------------------------------------
# Kernel 1: reparameterized weight sampling + closed-form KL (runs once).
# ---------------------------------------------------------------------------
def _sample_kl_kernel(w1mu, w1rho, w1eps, b1mu, b1rho, b1eps,
                      w2mu, w2rho, w2eps, b2mu, b2rho, b2eps,
                      w3mu, w3rho, w3eps, b3mu, b3rho, b3eps,
                      w1_o, b1_o, w2_o, b2_o, w3_o, b3_o, kl_ref):
    def _layer(mu_ref, rho_ref, eps_ref, w_out_ref):
        mu = mu_ref[...]
        sigma = _softplus(rho_ref[...])
        # Sampled weight: padded mu/eps are 0 -> padded weights are exactly 0.
        w_out_ref[...] = (mu + sigma * eps_ref[...]).astype(w_out_ref.dtype)
        # KL(N(mu, sigma^2) || N(0, 1)); padded entries (sigma=1, mu=0) give ~0,
        # so no mask is needed.
        kl_e = (0.5 * (sigma * sigma + mu * mu)
                - jnp.log(jnp.maximum(sigma, 1e-30)) - 0.5)
        return jnp.sum(kl_e)

    kl = _layer(w1mu, w1rho, w1eps, w1_o)
    kl += _layer(b1mu, b1rho, b1eps, b1_o)
    kl += _layer(w2mu, w2rho, w2eps, w2_o)
    kl += _layer(b2mu, b2rho, b2eps, b2_o)
    kl += _layer(w3mu, w3rho, w3eps, w3_o)
    kl += _layer(b3mu, b3rho, b3eps, b3_o)
    kl_ref[0] = kl    # single SMEM scalar store (no masked VMEM partial store)


# ---------------------------------------------------------------------------
# Kernel 2: batched 3-layer MLP forward on the sampled weights (pipelined grid).
# ---------------------------------------------------------------------------
def _forward_kernel(x_ref, w1_ref, b1_ref, w2_ref, b2_ref, w3_ref, b3_ref, out_ref):
    # x arrives already bf16 (cast in the wrapper); MXU operands bf16, acc f32.
    h = jnp.dot(x_ref[...], w1_ref[...],
                preferred_element_type=jnp.float32) + b1_ref[...]
    h = jnp.maximum(h, 0.0)
    h = jnp.dot(h.astype(jnp.bfloat16), w2_ref[...],
                preferred_element_type=jnp.float32) + b2_ref[...]
    h = jnp.maximum(h, 0.0)
    y = jnp.dot(h.astype(jnp.bfloat16), w3_ref[...],
                preferred_element_type=jnp.float32) + b3_ref[...]
    out_ref[...] = y.astype(out_ref.dtype)


@jax.jit
def bayesian_network_forward(x, params, eps):
    """Equivalent of BayesianNetwork.forward(x) -> (out, kl)."""
    input_dim = params[0][0].shape[0]
    hidden = params[0][0].shape[1]
    output_dim = params[2][0].shape[1]

    din_p = _round_up(input_dim, LANE)
    h_p = _round_up(hidden, LANE)
    dout_p = _round_up(output_dim, LANE)

    x2 = x.reshape(-1, input_dim).astype(jnp.float32)
    n = x2.shape[0]
    tb = _pick_batch_tile(n)
    n_pad = _round_up(n, tb)
    # Pad AND cast to bf16 in one fused XLA op: x is the only streamed operand
    # and is consumed in bf16 anyway -> halves the dominant HBM read.
    x_pad = jnp.pad(x2, ((0, n_pad - n), (0, din_p - input_dim))
                    ).astype(jnp.bfloat16)

    pad_dims = ((din_p, h_p), (h_p, h_p), (h_p, dout_p))
    flat = []
    for (w_mu, w_rho, b_mu, b_rho), (w_eps, b_eps), (rp, cp) in zip(params, eps,
                                                                    pad_dims):
        flat += [_pad2(w_mu, rp, cp), _pad2(w_rho, rp, cp, _RHO_PAD),
                 _pad2(w_eps, rp, cp),
                 _pad2(b_mu, 1, cp), _pad2(b_rho, 1, cp, _RHO_PAD),
                 _pad2(b_eps, 1, cp)]

    n_w = din_p * h_p + h_p * h_p + h_p * dout_p
    n_b = 2 * h_p + dout_p
    n_par = n_w + n_b

    # VMEM guards for the all-resident strategies (static shapes -> static check).
    # TODO(synk): replace with explicit row/K tiling once hidden >~ 2K.
    assert 14 * n_par < (24 << 20), "kernel 1 working set too large; needs tiling"
    assert 2 * n_w + 4 * n_b < (16 << 20), "kernel 2 resident weights too large"

    # ---- Kernel 1: sample weights + KL (one shot; keeps EUP/XLU work out of
    # the batched loop). ----
    w1, b1, w2, b2, w3, b3, kl_arr = pl.pallas_call(
        _sample_kl_kernel,
        out_shape=(
            jax.ShapeDtypeStruct((din_p, h_p), jnp.bfloat16),
            jax.ShapeDtypeStruct((1, h_p), jnp.float32),
            jax.ShapeDtypeStruct((h_p, h_p), jnp.bfloat16),
            jax.ShapeDtypeStruct((1, h_p), jnp.float32),
            jax.ShapeDtypeStruct((h_p, dout_p), jnp.bfloat16),
            jax.ShapeDtypeStruct((1, dout_p), jnp.float32),
            jax.ShapeDtypeStruct((1,), jnp.float32),            # KL scalar (SMEM)
        ),
        out_specs=(
            pl.BlockSpec(memory_space=pltpu.MemorySpace.VMEM),
            pl.BlockSpec(memory_space=pltpu.MemorySpace.VMEM),
            pl.BlockSpec(memory_space=pltpu.MemorySpace.VMEM),
            pl.BlockSpec(memory_space=pltpu.MemorySpace.VMEM),
            pl.BlockSpec(memory_space=pltpu.MemorySpace.VMEM),
            pl.BlockSpec(memory_space=pltpu.MemorySpace.VMEM),
            pl.BlockSpec(memory_space=pltpu.MemorySpace.SMEM),
        ),
        cost_estimate=pl.CostEstimate(
            flops=8 * n_par,
            transcendentals=3 * n_par,
            bytes_accessed=3 * 4 * n_par + 2 * n_w + 4 * n_b + 4),
    )(*flat)

    # ---- Kernel 2: pipelined, batch-tiled, megacore-parallel forward pass. ----
    flops = 2 * n_pad * (din_p * h_p + h_p * h_p + h_p * dout_p)
    bytes_accessed = 2 * n_pad * din_p + 4 * n_pad * dout_p + 2 * n_w + 4 * n_b
    out_pad = pl.pallas_call(
        _forward_kernel,
        out_shape=jax.ShapeDtypeStruct((n_pad, dout_p), jnp.float32),
        grid=(n_pad // tb,),
        in_specs=[
            pl.BlockSpec((tb, din_p), lambda i: (i, 0)),   # streamed bf16 x
            # Weights/biases: constant index_map -> stay VMEM-resident across grid.
            pl.BlockSpec((din_p, h_p), lambda i: (0, 0)),
            pl.BlockSpec((1, h_p), lambda i: (0, 0)),
            pl.BlockSpec((h_p, h_p), lambda i: (0, 0)),
            pl.BlockSpec((1, h_p), lambda i: (0, 0)),
            pl.BlockSpec((h_p, dout_p), lambda i: (0, 0)),
            pl.BlockSpec((1, dout_p), lambda i: (0, 0)),
        ],
        out_specs=pl.BlockSpec((tb, dout_p), lambda i: (i, 0)),
        compiler_params=pltpu.CompilerParams(
            dimension_semantics=("parallel",)),
        cost_estimate=pl.CostEstimate(
            flops=flops, transcendentals=0, bytes_accessed=bytes_accessed),
    )(x_pad, w1, b1, w2, b2, w3, b3)

    out = out_pad[:n, :output_dim]
    return out, kl_arr[0]


# ---------------------------------------------------------------------------
# Parameter / noise construction helpers (host side, deterministic).
# ---------------------------------------------------------------------------
def init_params(key, input_dim, hidden_size, output_dim, rho_init=-3.0):
    """Deterministic parameter init (mu ~ small normal, rho = const)."""
    dims = [(input_dim, hidden_size), (hidden_size, hidden_size),
            (hidden_size, output_dim)]
    params = []
    for i, (din, dout) in enumerate(dims):
        kw, kb = jax.random.split(jax.random.fold_in(key, i))
        w_mu = 0.1 * jax.random.normal(kw, (din, dout), jnp.float32)
        b_mu = 0.1 * jax.random.normal(kb, (1, dout), jnp.float32)
        w_rho = jnp.full((din, dout), rho_init, jnp.float32)
        b_rho = jnp.full((1, dout), rho_init, jnp.float32)
        params.append((w_mu, w_rho, b_mu, b_rho))
    return params


def sample_noise(key, params, deterministic):
    eps = []
    for i, (w_mu, _, b_mu, _) in enumerate(params):
        if deterministic:
            eps.append((jnp.zeros_like(w_mu), jnp.zeros_like(b_mu)))
        else:
            kw, kb = jax.random.split(jax.random.fold_in(key, i))
            eps.append((jax.random.normal(kw, w_mu.shape, jnp.float32),
                        jax.random.normal(kb, b_mu.shape, jnp.float32)))
    return eps


if __name__ == "__main__":
    INPUT_DIM, HIDDEN, OUTPUT_DIM, BATCH = 16, 32, 8, 8

    key = jax.random.PRNGKey(0)
    k_x, k_p, k_e = jax.random.split(key, 3)

    x = jax.random.normal(k_x, (BATCH, INPUT_DIM), jnp.float32)
    params = init_params(k_p, INPUT_DIM, HIDDEN, OUTPUT_DIM)
    eps = sample_noise(k_e, params, deterministic=False)

    out, kl = bayesian_network_forward(x, params, eps)
    jax.block_until_ready((out, kl))

    # Pure-JAX f32 reference (kernel uses bf16 MXU operands / bf16 streamed x
    # with f32 accumulation, so the comparison uses loose tolerances).
    def ref_forward(xr, params, eps):
        h = xr.reshape(-1, INPUT_DIM)
        kl_r = jnp.float32(0.0)
        for li, ((w_mu, w_rho, b_mu, b_rho), (w_eps, b_eps)) in enumerate(
                zip(params, eps)):
            s_w = jax.nn.softplus(w_rho)
            s_b = jax.nn.softplus(b_rho)
            w = w_mu + s_w * w_eps
            b = b_mu + s_b * b_eps
            kl_r += jnp.sum(0.5 * (s_w * s_w + w_mu * w_mu) - jnp.log(s_w) - 0.5)
            kl_r += jnp.sum(0.5 * (s_b * s_b + b_mu * b_mu) - jnp.log(s_b) - 0.5)
            h = h @ w + b
            if li < 2:
                h = jnp.maximum(h, 0.0)
        return h, kl_r

    out_ref, kl_ref = ref_forward(x, params, eps)

    assert out.shape == (BATCH, OUTPUT_DIM)
    assert kl.shape == ()
    assert bool(jnp.all(jnp.isfinite(out)))
    assert bool(jnp.isfinite(kl))
    assert bool(jnp.allclose(out, out_ref, atol=0.1, rtol=0.1))
    assert bool(jnp.allclose(kl, kl_ref, rtol=1e-3, atol=1e-2))
    print("KERNEL_OK")
</pallas_src>

<mosaic_0001>
module attributes {stable_mosaic.version = 11 : i64} {
  func.func @_forward_kernel(%arg0: i32, %arg1: memref<16x128xbf16, #tpu.memory_space<vmem>>, %arg2: memref<128x128xbf16, #tpu.memory_space<vmem>>, %arg3: memref<1x128xf32, #tpu.memory_space<vmem>>, %arg4: memref<128x128xbf16, #tpu.memory_space<vmem>>, %arg5: memref<1x128xf32, #tpu.memory_space<vmem>>, %arg6: memref<128x128xbf16, #tpu.memory_space<vmem>>, %arg7: memref<1x128xf32, #tpu.memory_space<vmem>>, %arg8: memref<16x128xf32, #tpu.memory_space<vmem>>) attributes {dimension_semantics = [#tpu.dimension_semantics<parallel>], iteration_bounds = array<i64: 1>, scalar_prefetch = 0 : i64, scratch_operands = 0 : i64, tpu.core_type = #tpu.core_type<tc>, window_params = [{transform_indices = @transform_0, window_bounds = array<i64: 16, 128>}, {pipeline_mode = #tpu.pipeline_mode<synchronous>, transform_indices = @transform_1, window_bounds = array<i64: 128, 128>}, {pipeline_mode = #tpu.pipeline_mode<synchronous>, transform_indices = @transform_2, window_bounds = array<i64: 1, 128>}, {pipeline_mode = #tpu.pipeline_mode<synchronous>, transform_indices = @transform_3, window_bounds = array<i64: 128, 128>}, {pipeline_mode = #tpu.pipeline_mode<synchronous>, transform_indices = @transform_4, window_bounds = array<i64: 1, 128>}, {pipeline_mode = #tpu.pipeline_mode<synchronous>, transform_indices = @transform_5, window_bounds = array<i64: 128, 128>}, {pipeline_mode = #tpu.pipeline_mode<synchronous>, transform_indices = @transform_6, window_bounds = array<i64: 1, 128>}, {transform_indices = @transform_7, window_bounds = array<i64: 16, 128>}]} {
    %c0 = arith.constant 0 : index
    %c0_0 = arith.constant 0 : index
    %0 = vector.load %arg1[%c0, %c0_0] : memref<16x128xbf16, #tpu.memory_space<vmem>>, vector<16x128xbf16>
    %c0_1 = arith.constant 0 : index
    %c0_2 = arith.constant 0 : index
    %1 = vector.load %arg2[%c0_1, %c0_2] : memref<128x128xbf16, #tpu.memory_space<vmem>>, vector<128x128xbf16>
    %cst = arith.constant dense<0.000000e+00> : vector<16x128xf32>
    %2 = tpu.matmul %0, %1, %cst {dimension_numbers = #tpu.dot_dimension_numbers<[1], [0], [0], [1], [0, 0, 1, 1], [], []>} : vector<16x128xbf16>, vector<128x128xbf16>, vector<16x128xf32> -> vector<16x128xf32>
    %c0_3 = arith.constant 0 : index
    %c0_4 = arith.constant 0 : index
    %3 = vector.load %arg3[%c0_3, %c0_4] : memref<1x128xf32, #tpu.memory_space<vmem>>, vector<1x128xf32>
    %4 = vector.broadcast %3 : vector<1x128xf32> to vector<16x128xf32>
    %5 = arith.addf %2, %4 : vector<16x128xf32>
    %cst_5 = arith.constant 0.000000e+00 : f32
    %6 = vector.broadcast %cst_5 : f32 to vector<16x128xf32>
    %7 = arith.maximumf %5, %6 : vector<16x128xf32>
    %8 = arith.truncf %7 : vector<16x128xf32> to vector<16x128xbf16>
    %c0_6 = arith.constant 0 : index
    %c0_7 = arith.constant 0 : index
    %9 = vector.load %arg4[%c0_6, %c0_7] : memref<128x128xbf16, #tpu.memory_space<vmem>>, vector<128x128xbf16>
    %cst_8 = arith.constant dense<0.000000e+00> : vector<16x128xf32>
    %10 = tpu.matmul %8, %9, %cst_8 {dimension_numbers = #tpu.dot_dimension_numbers<[1], [0], [0], [1], [0, 0, 1, 1], [], []>} : vector<16x128xbf16>, vector<128x128xbf16>, vector<16x128xf32> -> vector<16x128xf32>
    %c0_9 = arith.constant 0 : index
    %c0_10 = arith.constant 0 : index
    %11 = vector.load %arg5[%c0_9, %c0_10] : memref<1x128xf32, #tpu.memory_space<vmem>>, vector<1x128xf32>
    %12 = vector.broadcast %11 : vector<1x128xf32> to vector<16x128xf32>
    %13 = arith.addf %10, %12 : vector<16x128xf32>
    %cst_11 = arith.constant 0.000000e+00 : f32
    %14 = vector.broadcast %cst_11 : f32 to vector<16x128xf32>
    %15 = arith.maximumf %13, %14 : vector<16x128xf32>
    %16 = arith.truncf %15 : vector<16x128xf32> to vector<16x128xbf16>
    %c0_12 = arith.constant 0 : index
    %c0_13 = arith.constant 0 : index
    %17 = vector.load %arg6[%c0_12, %c0_13] : memref<128x128xbf16, #tpu.memory_space<vmem>>, vector<128x128xbf16>
    %cst_14 = arith.constant dense<0.000000e+00> : vector<16x128xf32>
    %18 = tpu.matmul %16, %17, %cst_14 {dimension_numbers = #tpu.dot_dimension_numbers<[1], [0], [0], [1], [0, 0, 1, 1], [], []>} : vector<16x128xbf16>, vector<128x128xbf16>, vector<16x128xf32> -> vector<16x128xf32>
    %c0_15 = arith.constant 0 : index
    %c0_16 = arith.constant 0 : index
    %19 = vector.load %arg7[%c0_15, %c0_16] : memref<1x128xf32, #tpu.memory_space<vmem>>, vector<1x128xf32>
    %20 = vector.broadcast %19 : vector<1x128xf32> to vector<16x128xf32>
    %21 = arith.addf %18, %20 : vector<16x128xf32>
    %c0_17 = arith.constant 0 : index
    %c0_18 = arith.constant 0 : index
    %22 = vector.load %arg8[%c0_17, %c0_18] : memref<16x128xf32, #tpu.memory_space<vmem>>, vector<16x128xf32>
    tpu.vector_store %arg8[%c0_17, %c0_18], %21 {strides = array<i32>} : memref<16x128xf32, #tpu.memory_space<vmem>>, vector<16x128xf32>,
    return
  }
  func.func @transform_0(%arg0: i32) -> (i32, i32) {
    %c0_i32 = arith.constant 0 : i32
    %c0_i32_0 = arith.constant 0 : i32
    return %arg0, %c0_i32 : i32, i32
  }
  func.func @transform_1(%arg0: i32) -> (i32, i32) {
    %c0_i32 = arith.constant 0 : i32
    %c0_i32_0 = arith.constant 0 : i32
    %c0_i32_1 = arith.constant 0 : i32
    return %c0_i32, %c0_i32_0 : i32, i32
  }
  func.func @transform_2(%arg0: i32) -> (i32, i32) {
    %c0_i32 = arith.constant 0 : i32
    %c0_i32_0 = arith.constant 0 : i32
    %c0_i32_1 = arith.constant 0 : i32
    return %c0_i32, %c0_i32_0 : i32, i32
  }
  func.func @transform_3(%arg0: i32) -> (i32, i32) {
    %c0_i32 = arith.constant 0 : i32
    %c0_i32_0 = arith.constant 0 : i32
    %c0_i32_1 = arith.constant 0 : i32
    return %c0_i32, %c0_i32_0 : i32, i32
  }
  func.func @transform_4(%arg0: i32) -> (i32, i32) {
    %c0_i32 = arith.constant 0 : i32
    %c0_i32_0 = arith.constant 0 : i32
    %c0_i32_1 = arith.constant 0 : i32
    return %c0_i32, %c0_i32_0 : i32, i32
  }
  func.func @transform_5(%arg0: i32) -> (i32, i32) {
    %c0_i32 = arith.constant 0 : i32
    %c0_i32_0 = arith.constant 0 : i32
    %c0_i32_1 = arith.constant 0 : i32
    return %c0_i32, %c0_i32_0 : i32, i32
  }
  func.func @transform_6(%arg0: i32) -> (i32, i32) {
    %c0_i32 = arith.constant 0 : i32
    %c0_i32_0 = arith.constant 0 : i32
    %c0_i32_1 = arith.constant 0 : i32
    return %c0_i32, %c0_i32_0 : i32, i32
  }
  func.func @transform_7(%arg0: i32) -> (i32, i32) {
    %c0_i32 = arith.constant 0 : i32
    %c0_i32_0 = arith.constant 0 : i32
    return %arg0, %c0_i32 : i32, i32
  }
}

module attributes {stable_mosaic.version = 11 : i64} {
  func.func @_sample_kl_kernel(%arg0: memref<128x128xf32, #tpu.memory_space<vmem>>, %arg1: memref<128x128xf32, #tpu.memory_space<vmem>>, %arg2: memref<128x128xf32, #tpu.memory_space<vmem>>, %arg3: memref<1x128xf32, #tpu.memory_space<vmem>>, %arg4: memref<1x128xf32, #tpu.memory_space<vmem>>, %arg5: memref<1x128xf32, #tpu.memory_space<vmem>>, %arg6: memref<128x128xf32, #tpu.memory_space<vmem>>, %arg7: memref<128x128xf32, #tpu.memory_space<vmem>>, %arg8: memref<128x128xf32, #tpu.memory_space<vmem>>, %arg9: memref<1x128xf32, #tpu.memory_space<vmem>>, %arg10: memref<1x128xf32, #tpu.memory_space<vmem>>, %arg11: memref<1x128xf32, #tpu.memory_space<vmem>>, %arg12: memref<128x128xf32, #tpu.memory_space<vmem>>, %arg13: memref<128x128xf32, #tpu.memory_space<vmem>>, %arg14: memref<128x128xf32, #tpu.memory_space<vmem>>, %arg15: memref<1x128xf32, #tpu.memory_space<vmem>>, %arg16: memref<1x128xf32, #tpu.memory_space<vmem>>, %arg17: memref<1x128xf32, #tpu.memory_space<vmem>>, %arg18: memref<128x128xbf16, #tpu.memory_space<vmem>>, %arg19: memref<1x128xf32, #tpu.memory_space<vmem>>, %arg20: memref<128x128xbf16, #tpu.memory_space<vmem>>, %arg21: memref<1x128xf32, #tpu.memory_space<vmem>>, %arg22: memref<128x128xbf16, #tpu.memory_space<vmem>>, %arg23: memref<1x128xf32, #tpu.memory_space<vmem>>, %arg24: memref<1xf32, #tpu.memory_space<smem>>) attributes {dimension_semantics = [], scalar_prefetch = 0 : i64, scratch_operands = 0 : i64, tpu.core_type = #tpu.core_type<tc>} {
    %c0 = arith.constant 0 : index
    %c0_0 = arith.constant 0 : index
    %0 = vector.load %arg0[%c0, %c0_0] : memref<128x128xf32, #tpu.memory_space<vmem>>, vector<128x128xf32>
    %c0_1 = arith.constant 0 : index
    %c0_2 = arith.constant 0 : index
    %1 = vector.load %arg1[%c0_1, %c0_2] : memref<128x128xf32, #tpu.memory_space<vmem>>, vector<128x128xf32>
    %cst = arith.constant 0.000000e+00 : f32
    %2 = vector.broadcast %cst : f32 to vector<128x128xf32>
    %3 = arith.maximumf %1, %2 : vector<128x128xf32>
    %4 = math.absf %1 : vector<128x128xf32>
    %cst_3 = arith.constant 0.000000e+00 : f32
    %5 = vector.broadcast %cst_3 : f32 to vector<128x128xf32>
    %6 = arith.subf %5, %4 : vector<128x128xf32>
    %7 = math.exp %6 : vector<128x128xf32>
    %8 = math.log1p %7 : vector<128x128xf32>
    %9 = arith.addf %3, %8 : vector<128x128xf32>
    %c0_4 = arith.constant 0 : index
    %c0_5 = arith.constant 0 : index
    %10 = vector.load %arg2[%c0_4, %c0_5] : memref<128x128xf32, #tpu.memory_space<vmem>>, vector<128x128xf32>
    %11 = arith.mulf %9, %10 : vector<128x128xf32>
    %12 = arith.addf %0, %11 : vector<128x128xf32>
    %13 = arith.truncf %12 : vector<128x128xf32> to vector<128x128xbf16>
    %c0_6 = arith.constant 0 : index
    %c0_7 = arith.constant 0 : index
    %14 = vector.load %arg18[%c0_6, %c0_7] : memref<128x128xbf16, #tpu.memory_space<vmem>>, vector<128x128xbf16>
    tpu.vector_store %arg18[%c0_6, %c0_7], %13 {strides = array<i32>} : memref<128x128xbf16, #tpu.memory_space<vmem>>, vector<128x128xbf16>,
    %15 = arith.mulf %9, %9 : vector<128x128xf32>
    %16 = arith.mulf %0, %0 : vector<128x128xf32>
    %17 = arith.addf %15, %16 : vector<128x128xf32>
    %cst_8 = arith.constant 5.000000e-01 : f32
    %18 = vector.broadcast %cst_8 : f32 to vector<128x128xf32>
    %19 = arith.mulf %18, %17 : vector<128x128xf32>
    %cst_9 = arith.constant 1.000000e-30 : f32
    %20 = vector.broadcast %cst_9 : f32 to vector<128x128xf32>
    %21 = arith.maximumf %9, %20 : vector<128x128xf32>
    %22 = math.log %21 : vector<128x128xf32>
    %23 = arith.subf %19, %22 : vector<128x128xf32>
    %cst_10 = arith.constant 5.000000e-01 : f32
    %24 = vector.broadcast %cst_10 : f32 to vector<128x128xf32>
    %25 = arith.subf %23, %24 : vector<128x128xf32>
    %26 = vector.shape_cast %25 : vector<128x128xf32> to vector<1x128x128xf32>
    %cst_11 = arith.constant dense<0.000000e+00> : vector<1xf32>
    %27 = vector.multi_reduction <add>, %26, %cst_11 [1, 2] : vector<1x128x128xf32> to vector<1xf32>
    %28 = vector.shape_cast %27 : vector<1xf32> to vector<1x1x1xf32>
    %29 = vector.extract %28[0, 0, 0] : f32 from vector<1x1x1xf32>
    %c0_12 = arith.constant 0 : index
    %c0_13 = arith.constant 0 : index
    %30 = vector.load %arg3[%c0_12, %c0_13] : memref<1x128xf32, #tpu.memory_space<vmem>>, vector<1x128xf32>
    %c0_14 = arith.constant 0 : index
    %c0_15 = arith.constant 0 : index
    %31 = vector.load %arg4[%c0_14, %c0_15] : memref<1x128xf32, #tpu.memory_space<vmem>>, vector<1x128xf32>
    %cst_16 = arith.constant 0.000000e+00 : f32
    %32 = vector.broadcast %cst_16 : f32 to vector<1x128xf32>
    %33 = arith.maximumf %31, %32 : vector<1x128xf32>
    %34 = math.absf %31 : vector<1x128xf32>
    %cst_17 = arith.constant 0.000000e+00 : f32
    %35 = vector.broadcast %cst_17 : f32 to vector<1x128xf32>
    %36 = arith.subf %35, %34 : vector<1x128xf32>
    %37 = math.exp %36 : vector<1x128xf32>
    %38 = math.log1p %37 : vector<1x128xf32>
    %39 = arith.addf %33, %38 : vector<1x128xf32>
    %c0_18 = arith.constant 0 : index
    %c0_19 = arith.constant 0 : index
    %40 = vector.load %arg5[%c0_18, %c0_19] : memref<1x128xf32, #tpu.memory_space<vmem>>, vector<1x128xf32>
    %41 = arith.mulf %39, %40 : vector<1x128xf32>
    %42 = arith.addf %30, %41 : vector<1x128xf32>
    %c0_20 = arith.constant 0 : index
    %c0_21 = arith.constant 0 : index
    %43 = vector.load %arg19[%c0_20, %c0_21] : memref<1x128xf32, #tpu.memory_space<vmem>>, vector<1x128xf32>
    tpu.vector_store %arg19[%c0_20, %c0_21], %42 {strides = array<i32>} : memref<1x128xf32, #tpu.memory_space<vmem>>, vector<1x128xf32>,
    %44 = arith.mulf %39, %39 : vector<1x128xf32>
    %45 = arith.mulf %30, %30 : vector<1x128xf32>
    %46 = arith.addf %44, %45 : vector<1x128xf32>
    %cst_22 = arith.constant 5.000000e-01 : f32
    %47 = vector.broadcast %cst_22 : f32 to vector<1x128xf32>
    %48 = arith.mulf %47, %46 : vector<1x128xf32>
    %cst_23 = arith.constant 1.000000e-30 : f32
    %49 = vector.broadcast %cst_23 : f32 to vector<1x128xf32>
    %50 = arith.maximumf %39, %49 : vector<1x128xf32>
    %51 = math.log %50 : vector<1x128xf32>
    %52 = arith.subf %48, %51 : vector<1x128xf32>
    %cst_24 = arith.constant 5.000000e-01 : f32
    %53 = vector.broadcast %cst_24 : f32 to vector<1x128xf32>
    %54 = arith.subf %52, %53 : vector<1x128xf32>
    %55 = vector.shape_cast %54 : vector<1x128xf32> to vector<1x1x128xf32>
    %cst_25 = arith.constant dense<0.000000e+00> : vector<1xf32>
    %56 = vector.multi_reduction <add>, %55, %cst_25 [1, 2] : vector<1x1x128xf32> to vector<1xf32>
    %57 = vector.shape_cast %56 : vector<1xf32> to vector<1x1x1xf32>
    %58 = vector.extract %57[0, 0, 0] : f32 from vector<1x1x1xf32>
    %59 = arith.addf %29, %58 : f32
    %c0_26 = arith.constant 0 : index
    %c0_27 = arith.constant 0 : index
    %60 = vector.load %arg6[%c0_26, %c0_27] : memref<128x128xf32, #tpu.memory_space<vmem>>, vector<128x128xf32>
    %c0_28 = arith.constant 0 : index
    %c0_29 = arith.constant 0 : index
    %61 = vector.load %arg7[%c0_28, %c0_29] : memref<128x128xf32, #tpu.memory_space<vmem>>, vector<128x128xf32>
    %cst_30 = arith.constant 0.000000e+00 : f32
    %62 = vector.broadcast %cst_30 : f32 to vector<128x128xf32>
    %63 = arith.maximumf %61, %62 : vector<128x128xf32>
    %64 = math.absf %61 : vector<128x128xf32>
    %cst_31 = arith.constant 0.000000e+00 : f32
    %65 = vector.broadcast %cst_31 : f32 to vector<128x128xf32>
    %66 = arith.subf %65, %64 : vector<128x128xf32>
    %67 = math.exp %66 : vector<128x128xf32>
    %68 = math.log1p %67 : vector<128x128xf32>
    %69 = arith.addf %63, %68 : vector<128x128xf32>
    %c0_32 = arith.constant 0 : index
    %c0_33 = arith.constant 0 : index
    %70 = vector.load %arg8[%c0_32, %c0_33] : memref<128x128xf32, #tpu.memory_space<vmem>>, vector<128x128xf32>
    %71 = arith.mulf %69, %70 : vector<128x128xf32>
    %72 = arith.addf %60, %71 : vector<128x128xf32>
    %73 = arith.truncf %72 : vector<128x128xf32> to vector<128x128xbf16>
    %c0_34 = arith.constant 0 : index
    %c0_35 = arith.constant 0 : index
    %74 = vector.load %arg20[%c0_34, %c0_35] : memref<128x128xbf16, #tpu.memory_space<vmem>>, vector<128x128xbf16>
    tpu.vector_store %arg20[%c0_34, %c0_35], %73 {strides = array<i32>} : memref<128x128xbf16, #tpu.memory_space<vmem>>, vector<128x128xbf16>,
    %75 = arith.mulf %69, %69 : vector<128x128xf32>
    %76 = arith.mulf %60, %60 : vector<128x128xf32>
    %77 = arith.addf %75, %76 : vector<128x128xf32>
    %cst_36 = arith.constant 5.000000e-01 : f32
    %78 = vector.broadcast %cst_36 : f32 to vector<128x128xf32>
    %79 = arith.mulf %78, %77 : vector<128x128xf32>
    %cst_37 = arith.constant 1.000000e-30 : f32
    %80 = vector.broadcast %cst_37 : f32 to vector<128x128xf32>
    %81 = arith.maximumf %69, %80 : vector<128x128xf32>
    %82 = math.log %81 : vector<128x128xf32>
    %83 = arith.subf %79, %82 : vector<128x128xf32>
    %cst_38 = arith.constant 5.000000e-01 : f32
    %84 = vector.broadcast %cst_38 : f32 to vector<128x128xf32>
    %85 = arith.subf %83, %84 : vector<128x128xf32>
    %86 = vector.shape_cast %85 : vector<128x128xf32> to vector<1x128x128xf32>
    %cst_39 = arith.constant dense<0.000000e+00> : vector<1xf32>
    %87 = vector.multi_reduction <add>, %86, %cst_39 [1, 2] : vector<1x128x128xf32> to vector<1xf32>
    %88 = vector.shape_cast %87 : vector<1xf32> to vector<1x1x1xf32>
    %89 = vector.extract %88[0, 0, 0] : f32 from vector<1x1x1xf32>
    %90 = arith.addf %59, %89 : f32
    %c0_40 = arith.constant 0 : index
    %c0_41 = arith.constant 0 : index
    %91 = vector.load %arg9[%c0_40, %c0_41] : memref<1x128xf32, #tpu.memory_space<vmem>>, vector<1x128xf32>
    %c0_42 = arith.constant 0 : index
    %c0_43 = arith.constant 0 : index
    %92 = vector.load %arg10[%c0_42, %c0_43] : memref<1x128xf32, #tpu.memory_space<vmem>>, vector<1x128xf32>
    %cst_44 = arith.constant 0.000000e+00 : f32
    %93 = vector.broadcast %cst_44 : f32 to vector<1x128xf32>
    %94 = arith.maximumf %92, %93 : vector<1x128xf32>
    %95 = math.absf %92 : vector<1x128xf32>
    %cst_45 = arith.constant 0.000000e+00 : f32
    %96 = vector.broadcast %cst_45 : f32 to vector<1x128xf32>
    %97 = arith.subf %96, %95 : vector<1x128xf32>
    %98 = math.exp %97 : vector<1x128xf32>
    %99 = math.log1p %98 : vector<1x128xf32>
    %100 = arith.addf %94, %99 : vector<1x128xf32>
    %c0_46 = arith.constant 0 : index
    %c0_47 = arith.constant 0 : index
    %101 = vector.load %arg11[%c0_46, %c0_47] : memref<1x128xf32, #tpu.memory_space<vmem>>, vector<1x128xf32>
    %102 = arith.mulf %100, %101 : vector<1x128xf32>
    %103 = arith.addf %91, %102 : vector<1x128xf32>
    %c0_48 = arith.constant 0 : index
    %c0_49 = arith.constant 0 : index
    %104 = vector.load %arg21[%c0_48, %c0_49] : memref<1x128xf32, #tpu.memory_space<vmem>>, vector<1x128xf32>
    tpu.vector_store %arg21[%c0_48, %c0_49], %103 {strides = array<i32>} : memref<1x128xf32, #tpu.memory_space<vmem>>, vector<1x128xf32>,
    %105 = arith.mulf %100, %100 : vector<1x128xf32>
    %106 = arith.mulf %91, %91 : vector<1x128xf32>
    %107 = arith.addf %105, %106 : vector<1x128xf32>
    %cst_50 = arith.constant 5.000000e-01 : f32
    %108 = vector.broadcast %cst_50 : f32 to vector<1x128xf32>
    %109 = arith.mulf %108, %107 : vector<1x128xf32>
    %cst_51 = arith.constant 1.000000e-30 : f32
    %110 = vector.broadcast %cst_51 : f32 to vector<1x128xf32>
    %111 = arith.maximumf %100, %110 : vector<1x128xf32>
    %112 = math.log %111 : vector<1x128xf32>
    %113 = arith.subf %109, %112 : vector<1x128xf32>
    %cst_52 = arith.constant 5.000000e-01 : f32
    %114 = vector.broadcast %cst_52 : f32 to vector<1x128xf32>
    %115 = arith.subf %113, %114 : vector<1x128xf32>
    %116 = vector.shape_cast %115 : vector<1x128xf32> to vector<1x1x128xf32>
    %cst_53 = arith.constant dense<0.000000e+00> : vector<1xf32>
    %117 = vector.multi_reduction <add>, %116, %cst_53 [1, 2] : vector<1x1x128xf32> to vector<1xf32>
    %118 = vector.shape_cast %117 : vector<1xf32> to vector<1x1x1xf32>
    %119 = vector.extract %118[0, 0, 0] : f32 from vector<1x1x1xf32>
    %120 = arith.addf %90, %119 : f32
    %c0_54 = arith.constant 0 : index
    %c0_55 = arith.constant 0 : index
    %121 = vector.load %arg12[%c0_54, %c0_55] : memref<128x128xf32, #tpu.memory_space<vmem>>, vector<128x128xf32>
    %c0_56 = arith.constant 0 : index
    %c0_57 = arith.constant 0 : index
    %122 = vector.load %arg13[%c0_56, %c0_57] : memref<128x128xf32, #tpu.memory_space<vmem>>, vector<128x128xf32>
    %cst_58 = arith.constant 0.000000e+00 : f32
    %123 = vector.broadcast %cst_58 : f32 to vector<128x128xf32>
    %124 = arith.maximumf %122, %123 : vector<128x128xf32>
    %125 = math.absf %122 : vector<128x128xf32>
    %cst_59 = arith.constant 0.000000e+00 : f32
    %126 = vector.broadcast %cst_59 : f32 to vector<128x128xf32>
    %127 = arith.subf %126, %125 : vector<128x128xf32>
    %128 = math.exp %127 : vector<128x128xf32>
    %129 = math.log1p %128 : vector<128x128xf32>
    %130 = arith.addf %124, %129 : vector<128x128xf32>
    %c0_60 = arith.constant 0 : index
    %c0_61 = arith.constant 0 : index
    %131 = vector.load %arg14[%c0_60, %c0_61] : memref<128x128xf32, #tpu.memory_space<vmem>>, vector<128x128xf32>
    %132 = arith.mulf %130, %131 : vector<128x128xf32>
    %133 = arith.addf %121, %132 : vector<128x128xf32>
    %134 = arith.truncf %133 : vector<128x128xf32> to vector<128x128xbf16>
    %c0_62 = arith.constant 0 : index
    %c0_63 = arith.constant 0 : index
    %135 = vector.load %arg22[%c0_62, %c0_63] : memref<128x128xbf16, #tpu.memory_space<vmem>>, vector<128x128xbf16>
    tpu.vector_store %arg22[%c0_62, %c0_63], %134 {strides = array<i32>} : memref<128x128xbf16, #tpu.memory_space<vmem>>, vector<128x128xbf16>,
    %136 = arith.mulf %130, %130 : vector<128x128xf32>
    %137 = arith.mulf %121, %121 : vector<128x128xf32>
    %138 = arith.addf %136, %137 : vector<128x128xf32>
    %cst_64 = arith.constant 5.000000e-01 : f32
    %139 = vector.broadcast %cst_64 : f32 to vector<128x128xf32>
    %140 = arith.mulf %139, %138 : vector<128x128xf32>
    %cst_65 = arith.constant 1.000000e-30 : f32
    %141 = vector.broadcast %cst_65 : f32 to vector<128x128xf32>
    %142 = arith.maximumf %130, %141 : vector<128x128xf32>
    %143 = math.log %142 : vector<128x128xf32>
    %144 = arith.subf %140, %143 : vector<128x128xf32>
    %cst_66 = arith.constant 5.000000e-01 : f32
    %145 = vector.broadcast %cst_66 : f32 to vector<128x128xf32>
    %146 = arith.subf %144, %145 : vector<128x128xf32>
    %147 = vector.shape_cast %146 : vector<128x128xf32> to vector<1x128x128xf32>
    %cst_67 = arith.constant dense<0.000000e+00> : vector<1xf32>
    %148 = vector.multi_reduction <add>, %147, %cst_67 [1, 2] : vector<1x128x128xf32> to vector<1xf32>
    %149 = vector.shape_cast %148 : vector<1xf32> to vector<1x1x1xf32>
    %150 = vector.extract %149[0, 0, 0] : f32 from vector<1x1x1xf32>
    %151 = arith.addf %120, %150 : f32
    %c0_68 = arith.constant 0 : index
    %c0_69 = arith.constant 0 : index
    %152 = vector.load %arg15[%c0_68, %c0_69] : memref<1x128xf32, #tpu.memory_space<vmem>>, vector<1x128xf32>
    %c0_70 = arith.constant 0 : index
    %c0_71 = arith.constant 0 : index
    %153 = vector.load %arg16[%c0_70, %c0_71] : memref<1x128xf32, #tpu.memory_space<vmem>>, vector<1x128xf32>
    %cst_72 = arith.constant 0.000000e+00 : f32
    %154 = vector.broadcast %cst_72 : f32 to vector<1x128xf32>
    %155 = arith.maximumf %153, %154 : vector<1x128xf32>
    %156 = math.absf %153 : vector<1x128xf32>
    %cst_73 = arith.constant 0.000000e+00 : f32
    %157 = vector.broadcast %cst_73 : f32 to vector<1x128xf32>
    %158 = arith.subf %157, %156 : vector<1x128xf32>
    %159 = math.exp %158 : vector<1x128xf32>
    %160 = math.log1p %159 : vector<1x128xf32>
    %161 = arith.addf %155, %160 : vector<1x128xf32>
    %c0_74 = arith.constant 0 : index
    %c0_75 = arith.constant 0 : index
    %162 = vector.load %arg17[%c0_74, %c0_75] : memref<1x128xf32, #tpu.memory_space<vmem>>, vector<1x128xf32>
    %163 = arith.mulf %161, %162 : vector<1x128xf32>
    %164 = arith.addf %152, %163 : vector<1x128xf32>
    %c0_76 = arith.constant 0 : index
    %c0_77 = arith.constant 0 : index
    %165 = vector.load %arg23[%c0_76, %c0_77] : memref<1x128xf32, #tpu.memory_space<vmem>>, vector<1x128xf32>
    tpu.vector_store %arg23[%c0_76, %c0_77], %164 {strides = array<i32>} : memref<1x128xf32, #tpu.memory_space<vmem>>, vector<1x128xf32>,
    %166 = arith.mulf %161, %161 : vector<1x128xf32>
    %167 = arith.mulf %152, %152 : vector<1x128xf32>
    %168 = arith.addf %166, %167 : vector<1x128xf32>
    %cst_78 = arith.constant 5.000000e-01 : f32
    %169 = vector.broadcast %cst_78 : f32 to vector<1x128xf32>
    %170 = arith.mulf %169, %168 : vector<1x128xf32>
    %cst_79 = arith.constant 1.000000e-30 : f32
    %171 = vector.broadcast %cst_79 : f32 to vector<1x128xf32>
    %172 = arith.maximumf %161, %171 : vector<1x128xf32>
    %173 = math.log %172 : vector<1x128xf32>
    %174 = arith.subf %170, %173 : vector<1x128xf32>
    %cst_80 = arith.constant 5.000000e-01 : f32
    %175 = vector.broadcast %cst_80 : f32 to vector<1x128xf32>
    %176 = arith.subf %174, %175 : vector<1x128xf32>
    %177 = vector.shape_cast %176 : vector<1x128xf32> to vector<1x1x128xf32>
    %cst_81 = arith.constant dense<0.000000e+00> : vector<1xf32>
    %178 = vector.multi_reduction <add>, %177, %cst_81 [1, 2] : vector<1x1x128xf32> to vector<1xf32>
    %179 = vector.shape_cast %178 : vector<1xf32> to vector<1x1x1xf32>
    %180 = vector.extract %179[0, 0, 0] : f32 from vector<1x1x1xf32>
    %181 = arith.addf %151, %180 : f32
    %c0_82 = arith.constant 0 : index
    %182 = memref.load %arg24[%c0_82] : memref<1xf32, #tpu.memory_space<smem>>
    memref.store %181, %arg24[%c0_82] : memref<1xf32, #tpu.memory_space<smem>>
    return
  }
}

</mosaic_0001>

<bundles_post_ra>
// kernel: bayesian_network_forward.3
= control target key start
LH: loop header
LB: loop body
LE: loop exit
PB: predicated region body
PF: predicated region fallthrough
CT: control target
= control target key end

     0   :  { %v525_v0 = vmov 0.0   ;;  %vm526_vm0 = vmmov 0   ;;  %s687_s1 = inlined_call_operand.vmem [shape: bf16[128,128], index: 1, kind: input, shape index: {}]   ;;  %s688_s3 = inlined_call_operand.vmem [shape: bf16[128,128], index: 3, kind: input, shape index: {}]   ;;  %s689_s0 = inlined_call_operand.vmem [shape: bf16[16,128], index: 0, kind: input, shape index: {}]   ;;  %s690_s5 = inlined_call_operand.vmem [shape: bf16[128,128], index: 5, kind: input, shape index: {}]   ;;  %s691_s2 = inlined_call_operand.vmem [shape: f32[1,128], index: 2, kind: input, shape index: {}]   ;;  %s692_s4 = inlined_call_operand.vmem [shape: f32[1,128], index: 4, kind: input, shape index: {}]   ;;  %s693_s6 = inlined_call_operand.vmem [shape: f32[1,128], index: 6, kind: input, shape index: {}]   ;;  %s694_s7 = inlined_call_operand.vmem [shape: f32[16,128], index: 7, kind: output, shape index: {}]  }
   0x1   :  { %438 = vmatprep.subr.bf16.mxu0 %v525_v0  ;;  %v500_v1 = vld [vmem:[%s687_s1 + $0x38] sm:$0xff]   ;;  %454 = vmatprep.mubr.msk.bf16.mxu0 %vm526_vm0, %v525_v0  ;;  %v501_v2 = vld [vmem:[%s687_s1 + $0x30] sm:$0xff]   ;;  %v502_v3 = vld [vmem:[%s687_s1 + $0x28] sm:$0xff]  }
   0x2   :  { %458 = vmatprep.subr.bf16.mxu1 %v525_v0  ;;  %474 = vmatprep.mubr.msk.bf16.mxu1 %vm526_vm0, %v525_v0  ;;  %v509_v4 = vld [vmem:[%s688_s3 + $0x38] sm:$0xff]   ;;  %v503_v5 = vld [vmem:[%s687_s1 + $0x20] sm:$0xff]   ;;  %v510_v6 = vld [vmem:[%s688_s3 + $0x30] sm:$0xff]  }
   0x3   :  { %439 = vmatpush3.bf16.msra.mxu0 %v500_v1  ;;  %459 = vmatpush3.bf16.msra.mxu1 %v509_v4  ;;  %v504_v7 = vld [vmem:[%s687_s1 + $0x18] sm:$0xff]   ;;  %v511_v8 = vld [vmem:[%s688_s3 + $0x28] sm:$0xff]   ;;  %v505_v9 = vld [vmem:[%s687_s1 + $0x10] sm:$0xff]  }
   0x4   :  { %440 = vmatprep.subr.bf16.mxu0 %v525_v0  ;;  %460 = vmatprep.subr.bf16.mxu1 %v525_v0  ;;  %v512_v10 = vld [vmem:[%s688_s3 + $0x20] sm:$0xff]   ;;  %v506_v11 = vld [vmem:[%s687_s1 + $0x8] sm:$0xff]   ;;  %v513_v12 = vld [vmem:[%s688_s3 + $0x18] sm:$0xff]  }
   0x5   :  { %v507_v13 = vld [vmem:[%s687_s1] sm:$0xff]   ;;  %v514_v15 = vld [vmem:[%s688_s3 + $0x10] sm:$0xff]   ;;  %v515_v16 = vld [vmem:[%s688_s3 + $0x8] sm:$0xff]  }
   0x6   :  { %v508_v14 = vld [vmem:[%s689_s0] sm:$0xff]   ;;  %v517_v18 = vld [vmem:[%s690_s5 + $0x38] sm:$0xff]   ;;  %v518_v19 = vld [vmem:[%s690_s5 + $0x30] sm:$0xff]  }
   0x7   :  { %441 = vmatpush3.bf16.msra.mxu0 %v501_v2  ;;  %461 = vmatpush3.bf16.msra.mxu1 %v510_v6  ;;  %v516_v17 = vld [vmem:[%s688_s3] sm:$0xff]   ;;  %v519_v20 = vld [vmem:[%s690_s5 + $0x28] sm:$0xff]   ;;  %v521_v22 = vld [vmem:[%s690_s5 + $0x18] sm:$0xff]  }
   0x8   :  { %442 = vmatprep.subr.bf16.mxu0 %v525_v0  ;;  %462 = vmatprep.subr.bf16.mxu1 %v525_v0  ;;  %v520_v21 = vld [vmem:[%s690_s5 + $0x20] sm:$0xff]   ;;  %v522_v33 = vld [vmem:[%s690_s5 + $0x10] sm:$0xff]   ;;  %v523_v34 = vld [vmem:[%s690_s5 + $0x8] sm:$0xff]  }
   0x9   :  { %v383_v23 = vld [vmem:[%s691_s2] ss:$0 sm:$0xff] }
   0xa   :  { %v524_v35 = vld [vmem:[%s690_s5] sm:$0xff]  }
   0xb   :  { %443 = vmatpush3.bf16.msra.mxu0 %v502_v3  ;;  %463 = vmatpush3.bf16.msra.mxu1 %v511_v8  ;;  %v393_v36 = vld [vmem:[%s692_s4] ss:$0 sm:$0xff] }
   0xc   :  { %444 = vmatprep.subr.bf16.mxu0 %v525_v0  ;;  %464 = vmatprep.subr.bf16.mxu1 %v525_v0  ;;  %v402_v46 = vld [vmem:[%s693_s6] ss:$0 sm:$0xff] }
   0xf   :  { %445 = vmatpush3.bf16.msra.mxu0 %v503_v5  ;;  %465 = vmatpush3.bf16.msra.mxu1 %v512_v10 }
  0x10   :  { %446 = vmatprep.subr.bf16.mxu0 %v525_v0  ;;  %466 = vmatprep.subr.bf16.mxu1 %v525_v0 }
  0x13   :  { %447 = vmatpush3.bf16.msra.mxu0 %v504_v7  ;;  %467 = vmatpush3.bf16.msra.mxu1 %v513_v12 }
  0x14   :  { %448 = vmatprep.subr.bf16.mxu0 %v525_v0  ;;  %468 = vmatprep.subr.bf16.mxu1 %v525_v0 }
  0x17   :  { %449 = vmatpush3.bf16.msra.mxu0 %v505_v9  ;;  %469 = vmatpush3.bf16.msra.mxu1 %v514_v15 }
  0x18   :  { %450 = vmatprep.subr.bf16.mxu0 %v525_v0  ;;  %470 = vmatprep.subr.bf16.mxu1 %v525_v0 }
  0x1b   :  { %451 = vmatpush3.bf16.msra.mxu0 %v506_v11  ;;  %471 = vmatpush3.bf16.msra.mxu1 %v515_v16 }
  0x1c   :  { %452 = vmatprep.subr.bf16.mxu0 %v525_v0  ;;  %472 = vmatprep.subr.bf16.mxu1 %v525_v0 }
  0x1f   :  { %453 = vmatpush3.bf16.msra.mxu0 %v507_v13  ;;  %473 = vmatpush3.bf16.msra.mxu1 %v516_v17 }
  0x20   :  { %478 = vmatprep.subr.bf16.mxu0 %v525_v0 }
  0x22   :  { %455 = vmatmul.mubr.bf16.vlgmr.msra.gmra.mxu0 %v508_v14 }
  0x23   :  { %494 = vmatprep.mubr.msk.bf16.mxu0 %vm526_vm0, %v525_v0  ;;  %479 = vmatpush3.bf16.msra.mxu0 %v517_v18 }
  0x24   :  { %480 = vmatprep.subr.bf16.mxu0 %v525_v0 }
  0x27   :  { %481 = vmatpush3.bf16.msra.mxu0 %v518_v19 }
  0x28   :  { %482 = vmatprep.subr.bf16.mxu0 %v525_v0 }
  0x2b   :  { %483 = vmatpush3.bf16.msra.mxu0 %v519_v20 }
  0x2c   :  { %484 = vmatprep.subr.bf16.mxu0 %v525_v0 }
  0x2f   :  { %485 = vmatpush3.bf16.msra.mxu0 %v520_v21 }
  0x30   :  { %486 = vmatprep.subr.bf16.mxu0 %v525_v0 }
  0x33   :  { %487 = vmatpush3.bf16.msra.mxu0 %v521_v22 }
  0x34   :  { %488 = vmatprep.subr.bf16.mxu0 %v525_v0 }
  0x37   :  { %489 = vmatpush3.bf16.msra.mxu0 %v522_v33 }
  0x38   :  { %490 = vmatprep.subr.bf16.mxu0 %v525_v0 }
  0x3b   :  { %491 = vmatpush3.bf16.msra.mxu0 %v523_v34 }
  0x3c   :  { %492 = vmatprep.subr.bf16.mxu0 %v525_v0 }
  0x3f   :  { %493 = vmatpush3.bf16.msra.mxu0 %v524_v35 }
  0xe2   :  { %v140_v24 = vpop.f32.mrf.mxu0 }
  0xe3   :  { %v141_v26 = vadd.f32 %v383_v23, %v140_v24 }
  0xe4   :  { %v456_v25 = vpop.f32.mrf.mxu0 }
  0xe5   :  { %v147_v30 = vmax.f32 %v141_v26, 0.0 }
  0xe6   :  { %v143_v27 = vpop.f32.mrf.mxu0 }
  0xe7   :  { %v144_v28 = vadd.f32 %v383_v23, %v143_v27 }
  0xe8   :  { %v457_v29 = vpop.f32.mrf.mxu0 }
  0xe9   :  { %v148_v31 = vmax.f32 %v144_v28, 0.0 }
  0xeb   :  { %v149_v32 = vpack.c.bf16 %v148_v31, %v147_v30 }
  0xed   :  { %475 = vmatmul.mubr.bf16.vlgmr.msra.gmra.mxu1 %v149_v32 }
 0x1ad   :  { %v255_v37 = vpop.f32.mrf.mxu1 }
 0x1ae   :  { %v256_v39 = vadd.f32 %v393_v36, %v255_v37 }
 0x1af   :  { %v476_v38 = vpop.f32.mrf.mxu1 }
 0x1b0   :  { %v262_v43 = vmax.f32 %v256_v39, 0.0 }
 0x1b1   :  { %v258_v40 = vpop.f32.mrf.mxu1 }
 0x1b2   :  { %v259_v41 = vadd.f32 %v393_v36, %v258_v40 }
 0x1b3   :  { %v477_v42 = vpop.f32.mrf.mxu1 }
 0x1b4   :  { %v263_v44 = vmax.f32 %v259_v41, 0.0 }
 0x1b6   :  { %v264_v45 = vpack.c.bf16 %v263_v44, %v262_v43 }
 0x1b8   :  { %495 = vmatmul.mubr.bf16.vlgmr.msra.gmra.mxu0 %v264_v45 }
 0x278   :  { %v370_v47 = vpop.f32.mrf.mxu0 }
 0x279   :  { %v371_v48 = vadd.f32 %v402_v46, %v370_v47 }
 0x27a   :  { %v496_v49 = vpop.f32.mrf.mxu0 }
 0x27b   :  { %377 = vst [vmem:[%s694_s7] sm:$0xff] %v371_v48 }
 0x27c   :  { %v373_v50 = vpop.f32.mrf.mxu0 }
 0x27d   :  { %v374_v51 = vadd.f32 %v402_v46, %v373_v50 }
 0x27e   :  { %v497_v52 = vpop.f32.mrf.mxu0 }
 0x27f   :  { %378 = vst [vmem:[%s694_s7 + $0x8] sm:$0xff] %v374_v51 }

// kernel: bayesian_network_forward.2
= control target key start
LH: loop header
LB: loop body
LE: loop exit
PB: predicated region body
PF: predicated region fallthrough
CT: control target
= control target key end

     0   :  { %s4997_s0 = inlined_call_operand.vmem [shape: f32[128,128], index: 0, kind: input, shape index: {}]   ;;  %s4998_s1 = inlined_call_operand.vmem [shape: f32[128,128], index: 1, kind: input, shape index: {}]   ;;  %s4999_s2 = inlined_call_operand.vmem [shape: f32[128,128], index: 2, kind: input, shape index: {}]   ;;  %s5000_s3 = inlined_call_operand.vmem [shape: f32[1,128], index: 3, kind: input, shape index: {}]   ;;  %s5001_s4 = inlined_call_operand.vmem [shape: f32[1,128], index: 4, kind: input, shape index: {}]   ;;  %s5002_s5 = inlined_call_operand.vmem [shape: f32[1,128], index: 5, kind: input, shape index: {}]   ;;  %s5003_s6 = inlined_call_operand.vmem [shape: f32[128,128], index: 6, kind: input, shape index: {}]   ;;  %s5004_s7 = inlined_call_operand.vmem [shape: f32[128,128], index: 7, kind: input, shape index: {}]   ;;  %s5005_s8 = inlined_call_operand.vmem [shape: f32[128,128], index: 8, kind: input, shape index: {}]   ;;  %s5006_s9 = inlined_call_operand.vmem [shape: f32[1,128], index: 9, kind: input, shape index: {}]   ;;  %s5007_s10 = inlined_call_operand.vmem [shape: f32[1,128], index: 10, kind: input, shape index: {}]   ;;  %s5008_s11 = inlined_call_operand.vmem [shape: f32[1,128], index: 11, kind: input, shape index: {}]   ;;  %s5009_s12 = inlined_call_operand.vmem [shape: f32[128,128], index: 12, kind: input, shape index: {}]   ;;  %s5010_s13 = inlined_call_operand.vmem [shape: f32[128,128], index: 13, kind: input, shape index: {}]   ;;  %s5011_s14 = inlined_call_operand.vmem [shape: f32[128,128], index: 14, kind: input, shape index: {}]   ;;  %s5012_s15 = inlined_call_operand.vmem [shape: f32[1,128], index: 15, kind: input, shape index: {}]   ;;  %s5013_s16 = inlined_call_operand.vmem [shape: f32[1,128], index: 16, kind: input, shape index: {}]   ;;  %s5014_s17 = inlined_call_operand.vmem [shape: f32[1,128], index: 17, kind: input, shape index: {}]   ;;  %s5015_s18 = inlined_call_operand.vmem [shape: bf16[128,128], index: 18, kind: output, shape index: {0}]   ;;  %s5016_s19 = inlined_call_operand.vmem [shape: f32[1,128], index: 19, kind: output, shape index: {1}]   ;;  %s5017_s20 = inlined_call_operand.vmem [shape: bf16[128,128], index: 20, kind: output, shape index: {2}]   ;;  %s5018_s21 = inlined_call_operand.vmem [shape: f32[1,128], index: 21, kind: output, shape index: {3}]   ;;  %s5019_s22 = inlined_call_operand.vmem [shape: bf16[128,128], index: 22, kind: output, shape index: {4}]   ;;  %s5020_s23 = inlined_call_operand.vmem [shape: f32[1,128], index: 23, kind: output, shape index: {5}]   ;;  %s5021_s24 = inlined_call_operand.hbm [shape: f32[1], index: 24, kind: output, shape index: {6}]  }
   0x1   :  { %5078 = sst [smem:[#allocation48_spill]] %s4997_s0 }
   0x2   :  { %5079 = sst [smem:[#allocation49_spill]] %s4998_s1 }
   0x3   :  { %5080 = sst [smem:[#allocation50_spill]] %s4999_s2 }
   0x4   :  { %5081 = sst [smem:[#allocation51_spill]] %s5000_s3 }
   0x5   :  { %5082 = sst [smem:[#allocation52_spill]] %s5001_s4 }
   0x6   :  { %5083 = sst [smem:[#allocation53_spill]] %s5002_s5 }
   0x7   :  { %5084 = sst [smem:[#allocation54_spill]] %s5003_s6 }
   0x8   :  { %5085 = sst [smem:[#allocation55_spill]] %s5004_s7 }
   0x9   :  { %5086 = sst [smem:[#allocation56_spill]] %s5005_s8 }
   0xa   :  { %s5087_s27 = sld [smem:[#allocation55_spill]] }
   0xb   :  { %s5088_s4 = sld [smem:[#allocation54_spill]] }
  0x10   :  { %v2727_v0 = vld [vmem:[%s5087_s27] sm:$0xff]  ;;  %v2732_v1 = vld [vmem:[%s5087_s27 + $0x8] sm:$0xff]  ;;  %v2737_v2 = vld [vmem:[%s5087_s27 + $0x10] sm:$0xff] }
  0x11   :  { %v725_v3 = vand.u32 2147483647, %v2727_v0  ;;  %v726_v4 = vand.u32 2147483647, %v2732_v1  ;;  %v2744_v5 = vld [vmem:[%s5087_s27 + $0x18] sm:$0xff]  ;;  %v2750_v7 = vld [vmem:[%s5087_s27 + $0x20] sm:$0xff] }
  0x12   :  { %v727_v6 = vand.u32 2147483647, %v2737_v2  ;;  %v2755_v9 = vld [vmem:[%s5087_s27 + $0x28] sm:$0xff]  ;;  %v728_v10 = vand.u32 2147483647, %v2744_v5  ;;  %v2761_v12 = vld [vmem:[%s5087_s27 + $0x30] sm:$0xff] }
  0x13   :  { %v741_v8 = vsub.f32 0.0, %v725_v3  ;;  %v742_v11 = vsub.f32 0.0, %v726_v4  ;;  %v2766_v14 = vld [vmem:[%s5087_s27 + $0x38] sm:$0xff]  ;;  %v729_v15 = vand.u32 2147483647, %v2750_v7  ;;  %v2772_v16 = vld [vmem:[%s5087_s27 + $0x40] sm:$0xff] }
  0x14   :  { %v743_v13 = vsub.f32 0.0, %v727_v6  ;;  %v730_v17 = vand.u32 2147483647, %v2755_v9  ;;  %v2778_v19 = vld [vmem:[%s5087_s27 + $0x48] sm:$0xff]  ;;  %v731_v20 = vand.u32 2147483647, %v2761_v12 }
  0x15   :  { %v757_v18 = vmul.f32 1.442695, %v741_v8  ;;  %v744_v21 = vsub.f32 0.0, %v728_v10  ;;  %v759_v22 = vmul.f32 1.442695, %v742_v11  ;;  %v2784_v23 = vld [vmem:[%s5087_s27 + $0x50] sm:$0xff] }
  0x16   :  { %v732_v24 = vand.u32 2147483647, %v2766_v14  ;;  %v761_v25 = vmul.f32 1.442695, %v743_v13  ;;  %v733_v26 = vand.u32 2147483647, %v2772_v16 }
  0x17   :  { %v745_v27 = vsub.f32 0.0, %v729_v15  ;;  %v2791_v28 = vld [vmem:[%s5087_s27 + $0x58] sm:$0xff]  ;;  %v734_v29 = vand.u32 2147483647, %v2778_v19  ;;  %v746_v30 = vsub.f32 0.0, %v730_v17  ;;  %2237 = vpow2.f32 %v757_v18  ;;  %v677_v34 = vld [vmem:[%s5088_s4] sm:$0xff] }
  0x18   :  { %v735_v31 = vand.u32 2147483647, %v2784_v23  ;;  %v747_v32 = vsub.f32 0.0, %v731_v20  ;;  %2239 = vpow2.f32 %v759_v22  ;;  %v763_v33 = vmul.f32 1.442695, %v744_v21  ;;  %v678_v35 = vld [vmem:[%s5088_s4 + $0x8] sm:$0xff] }
  0x19   :  { %v2804_v36 = vld [vmem:[%s5087_s27 + $0x60] sm:$0xff]  ;;  %v748_v37 = vsub.f32 0.0, %v732_v24  ;;  %2241 = vpow2.f32 %v761_v25  ;;  %v679_v38 = vld [vmem:[%s5088_s4 + $0x10] sm:$0xff]  ;;  %v736_v39 = vand.u32 2147483647, %v2791_v28  ;;  %v749_v40 = vsub.f32 0.0, %v733_v26 }
  0x1a   :  { %v765_v41 = vmul.f32 1.442695, %v745_v27  ;;  %v680_v42 = vld [vmem:[%s5088_s4 + $0x18] sm:$0xff]  ;;  %v681_v43 = vld [vmem:[%s5088_s4 + $0x20] sm:$0xff]  ;;  %v750_v44 = vsub.f32 0.0, %v734_v29  ;;  %v682_v46 = vld [vmem:[%s5088_s4 + $0x28] sm:$0xff]  ;;  %2243 = vpow2.f32 %v763_v33  ;;  %v2829_v54 = vmul.f32 %v677_v34, %v677_v34 }
  0x1b   :  { %v767_v45 = vmul.f32 1.442695, %v746_v30  ;;  %v737_v47 = vand.u32 2147483647, %v2804_v36  ;;  %v751_v48 = vsub.f32 0.0, %v735_v31  ;;  %v683_v50 = vld [vmem:[%s5088_s4 + $0x30] sm:$0xff]  ;;  %v2831_v55 = vmul.f32 %v678_v35, %v678_v35 }
  0x1c   :  { %v769_v49 = vmul.f32 1.442695, %v747_v32  ;;  %v684_v51 = vld [vmem:[%s5088_s4 + $0x38] sm:$0xff]  ;;  %v685_v52 = vld [vmem:[%s5088_s4 + $0x40] sm:$0xff]  ;;  %v771_v53 = vmul.f32 1.442695, %v748_v37  ;;  %v2833_v56 = vmul.f32 %v679_v38, %v679_v38  ;;  %2245 = vpow2.f32 %v765_v41 }
  0x1d   :  { %5089 = vst [vmem:[#allocation5_spill] sm:$0xff] %v2829_v54  ;;  %5090 = vst [vmem:[#allocation6_spill] sm:$0xff] %v2831_v55  ;;  %v686_v57 = vld [vmem:[%s5088_s4 + $0x48] sm:$0xff]  ;;  %v752_v58 = vsub.f32 0.0, %v736_v39  ;;  %v773_v59 = vmul.f32 1.442695, %v749_v40  ;;  %v2838_v60 = vmul.f32 %v680_v42, %v680_v42 }
  0x1e   :  { %5091 = vst [vmem:[#allocation7_spill] sm:$0xff] %v2833_v56 }
  0x1f   :  { %5092 = vst [vmem:[#allocation8_spill] sm:$0xff] %v2838_v60 }
  0x20   :  { %30 = vsyncpa [#allocation3], 0  ;;  %v687_v61 = vld [vmem:[%s5088_s4 + $0x50] sm:$0xff]  ;;  %v2846_v62 = vld [vmem:[%s5087_s27 + $0x68] sm:$0xff]  ;;  %2247 = vpow2.f32 %v767_v45  ;;  %v775_v63 = vmul.f32 1.442695, %v750_v44  ;;  %v2848_v3 = vmul.f32 %v681_v43, %v681_v43  ;;  %v2850_v4 = vmul.f32 %v682_v46, %v682_v46 }
  0x21   :  { %5093 = vst [vmem:[#allocation9_spill] sm:$0xff] %v2846_v62  ;;  %v688_v6 = vld [vmem:[%s5088_s4 + $0x58] sm:$0xff]  ;;  %v689_v8 = vld [vmem:[%s5088_s4 + $0x60] sm:$0xff]  ;;  %v2861_v10 = vld [vmem:[%s5087_s27 + $0x70] sm:$0xff]  ;;  %v753_v11 = vsub.f32 0.0, %v737_v47  ;;  %2249 = vpow2.f32 %v769_v49  ;;  %v2863_v15 = vmul.f32 %v683_v50, %v683_v50  ;;  %v2871_v20 = vmul.f32 %v684_v51, %v684_v51  ;;  %s5108_s1 = sld [smem:[#allocation49_spill]] }
  0x22   :  { %5094 = vst [vmem:[#allocation10_spill] sm:$0xff] %v2848_v3  ;;  %5095 = vst [vmem:[#allocation11_spill] sm:$0xff] %v2850_v4  ;;  %v777_v13 = vmul.f32 1.442695, %v751_v48  ;;  %v690_v17 = vld [vmem:[%s5088_s4 + $0x68] sm:$0xff]  ;;  %v691_v18 = vld [vmem:[%s5088_s4 + $0x70] sm:$0xff]  ;;  %2251 = vpow2.f32 %v771_v53  ;;  %v2873_v21 = vmul.f32 %v685_v52, %v685_v52  ;;  %v2875_v22 = vmul.f32 %v686_v57, %v686_v57 }
  0x23   :  { %5096 = vst [vmem:[#allocation12_spill] sm:$0xff] %v2861_v10  ;;  %5097 = vst [vmem:[#allocation13_spill] sm:$0xff] %v2863_v15  ;;  %v692_v24 = vld [vmem:[%s5088_s4 + $0x78] sm:$0xff]  ;;  %v738_v26 = vand.u32 2147483647, %v2846_v62  ;;  %2253 = vpow2.f32 %v773_v59  ;;  %v2886_v29 = vmul.f32 %v687_v61, %v687_v61  ;;  %v2889_v31 = vmul.f32 %v688_v6, %v688_v6  ;;  %s5256_s29 = sld [smem:[#allocation48_spill]] }
  0x24   :  { %5098 = vst [vmem:[#allocation14_spill] sm:$0xff] %v2871_v20  ;;  %5099 = vst [vmem:[#allocation15_spill] sm:$0xff] %v2873_v21  ;;  %v2883_v25 = vld [vmem:[%s5087_s27 + $0x78] sm:$0xff]  ;;  %v779_v27 = vmul.f32 1.442695, %v752_v58  ;;  %2255 = vpow2.f32 %v775_v63  ;;  %v2891_v32 = vmul.f32 %v689_v8, %v689_v8  ;;  %v2893_v33 = vpop.eup %2237  ;;  %v2895_v35 = vmul.f32 %v690_v17, %v690_v17  ;;  %s5267_s0 = sld [smem:[#allocation52_spill]] }
  0x25   :  { %5100 = vst [vmem:[#allocation16_spill] sm:$0xff] %v2875_v22  ;;  %5101 = vst [vmem:[#allocation17_spill] sm:$0xff] %v2883_v25  ;;  %v739_v30 = vand.u32 2147483647, %v2861_v10  ;;  %2257 = vpow2.f32 %v777_v13  ;;  %v781_v34 = vmul.f32 1.442695, %v753_v11  ;;  %v2897_v37 = vmul.f32 %v691_v18, %v691_v18  ;;  %v2899_v38 = vpop.eup %2239 }
  0x26   :  { %5102 = vst [vmem:[#allocation18_spill] sm:$0xff] %v2886_v29  ;;  %5103 = vst [vmem:[#allocation19_spill] sm:$0xff] %v2889_v31  ;;  %v740_v41 = vand.u32 2147483647, %v2883_v25  ;;  %v2904_v42 = vmul.f32 %v692_v24, %v692_v24  ;;  %v2906_v43 = vpop.eup %2241  ;;  %v754_v46 = vsub.f32 0.0, %v738_v26  ;;  %2259 = vpow2.f32 %v779_v27  ;;  %s5281_s26 = sld [smem:[#allocation51_spill]] }
  0x27   :  { %5104 = vst [vmem:[#allocation20_spill] sm:$0xff] %v2891_v32  ;;  %5105 = vst [vmem:[#allocation21_spill] sm:$0xff] %v2895_v35  ;;  %v755_v49 = vsub.f32 0.0, %v739_v30  ;;  %v789_v50 = vadd.f32 1.0, %v2893_v33  ;;  %2261 = vpow2.f32 %v781_v34  ;;  %v798_v53 = vadd.f32 1.0, %v2899_v38  ;;  %v2916_v57 = vpop.eup %2243  ;;  %v2927_v17 = vld [vmem:[%s5108_s1] sm:$0xff] }
  0x28   :  { %5106 = vst [vmem:[#allocation22_spill] sm:$0xff] %v2897_v37  ;;  %5107 = vst [vmem:[#allocation23_spill] sm:$0xff] %v2904_v42  ;;  %v756_v61 = vsub.f32 0.0, %v740_v41  ;;  %v807_v63 = vadd.f32 1.0, %v2906_v43  ;;  %v783_v13 = vmul.f32 1.442695, %v754_v46 }
  0x29   :  { %5109 = vst [vmem:[#allocation24_spill] sm:$0xff] %v2927_v17  ;;  %v2929_v18 = vpop.eup %2245  ;;  %v785_v26 = vmul.f32 1.442695, %v755_v49  ;;  %2263 = vlog2.f32 %v789_v50  ;;  %v792_v27 = vmul.f32 -0.5, %v2893_v33  ;;  %v2936_v30 = vld [vmem:[%s5108_s1 + $0x8] sm:$0xff]  ;;  %v2941_v34 = vld [vmem:[%s5108_s1 + $0x10] sm:$0xff] }
  0x2a   :  { %5110 = vst [vmem:[#allocation25_spill] sm:$0xff] %v2936_v30  ;;  %5111 = vst [vmem:[#allocation26_spill] sm:$0xff] %v2941_v34  ;;  %2265 = vlog2.f32 %v798_v53  ;;  %v801_v49 = vmul.f32 -0.5, %v2899_v38  ;;  %v816_v50 = vadd.f32 1.0, %v2916_v57  ;;  %v787_v8 = vmul.f32 1.442695, %v756_v61 }
  0x2b   :  { %2267 = vlog2.f32 %v807_v63  ;;  %v825_v58 = vadd.f32 1.0, %v2929_v18  ;;  %v793_v51 = vadd.f32 1.0, %v792_v27  ;;  %v795_v48 = vand.u32 2147483647, %v2893_v33  ;;  %v2968_v53 = vld [vmem:[%s5108_s1 + $0x18] sm:$0xff]  ;;  %s5347_s5 = sld [smem:[#allocation50_spill]] }
  0x2c   :  { %2269 = vpow2.f32 %v783_v13  ;;  %v802_v6 = vadd.f32 1.0, %v801_v49  ;;  %v810_v11 = vmul.f32 -0.5, %v2906_v43  ;;  %5112 = vst [vmem:[#allocation27_spill] sm:$0xff] %v2968_v53  ;;  %v819_v27 = vmul.f32 -0.5, %v2916_v57  ;;  %s2598_s8 = smov [#allocation2]  }
  0x2d   :  { %v2943_v41 = vpop.eup %2247  ;;  %2271 = vpow2.f32 %v785_v26  ;;  %v804_v26 = vand.u32 2147483647, %v2899_v38  ;;  %v813_v49 = vand.u32 2147483647, %v2906_v43  ;;  %v2981_v40 = vmul.f32 %v2893_v33, %v793_v51 }
  0x2e   :  { %v2948_v24 = vpop.eup %2249  ;;  %v834_v61 = vadd.f32 1.0, %v2943_v41  ;;  %2273 = vlog2.f32 %v816_v50  ;;  %v828_v50 = vmul.f32 -0.5, %v2929_v18  ;;  %v2986_v34 = vmul.f32 %v2899_v38, %v802_v6 }
  0x2f   :  { %v2952_v59 = vpop.eup %2251  ;;  %v843_v13 = vadd.f32 1.0, %v2948_v24  ;;  %2275 = vpow2.f32 %v787_v8  ;;  %v811_v42 = vadd.f32 1.0, %v810_v11  ;;  %vm2991_vm0 = vcmp.lt.f32.partialorder %v795_v48, 0.0004427343 }
  0x30   :  { %v2957_v52 = vpop.eup %2253  ;;  %v852_v47 = vadd.f32 1.0, %v2952_v59  ;;  %2277 = vlog2.f32 %v825_v58  ;;  %v820_v33 = vadd.f32 1.0, %v819_v27  ;;  %v822_v51 = vand.u32 2147483647, %v2916_v57 }
  0x31   :  { %v2961_v63 = vpop.eup %2255  ;;  %v861_v45 = vadd.f32 1.0, %v2957_v52  ;;  %2279 = vlog2.f32 %v834_v61  ;;  %v837_v61 = vmul.f32 -0.5, %v2943_v41  ;;  %vm2997_vm1 = vcmp.lt.f32.partialorder %v804_v26, 0.0004427343 }
  0x32   :  { %v2970_v46 = vpop.eup %2257  ;;  %v870_v8 = vadd.f32 1.0, %v2961_v63  ;;  %2281 = vlog2.f32 %v843_v13  ;;  %vm3001_vm2 = vcmp.lt.f32.partialorder %v813_v49, 0.0004427343  ;;  %v829_v6 = vadd.f32 1.0, %v828_v50 }
  0x33   :  { %v2978_v44 = vpop.eup %2259  ;;  %v879_v58 = vadd.f32 1.0, %v2970_v46  ;;  %2283 = vlog2.f32 %v852_v47  ;;  %v846_v48 = vmul.f32 -0.5, %v2948_v24  ;;  %v831_v13 = vand.u32 2147483647, %v2929_v18 }
  0x34   :  { %v2989_v30 = vpop.eup %2261  ;;  %2285 = vlog2.f32 %v861_v45  ;;  %v888_v11 = vadd.f32 1.0, %v2978_v44  ;;  %v855_v27 = vmul.f32 -0.5, %v2952_v59  ;;  %v864_v47 = vmul.f32 -0.5, %v2957_v52 }
  0x35   :  { %2287 = vlog2.f32 %v870_v8  ;;  %v3011_v53 = vmul.f32 %v2906_v43, %v811_v42  ;;  %v840_v49 = vand.u32 2147483647, %v2943_v41  ;;  %v897_v50 = vadd.f32 1.0, %v2989_v30 }
  0x36   :  { %v2264_v26 = vpop.eup %2263  ;;  %2289 = vlog2.f32 %v879_v58  ;;  %v3016_v45 = vmul.f32 %v2916_v57, %v820_v33  ;;  %vm3018_vm3 = vcmp.lt.f32.partialorder %v822_v51, 0.0004427343  ;;  %v838_v25 = vadd.f32 1.0, %v837_v61 }
  0x37   :  { %v2266_v37 = vpop.eup %2265  ;;  %v873_v8 = vmul.f32 -0.5, %v2961_v63  ;;  %v3024_v42 = vmul.f32 %v2929_v18, %v829_v6  ;;  %v847_v43 = vadd.f32 1.0, %v846_v48  ;;  %v849_v58 = vand.u32 2147483647, %v2948_v24 }
  0x38   :  { %v2268_v10 = vpop.eup %2267  ;;  %2291 = vlog2.f32 %v888_v11  ;;  %vm3029_vm4 = vcmp.lt.f32.partialorder %v831_v13, 0.0004427343  ;;  %v856_v33 = vadd.f32 1.0, %v855_v27  ;;  %v858_v51 = vand.u32 2147483647, %v2952_v59 }
  0x39   :  { %v3027_v32 = vpop.eup %2269  ;;  %v865_v61 = vadd.f32 1.0, %v864_v47  ;;  %v867_v31 = vand.u32 2147483647, %v2957_v52  ;;  %v3037_v18 = vmul.f32 0.6931472, %v2264_v26  ;;  %v882_v11 = vmul.f32 -0.5, %v2970_v46 }
  0x3a   :  { %v3035_v29 = vpop.eup %2271  ;;  %vm3039_vm5 = vcmp.lt.f32.partialorder %v840_v49, 0.0004427343  ;;  %v876_v48 = vand.u32 2147483647, %v2961_v63  ;;  %2293 = vlog2.f32 %v897_v50  ;;  %v3045_v27 = vmul.f32 0.6931472, %v2266_v37 }
  0x3b   :  { %v2274_v13 = vpop.eup %2273  ;;  %v3047_v22 = vmul.f32 0.6931472, %v2268_v10  ;;  %v3050_v47 = vmul.f32 %v2943_v41, %v838_v25  ;;  %v874_v21 = vadd.f32 1.0, %v873_v8  ;;  %v3055_v49 = vmul.f32 %v2948_v24, %v847_v43 }
  0x3c   :  { %v3052_v26 = vpop.eup %2275  ;;  %vm3057_vm6 = vcmp.lt.f32.partialorder %v849_v58, 0.0004427343  ;;  %v885_v50 = vand.u32 2147483647, %v2970_v46  ;;  %v891_v37 = vmul.f32 -0.5, %v2978_v44  ;;  %v3064_v10 = vmul.f32 %v2952_v59, %v856_v33  ;;  %v5178_v59 = vld [vmem:[#allocation9_spill] sm:$0xff] }
  0x3d   :  { %v2278_v62 = vpop.eup %2277  ;;  %vm3066_vm7 = vcmp.lt.f32.partialorder %v858_v51, 0.0004427343  ;;  %v3071_v41 = vmul.f32 %v2957_v52, %v865_v61  ;;  %v906_v24 = vadd.f32 1.0, %v3027_v32  ;;  %v797_v43 = vsel %vm2991_vm0, %v2981_v40, %v3037_v18 }
  0x3e   :  { %v2280_v8 = vpop.eup %2279  ;;  %v3078_v58 = vmul.f32 0.6931472, %v2274_v13  ;;  %vm3080_vm8 = vcmp.lt.f32.partialorder %v867_v31, 0.0004427343  ;;  %v883_v33 = vadd.f32 1.0, %v882_v11  ;;  %v806_v52 = vsel %vm2997_vm1, %v2986_v34, %v3045_v27 }
  0x3f   :  { %v894_v51 = vand.u32 2147483647, %v2978_v44  ;;  %v2282_v15 = vpop.eup %2281  ;;  %v815_v40 = vsel %vm3001_vm2, %v3011_v53, %v3047_v22  ;;  %v3094_v17 = vmul.f32 %v2961_v63, %v874_v21  ;;  %vm3096_vm9 = vcmp.lt.f32.partialorder %v876_v48, 0.0004427343 }
  0x40   :  { %v900_v61 = vmul.f32 -0.5, %v2989_v30  ;;  %v2284_v18 = vpop.eup %2283  ;;  %v827_v11 = vmul.f32 0.6931472, %v2278_v62  ;;  %vm3101_vm10 = vcmp.lt.f32.partialorder %v885_v50, 0.0004427343  ;;  %v892_v39 = vadd.f32 1.0, %v891_v37 }
  0x41   :  { %v909_v34 = vmul.f32 -0.5, %v3027_v32  ;;  %v2286_v38 = vpop.eup %2285  ;;  %v836_v22 = vmul.f32 0.6931472, %v2280_v8  ;;  %2295 = vlog2.f32 %v906_v24  ;;  %v915_v21 = vadd.f32 1.0, %v3035_v29 }
  0x42   :  { %v918_v53 = vmul.f32 -0.5, %v3035_v29  ;;  %v2288_v63 = vpop.eup %2287  ;;  %v824_v62 = vsel %vm3018_vm3, %v3016_v45, %v3078_v58  ;;  %v884_v48 = vmul.f32 %v2970_v46, %v883_v33  ;;  %vm3113_vm11 = vcmp.lt.f32.partialorder %v894_v51, 0.0004427343 }
  0x43   :  { %v924_v50 = vadd.f32 1.0, %v3052_v26  ;;  %v2290_v37 = vpop.eup %2289  ;;  %v845_v24 = vmul.f32 0.6931472, %v2282_v15  ;;  %v901_v8 = vadd.f32 1.0, %v900_v61  ;;  %v903_v4 = vand.u32 2147483647, %v2989_v30 }
  0x44   :  { %v927_v3 = vmul.f32 -0.5, %v3052_v26  ;;  %v833_v35 = vsel %vm3029_vm4, %v3024_v42, %v827_v11  ;;  %v854_v45 = vmul.f32 0.6931472, %v2284_v18  ;;  %v893_v46 = vmul.f32 %v2978_v44, %v892_v39 }
  0x45   :  { %v910_v58 = vadd.f32 1.0, %v909_v34  ;;  %v2292_v33 = vpop.eup %2291  ;;  %v842_v51 = vsel %vm3039_vm5, %v3050_v47, %v836_v22  ;;  %v863_v60 = vmul.f32 0.6931472, %v2286_v38  ;;  %2297 = vlog2.f32 %v915_v21 }
  0x46   :  { %v919_v15 = vadd.f32 1.0, %v918_v53  ;;  %v872_v61 = vmul.f32 0.6931472, %v2288_v63  ;;  %v881_v56 = vmul.f32 0.6931472, %v2290_v37  ;;  %2299 = vlog2.f32 %v924_v50  ;;  %v5190_v63 = vld [vmem:[#allocation17_spill] sm:$0xff] }
  0x47   :  { %v912_v55 = vand.u32 2147483647, %v3027_v32  ;;  %v2294_v54 = vpop.eup %2293  ;;  %v851_v42 = vsel %vm3057_vm6, %v3055_v49, %v845_v24  ;;  %v902_v44 = vmul.f32 %v2989_v30, %v901_v8  ;;  %vm3132_vm12 = vcmp.lt.f32.partialorder %v903_v4, 0.0004427343 }
  0x48   :  { %v928_v6 = vadd.f32 1.0, %v927_v3  ;;  %v860_v47 = vsel %vm3066_vm7, %v3064_v10, %v854_v45  ;;  %v890_v18 = vmul.f32 0.6931472, %v2292_v33  ;;  %v3140_v11 = vmul.f32 %v3027_v32, %v910_v58  ;;  %v5171_v33 = vld [vmem:[#allocation5_spill] sm:$0xff] }
  0x49   :  { %v921_v39 = vand.u32 2147483647, %v3035_v29  ;;  %v869_v20 = vsel %vm3080_vm8, %v3071_v41, %v863_v60  ;;  %v3147_v4 = vmul.f32 %v3035_v29, %v919_v15  ;;  %v930_v30 = vand.u32 2147483647, %v3052_v26 }
  0x4a   :  { %v5139_v3 = vmax.f32 %v2727_v0, 0.0  ;;  %v878_v32 = vsel %vm3096_vm9, %v3094_v17, %v872_v61  ;;  %v887_v10 = vsel %vm3101_vm10, %v884_v48, %v881_v56  ;;  %v899_v25 = vmul.f32 0.6931472, %v2294_v54 }
  0x4b   :  { %vm3159_vm13 = vcmp.lt.f32.partialorder %v912_v55, 0.0004427343  ;;  %v5143_v60 = vmax.f32 %v2732_v1, 0.0  ;;  %v3168_v0 = vmul.f32 %v3052_v26, %v928_v6  ;;  %v5145_v41 = vmax.f32 %v2737_v2, 0.0 }
  0x4c   :  { %v3152_v49 = vadd.f32 %v797_v43, %v5139_v3  ;;  %v5147_v17 = vmax.f32 %v2744_v5, 0.0  ;;  %v5149_v54 = vmax.f32 %v2750_v7, 0.0  ;;  %v896_v1 = vsel %vm3113_vm11, %v893_v46, %v890_v18  ;;  %v5172_v18 = vld [vmem:[#allocation6_spill] sm:$0xff]  ;;  %v5174_v3 = vld [vmem:[#allocation8_spill] sm:$0xff] }
  0x4d   :  { %v3165_v29 = vadd.f32 %v806_v52, %v5143_v60  ;;  %v3172_v43 = vadd.f32 %v815_v40, %v5145_v41  ;;  %v5151_v56 = vmax.f32 %v2755_v9, 0.0  ;;  %v5153_v26 = vmax.f32 %v2761_v12, 0.0 }
  0x4e   :  { %5140 = vst [vmem:[#allocation28_spill] sm:$0xff] %v3152_v49  ;;  %v3176_v31 = vadd.f32 %v824_v62, %v5147_v17  ;;  %v3180_v55 = vadd.f32 %v833_v35, %v5149_v54  ;;  %v5155_v40 = vmax.f32 %v2766_v14, 0.0  ;;  %v5157_v13 = vmax.f32 %v2772_v16, 0.0  ;;  %v2296_v21 = vpop.eup %2295 }
  0x4f   :  { %5144 = vst [vmem:[#allocation29_spill] sm:$0xff] %v3165_v29  ;;  %5146 = vst [vmem:[#allocation30_spill] sm:$0xff] %v3172_v43  ;;  %v3186_v52 = vadd.f32 %v842_v51, %v5151_v56  ;;  %v3190_v2 = vadd.f32 %v851_v42, %v5153_v26  ;;  %v5159_v34 = vmax.f32 %v2778_v19, 0.0  ;;  %v5161_v9 = vmax.f32 %v2784_v23, 0.0  ;;  %v5176_v56 = vld [vmem:[#allocation11_spill] sm:$0xff] }
  0x50   :  { %5148 = vst [vmem:[#allocation31_spill] sm:$0xff] %v3176_v31  ;;  %5150 = vst [vmem:[#allocation32_spill] sm:$0xff] %v3180_v55  ;;  %v3194_v5 = vadd.f32 %v860_v47, %v5155_v40  ;;  %v3198_v7 = vadd.f32 %v869_v20, %v5157_v13  ;;  %v1077_v12 = vmul.f32 %v3152_v49, %v3152_v49  ;;  %vm3212_vm14 = vcmp.lt.f32.partialorder %v921_v39, 0.0004427343 }
  0x51   :  { %5152 = vst [vmem:[#allocation33_spill] sm:$0xff] %v3186_v52  ;;  %5154 = vst [vmem:[#allocation34_spill] sm:$0xff] %v3190_v2  ;;  %v3202_v38 = vadd.f32 %v878_v32, %v5159_v34  ;;  %v3206_v22 = vadd.f32 %v887_v10, %v5161_v9  ;;  %v905_v14 = vsel %vm3132_vm12, %v902_v44, %v899_v25  ;;  %vm3222_vm15 = vcmp.lt.f32.partialorder %v930_v30, 0.0004427343  ;;  %v5175_v10 = vld [vmem:[#allocation10_spill] sm:$0xff]  ;;  %v5177_v34 = vld [vmem:[#allocation13_spill] sm:$0xff] }
  0x52   :  { %5156 = vst [vmem:[#allocation35_spill] sm:$0xff] %v3194_v5  ;;  %5158 = vst [vmem:[#allocation36_spill] sm:$0xff] %v3198_v7  ;;  %v1078_v16 = vmul.f32 %v3165_v29, %v3165_v29  ;;  %v1079_v19 = vmul.f32 %v3172_v43, %v3172_v43  ;;  %v1080_v23 = vmul.f32 %v3176_v31, %v3176_v31  ;;  %v5167_v62 = vmax.f32 %v2791_v28, 0.0  ;;  %v2298_v61 = vpop.eup %2297 }
  0x53   :  { %5160 = vst [vmem:[#allocation37_spill] sm:$0xff] %v3202_v38  ;;  %5162 = vst [vmem:[#allocation38_spill] sm:$0xff] %v3206_v22  ;;  %v1081_v27 = vmul.f32 %v3180_v55, %v3180_v55  ;;  %v1082_v50 = vmul.f32 %v3186_v52, %v3186_v52  ;;  %v1083_v37 = vmul.f32 %v3190_v2, %v3190_v2  ;;  %v908_v45 = vmul.f32 0.6931472, %v2296_v21  ;;  %v2300_v47 = vpop.eup %2299 }
  0x54   :  { %v3228_v48 = vadd.f32 %v896_v1, %v5167_v62  ;;  %v1084_v24 = vmul.f32 %v3194_v5, %v3194_v5  ;;  %v1085_v8 = vmul.f32 %v3198_v7, %v3198_v7  ;;  %v1086_v28 = vmul.f32 %v3202_v38, %v3202_v38  ;;  %v5182_v62 = vld [vmem:[#allocation15_spill] sm:$0xff] }
  0x55   :  { %v1087_v35 = vmul.f32 %v3206_v22, %v3206_v22  ;;  %v5169_v46 = vmax.f32 %v2804_v36, 0.0  ;;  %v1109_v51 = vadd.f32 %v5171_v33, %v1077_v12  ;;  %v1141_v15 = vmax.f32 %v3152_v49, 1e-30  ;;  %v5173_v36 = vld [vmem:[#allocation7_spill] sm:$0xff]  ;;  %v5184_v33 = vld [vmem:[#allocation18_spill] sm:$0xff] }
  0x56   :  { %5168 = vst [vmem:[#allocation39_spill] sm:$0xff] %v3228_v48  ;;  %v1088_v42 = vmul.f32 %v3228_v48, %v3228_v48  ;;  %v1142_v44 = vmax.f32 %v3165_v29, 1e-30  ;;  %v1143_v57 = vmax.f32 %v3172_v43, 1e-30  ;;  %v1110_v39 = vadd.f32 %v5172_v18, %v1078_v16 }
  0x57   :  { %v3246_v58 = vadd.f32 %v905_v14, %v5169_v46  ;;  %v1144_v6 = vmax.f32 %v3176_v31, 1e-30  ;;  %v1111_v20 = vadd.f32 %v5173_v36, %v1079_v19  ;;  %v1145_v30 = vmax.f32 %v3180_v55, 1e-30  ;;  %v5181_v14 = vld [vmem:[#allocation14_spill] sm:$0xff] }
  0x58   :  { %2301 = vlog2.f32 %v1141_v15  ;;  %v1112_v32 = vadd.f32 %v5174_v3, %v1080_v23  ;;  %v1113_v25 = vadd.f32 %v5175_v10, %v1081_v27  ;;  %v1146_v60 = vmax.f32 %v3186_v52, 1e-30  ;;  %v5193_v3 = vld [vmem:[#allocation21_spill] sm:$0xff] }
  0x59   :  { %5170 = vst [vmem:[#allocation40_spill] sm:$0xff] %v3246_v58  ;;  %2303 = vlog2.f32 %v1142_v44  ;;  %v914_v41 = vsel %vm3159_vm13, %v3140_v11, %v908_v45  ;;  %v917_v17 = vmul.f32 0.6931472, %v2298_v61  ;;  %v1147_v54 = vmax.f32 %v3190_v2, 1e-30  ;;  %v5185_v61 = vld [vmem:[#allocation19_spill] sm:$0xff] }
  0x5a   :  { %2305 = vlog2.f32 %v1143_v57  ;;  %v926_v1 = vmul.f32 0.6931472, %v2300_v47  ;;  %v1114_v26 = vadd.f32 %v5176_v56, %v1082_v50  ;;  %v1148_v40 = vmax.f32 %v3194_v5, 1e-30  ;;  %v5183_v50 = vld [vmem:[#allocation16_spill] sm:$0xff] }
  0x5b   :  { %2307 = vlog2.f32 %v1144_v6  ;;  %v1089_v13 = vmul.f32 %v3246_v58, %v3246_v58  ;;  %v1115_v9 = vadd.f32 %v5177_v34, %v1083_v37  ;;  %v1149_v12 = vmax.f32 %v3198_v7, 1e-30  ;;  %v3324_v34 = vld [vmem:[%s5108_s1 + $0x20] sm:$0xff] }
  0x5c   :  { %2309 = vlog2.f32 %v1145_v30  ;;  %v5179_v11 = vmax.f32 %v5178_v59, 0.0  ;;  %v1116_v16 = vadd.f32 %v5181_v14, %v1084_v24  ;;  %v1150_v19 = vmax.f32 %v3202_v38, 1e-30 }
  0x5d   :  { %2311 = vlog2.f32 %v1146_v60  ;;  %v923_v23 = vsel %vm3212_vm14, %v3147_v4, %v917_v17  ;;  %v1117_v27 = vadd.f32 %v5182_v62, %v1085_v8  ;;  %v1118_v37 = vadd.f32 %v5183_v50, %v1086_v28  ;;  %v5186_v4 = vld [vmem:[#allocation20_spill] sm:$0xff] }
  0x5e   :  { %v3273_v21 = vadd.f32 %v914_v41, %v5179_v11  ;;  %2313 = vlog2.f32 %v1147_v54  ;;  %v932_v45 = vsel %vm3222_vm15, %v3168_v0, %v926_v1  ;;  %v1151_v24 = vmax.f32 %v3206_v22, 1e-30  ;;  %v5187_v8 = vld [vmem:[#allocation12_spill] sm:$0xff] }
  0x5f   :  { %2315 = vlog2.f32 %v1148_v40  ;;  %v1119_v15 = vadd.f32 %v5184_v33, %v1087_v35  ;;  %v1120_v53 = vadd.f32 %v5185_v61, %v1088_v42  ;;  %v1121_v44 = vadd.f32 %v5186_v4, %v1089_v13 }
  0x60   :  { %5180 = vst [vmem:[#allocation5_spill] sm:$0xff] %v3273_v21  ;;  %v1090_v46 = vmul.f32 %v3273_v21, %v3273_v21  ;;  %2317 = vlog2.f32 %v1149_v12  ;;  %v5188_v28 = vmax.f32 %v5187_v8, 0.0  ;;  %v1125_v6 = vmul.f32 0.5, %v1109_v51  ;;  %v5194_v12 = vld [vmem:[#allocation22_spill] sm:$0xff] }
  0x61   :  { %v1152_v0 = vmax.f32 %v3228_v48, 1e-30  ;;  %2319 = vlog2.f32 %v1150_v19  ;;  %v5191_v47 = vmax.f32 %v5190_v63, 0.0  ;;  %v1126_v36 = vmul.f32 0.5, %v1110_v39 }
  0x62   :  { %v3293_v57 = vadd.f32 %v923_v23, %v5188_v28  ;;  %v1127_v30 = vmul.f32 0.5, %v1111_v20  ;;  %v1128_v35 = vmul.f32 0.5, %v1112_v32  ;;  %v1122_v10 = vadd.f32 %v5193_v3, %v1090_v46 }
  0x63   :  { %v3298_v18 = vadd.f32 %v932_v45, %v5191_v47  ;;  %v1153_v60 = vmax.f32 %v3246_v58, 1e-30  ;;  %2321 = vlog2.f32 %v1151_v24  ;;  %v1129_v41 = vmul.f32 0.5, %v1113_v25  ;;  %v3342_v47 = vld [vmem:[%s5108_s1 + $0x30] sm:$0xff] }
  0x64   :  { %5189 = vst [vmem:[#allocation6_spill] sm:$0xff] %v3293_v57  ;;  %v1091_v42 = vmul.f32 %v3293_v57, %v3293_v57  ;;  %v3304_v51 = vmul.f32 0.5, %v1114_v26  ;;  %v3306_v17 = vmul.f32 0.5, %v1115_v9  ;;  %v3308_v54 = vmul.f32 0.5, %v1116_v16 }
  0x65   :  { %5192 = vst [vmem:[#allocation7_spill] sm:$0xff] %v3298_v18  ;;  %v2302_v1 = vpop.eup %2301  ;;  %v1092_v39 = vmul.f32 %v3298_v18, %v3298_v18  ;;  %v3312_v20 = vmul.f32 0.5, %v1117_v27  ;;  %v1154_v32 = vmax.f32 %v3273_v21, 1e-30  ;;  %2323 = vlog2.f32 %v1152_v0 }
  0x66   :  { %v2304_v56 = vpop.eup %2303  ;;  %v3315_v40 = vmul.f32 0.5, %v1118_v37  ;;  %v3317_v13 = vmul.f32 0.5, %v1119_v15  ;;  %v3319_v25 = vmul.f32 0.5, %v1120_v53  ;;  %v1158_v26 = vmul.f32 0.6931472, %v2302_v1  ;;  %v5195_v53 = vld [vmem:[#allocation24_spill] sm:$0xff] }
  0x67   :  { %v2306_v9 = vpop.eup %2305  ;;  %v1123_v59 = vadd.f32 %v5194_v12, %v1091_v42  ;;  %v1155_v11 = vmax.f32 %v3293_v57, 1e-30  ;;  %v1160_v14 = vmul.f32 0.6931472, %v2304_v56  ;;  %2325 = vlog2.f32 %v1153_v60 }
  0x68   :  { %v2308_v16 = vpop.eup %2307  ;;  %v3328_v19 = vmul.f32 0.5, %v1121_v44  ;;  %v1156_v23 = vmax.f32 %v3298_v18, 1e-30  ;;  %v1162_v62 = vmul.f32 0.6931472, %v2306_v9  ;;  %v1189_v27 = vsub.f32 %v1125_v6, %v1158_v26  ;;  %v3337_v6 = vld [vmem:[%s5108_s1 + $0x28] sm:$0xff] }
  0x69   :  { %v2310_v50 = vpop.eup %2309  ;;  %v1164_v37 = vmul.f32 0.6931472, %v2308_v16  ;;  %2327 = vlog2.f32 %v1154_v32  ;;  %v1190_v45 = vsub.f32 %v1126_v36, %v1160_v14  ;;  %v5196_v4 = vand.u32 2147483647, %v5195_v53  ;;  %v3348_v26 = vld [vmem:[%s5108_s1 + $0x38] sm:$0xff] }
  0x6a   :  { %v2312_v24 = vpop.eup %2311  ;;  %v1166_v33 = vmul.f32 0.6931472, %v2310_v50  ;;  %v1191_v15 = vsub.f32 %v1127_v30, %v1162_v62  ;;  %v1985_v61 = vadd.f32 -0.5, %v1189_v27  ;;  %2329 = vlog2.f32 %v1155_v11 }
  0x6b   :  { %v131_v8 = vsub.f32 0.0, %v5196_v4  ;;  %v2314_v28 = vpop.eup %2313  ;;  %v1168_v44 = vmul.f32 0.6931472, %v2312_v24  ;;  %v1192_v0 = vsub.f32 %v1128_v35, %v1164_v37  ;;  %v1986_v63 = vadd.f32 -0.5, %v1190_v45  ;;  %v3360_v37 = vld [vmem:[%s5108_s1 + $0x40] sm:$0xff] }
  0x6c   :  { %v2316_v36 = vpop.eup %2315  ;;  %v1170_v30 = vmul.f32 0.6931472, %v2314_v28  ;;  %2331 = vlog2.f32 %v1156_v23  ;;  %v1193_v42 = vsub.f32 %v1129_v41, %v1166_v33  ;;  %v1987_v3 = vadd.f32 -0.5, %v1191_v15  ;;  %v5197_v41 = vld [vmem:[#allocation25_spill] sm:$0xff]  ;;  %v5200_v15 = vld [vmem:[#allocation26_spill] sm:$0xff] }
  0x6d   :  { %v2318_v60 = vpop.eup %2317  ;;  %v1172_v1 = vmul.f32 0.6931472, %v2316_v36  ;;  %v1194_v35 = vsub.f32 %v3304_v51, %v1168_v44  ;;  %v1988_v32 = vadd.f32 -0.5, %v1192_v0  ;;  %v1221_v56 = vadd.f32 %v1986_v63, %v1985_v61  ;;  %v3370_v36 = vld [vmem:[%s5108_s1 + $0x48] sm:$0xff] }
  0x6e   :  { %v2320_v9 = vpop.eup %2319  ;;  %v3350_v12 = vmul.f32 0.5, %v1122_v10  ;;  %v120_v11 = vand.u32 2147483647, %v3337_v6  ;;  %v121_v14 = vand.u32 2147483647, %v3342_v47  ;;  %v1195_v51 = vsub.f32 %v3306_v17, %v1170_v30  ;;  %v5199_v10 = vld [vmem:[#allocation23_spill] sm:$0xff] }
  0x6f   :  { %v5198_v16 = vand.u32 2147483647, %v5197_v41  ;;  %v1174_v62 = vmul.f32 0.6931472, %v2318_v60  ;;  %v1989_v27 = vadd.f32 -0.5, %v1193_v42  ;;  %v1222_v50 = vadd.f32 %v1987_v3, %v1221_v56  ;;  %v5202_v3 = vld [vmem:[#allocation27_spill] sm:$0xff] }
  0x70   :  { %v2322_v45 = vpop.eup %2321  ;;  %v1124_v24 = vadd.f32 %v5199_v10, %v1092_v39  ;;  %v122_v33 = vand.u32 2147483647, %v3348_v26  ;;  %v5201_v61 = vand.u32 2147483647, %v5200_v15  ;;  %v147_v28 = vmul.f32 1.442695, %v131_v8 }
  0x71   :  { %v132_v23 = vsub.f32 0.0, %v5198_v16  ;;  %v1176_v44 = vmul.f32 0.6931472, %v2320_v9  ;;  %v1196_v0 = vsub.f32 %v3308_v54, %v1172_v1  ;;  %v1990_v17 = vadd.f32 -0.5, %v1194_v35  ;;  %v3375_v39 = vld [vmem:[%s5108_s1 + $0x50] sm:$0xff]  ;;  %v3386_v16 = vld [vmem:[%s5108_s1 + $0x58] sm:$0xff] }
  0x72   :  { %v133_v4 = vsub.f32 0.0, %v5201_v61  ;;  %v1223_v63 = vadd.f32 %v1988_v32, %v1222_v50  ;;  %v2324_v30 = vpop.eup %2323  ;;  %v3377_v42 = vmul.f32 0.5, %v1123_v59  ;;  %v123_v8 = vand.u32 2147483647, %v3360_v37 }
  0x73   :  { %v5203_v60 = vand.u32 2147483647, %v5202_v3  ;;  %v149_v1 = vmul.f32 1.442695, %v132_v23  ;;  %v1178_v35 = vmul.f32 0.6931472, %v2322_v45  ;;  %v1197_v32 = vsub.f32 %v3312_v20, %v1174_v62 }
  0x74   :  { %v1991_v56 = vadd.f32 -0.5, %v1195_v51  ;;  %v1224_v9 = vadd.f32 %v1989_v27, %v1223_v63  ;;  %v2326_v50 = vpop.eup %2325  ;;  %v124_v59 = vand.u32 2147483647, %v3370_v36  ;;  %v125_v10 = vand.u32 2147483647, %v3375_v39  ;;  %v3394_v20 = vld [vmem:[%s5108_s1 + $0x60] sm:$0xff] }
  0x75   :  { %v134_v54 = vsub.f32 0.0, %v5203_v60  ;;  %2333 = vpow2.f32 %v147_v28  ;;  %v151_v61 = vmul.f32 1.442695, %v133_v4  ;;  %v1180_v46 = vmul.f32 0.6931472, %v2324_v30 }
  0x76   :  { %v1198_v23 = vsub.f32 %v3315_v40, %v1176_v44  ;;  %v1992_v45 = vadd.f32 -0.5, %v1196_v0  ;;  %v1225_v60 = vadd.f32 %v1990_v17, %v1224_v9  ;;  %v2328_v62 = vpop.eup %2327  ;;  %v126_v51 = vand.u32 2147483647, %v3386_v16 }
  0x77   :  { %v5204_v27 = vand.u32 2147483647, %v3324_v34  ;;  %2335 = vpow2.f32 %v149_v1  ;;  %v153_v18 = vmul.f32 1.442695, %v134_v54  ;;  %v1182_v28 = vmul.f32 0.6931472, %v2326_v50  ;;  %v2330_v44 = vpop.eup %2329 }
  0x78   :  { %v1199_v4 = vsub.f32 %v3317_v13, %v1178_v35  ;;  %v1993_v30 = vadd.f32 -0.5, %v1197_v32  ;;  %v1226_v40 = vadd.f32 %v1991_v56, %v1225_v60  ;;  %v127_v0 = vand.u32 2147483647, %v3394_v20 }
  0x79   :  { %v135_v63 = vsub.f32 0.0, %v5204_v27  ;;  %v136_v17 = vsub.f32 0.0, %v120_v11  ;;  %v137_v9 = vsub.f32 0.0, %v121_v14  ;;  %2337 = vpow2.f32 %v151_v61  ;;  %v2332_v57 = vpop.eup %2331  ;;  %v3406_v11 = vld [vmem:[%s5108_s1 + $0x68] sm:$0xff] }
  0x7a   :  { %v1184_v21 = vmul.f32 0.6931472, %v2328_v62  ;;  %v1200_v58 = vsub.f32 %v3319_v25, %v1180_v46  ;;  %v1994_v48 = vadd.f32 -0.5, %v1198_v23  ;;  %v1227_v22 = vadd.f32 %v1992_v45, %v1226_v40  ;;  %v3423_v40 = vld [vmem:[%s5108_s1 + $0x78] sm:$0xff] }
  0x7b   :  { %v138_v27 = vsub.f32 0.0, %v122_v33  ;;  %v139_v1 = vsub.f32 0.0, %v123_v8  ;;  %2339 = vpow2.f32 %v153_v18  ;;  %v155_v54 = vmul.f32 1.442695, %v135_v63  ;;  %5205 = vst [vmem:[#allocation8_spill] sm:$0xff] %v3423_v40 }
  0x7c   :  { %v1186_v50 = vmul.f32 0.6931472, %v2330_v44  ;;  %v1201_v13 = vsub.f32 %v3328_v19, %v1182_v28  ;;  %v1995_v35 = vadd.f32 -0.5, %v1199_v4  ;;  %v1228_v32 = vadd.f32 %v1993_v30, %v1227_v22 }
  0x7d   :  { %v1140_v14 = vmul.f32 0.5, %v1124_v24  ;;  %v140_v56 = vsub.f32 0.0, %v124_v59  ;;  %v157_v61 = vmul.f32 1.442695, %v136_v17  ;;  %v159_v25 = vmul.f32 1.442695, %v137_v9 }
  0x7e   :  { %v1188_v46 = vmul.f32 0.6931472, %v2332_v57  ;;  %v1202_v33 = vsub.f32 %v3350_v12, %v1184_v21  ;;  %v1996_v8 = vadd.f32 -0.5, %v1200_v58  ;;  %v1229_v18 = vadd.f32 %v1994_v48, %v1228_v32  ;;  %v3416_v48 = vld [vmem:[%s5108_s1 + $0x70] sm:$0xff]  ;;  %s5364_s1 = sld [smem:[#allocation53_spill]] }
  0x7f   :  { %v128_v23 = vand.u32 2147483647, %v3406_v11  ;;  %v141_v45 = vsub.f32 0.0, %v125_v10  ;;  %2341 = vpow2.f32 %v155_v54  ;;  %v161_v19 = vmul.f32 1.442695, %v138_v27 }
  0x80   :  { %v1203_v22 = vsub.f32 %v3377_v42, %v1186_v50  ;;  %v1997_v60 = vadd.f32 -0.5, %v1201_v13  ;;  %v1230_v62 = vadd.f32 %v1995_v35, %v1229_v18  ;;  %v163_v63 = vmul.f32 1.442695, %v139_v1 }
  0x81   :  { %v142_v28 = vsub.f32 0.0, %v126_v51  ;;  %v143_v24 = vsub.f32 0.0, %v127_v0  ;;  %2343 = vpow2.f32 %v157_v61  ;;  %v165_v59 = vmul.f32 1.442695, %v140_v56 }
  0x82   :  { %v3411_v4 = vpop.eup %2333  ;;  %v1204_v57 = vsub.f32 %v1140_v14, %v1188_v46  ;;  %v1998_v21 = vadd.f32 -0.5, %v1202_v33  ;;  %v1231_v58 = vadd.f32 %v1996_v8, %v1230_v62  ;;  %2345 = vpow2.f32 %v159_v25 }
  0x83   :  { %2347 = vpow2.f32 %v161_v19  ;;  %v167_v12 = vmul.f32 1.442695, %v141_v45  ;;  %v1999_v10 = vadd.f32 -0.5, %v1203_v22  ;;  %v144_v30 = vsub.f32 0.0, %v128_v23 }
  0x84   :  { %v3418_v42 = vpop.eup %2335  ;;  %v1232_v51 = vadd.f32 %v1997_v60, %v1231_v58  ;;  %2349 = vpow2.f32 %v163_v63  ;;  %v129_v44 = vand.u32 2147483647, %v3416_v48  ;;  %v169_v0 = vmul.f32 1.442695, %v142_v28 }
  0x85   :  { %2351 = vpow2.f32 %v165_v59  ;;  %v2000_v9 = vadd.f32 -0.5, %v1204_v57  ;;  %v171_v1 = vmul.f32 1.442695, %v143_v24  ;;  %v130_v14 = vand.u32 2147483647, %v3423_v40 }
  0x86   :  { %v3426_v17 = vpop.eup %2337  ;;  %v1233_v27 = vadd.f32 %v1998_v21, %v1232_v51  ;;  %2353 = vpow2.f32 %v167_v12  ;;  %v173_v56 = vmul.f32 1.442695, %v144_v30  ;;  %v145_v25 = vsub.f32 0.0, %v129_v44 }
  0x87   :  { %2355 = vpow2.f32 %v169_v0  ;;  %v179_v46 = vadd.f32 1.0, %v3411_v4  ;;  %v188_v18 = vadd.f32 1.0, %v3418_v42  ;;  %v197_v22 = vadd.f32 1.0, %v3426_v17 }
  0x88   :  { %v3430_v13 = vpop.eup %2339  ;;  %v1234_v35 = vadd.f32 %v1999_v10, %v1233_v27  ;;  %2357 = vpow2.f32 %v171_v1  ;;  %v146_v62 = vsub.f32 0.0, %v130_v14  ;;  %v182_v63 = vmul.f32 -0.5, %v3411_v4 }
  0x89   :  { %2359 = vpow2.f32 %v173_v56  ;;  %v206_v28 = vadd.f32 1.0, %v3430_v13  ;;  %v175_v57 = vmul.f32 1.442695, %v145_v25  ;;  %v191_v10 = vmul.f32 -0.5, %v3418_v42 }
  0x8a   :  { %v1235_v33 = vadd.f32 %v2000_v9, %v1234_v35  ;;  %2361 = vlog2.f32 %v179_v46  ;;  %v200_v44 = vmul.f32 -0.5, %v3426_v17  ;;  %v177_v1 = vmul.f32 1.442695, %v146_v62 }
  0x8b   :  { %2363 = vlog2.f32 %v188_v18  ;;  %v183_v35 = vadd.f32 1.0, %v182_v63  ;;  %v185_v25 = vand.u32 2147483647, %v3411_v4  ;;  %v192_v18 = vadd.f32 1.0, %v191_v10 }
  0x8c   :  { %v3442_v60 = vpop.eup %2341  ;;  %1236 = vadd.xlane.f32.xlu1 %v1235_v33  ;;  %2365 = vlog2.f32 %v197_v22  ;;  %v209_v22 = vmul.f32 -0.5, %v3430_v13  ;;  %v194_v63 = vand.u32 2147483647, %v3418_v42  ;;  %v203_v58 = vand.u32 2147483647, %v3426_v17 }
  0x8d   :  { %v215_v0 = vadd.f32 1.0, %v3442_v60  ;;  %2367 = vlog2.f32 %v206_v28  ;;  %v218_v30 = vmul.f32 -0.5, %v3442_v60  ;;  %v201_v28 = vadd.f32 1.0, %v200_v44 }
  0x8e   :  { %v3448_v21 = vpop.eup %2343  ;;  %2369 = vpow2.f32 %v175_v57  ;;  %v3477_v12 = vmul.f32 %v3411_v4, %v183_v35  ;;  %v212_v59 = vand.u32 2147483647, %v3430_v13  ;;  %v3486_v24 = vmul.f32 %v3418_v42, %v192_v18 }
  0x8f   :  { %v3453_v51 = vpop.eup %2345  ;;  %v224_v46 = vadd.f32 1.0, %v3448_v21  ;;  %2371 = vlog2.f32 %v215_v0  ;;  %v210_v19 = vadd.f32 1.0, %v209_v22  ;;  %v219_v27 = vadd.f32 1.0, %v218_v30 }
  0x90   :  { %v3458_v9 = vpop.eup %2347  ;;  %v233_v62 = vadd.f32 1.0, %v3453_v51  ;;  %2373 = vpow2.f32 %v177_v1  ;;  %vm3490_vm0 = vcmp.lt.f32.partialorder %v185_v25, 0.0004427343  ;;  %vm3494_vm1 = vcmp.lt.f32.partialorder %v194_v63, 0.0004427343 }
  0x91   :  { %v3461_v14 = vpop.eup %2349  ;;  %v242_v56 = vadd.f32 1.0, %v3458_v9  ;;  %2375 = vlog2.f32 %v224_v46  ;;  %v3499_v46 = vmul.f32 %v3426_v17, %v201_v28  ;;  %v227_v45 = vmul.f32 -0.5, %v3448_v21 }
  0x92   :  { %v3466_v33 = vpop.eup %2351  ;;  %v251_v10 = vadd.f32 1.0, %v3461_v14  ;;  %2377 = vlog2.f32 %v233_v62  ;;  %v221_v30 = vand.u32 2147483647, %v3442_v60  ;;  %v236_v18 = vmul.f32 -0.5, %v3453_v51 }
  0x93   :  { %v3473_v57 = vpop.eup %2353  ;;  %v260_v44 = vadd.f32 1.0, %v3466_v33  ;;  %2379 = vlog2.f32 %v242_v56  ;;  %v245_v25 = vmul.f32 -0.5, %v3458_v9  ;;  %vm3508_vm2 = vcmp.lt.f32.partialorder %v203_v58, 0.0004427343 }
  0x94   :  { %v3483_v0 = vpop.eup %2355  ;;  %v269_v42 = vadd.f32 1.0, %v3473_v57  ;;  %2381 = vlog2.f32 %v251_v10  ;;  %vm3512_vm3 = vcmp.lt.f32.partialorder %v212_v59, 0.0004427343  ;;  %v254_v56 = vmul.f32 -0.5, %v3461_v14 }
  0x95   :  { %v3488_v1 = vpop.eup %2357  ;;  %2383 = vlog2.f32 %v260_v44  ;;  %v278_v63 = vadd.f32 1.0, %v3483_v0  ;;  %v3519_v23 = vmul.f32 %v3430_v13, %v210_v19  ;;  %v3522_v10 = vmul.f32 %v3442_v60, %v219_v27 }
  0x96   :  { %v3506_v22 = vpop.eup %2359  ;;  %v230_v58 = vand.u32 2147483647, %v3448_v21  ;;  %v287_v8 = vadd.f32 1.0, %v3488_v1  ;;  %v228_v61 = vadd.f32 1.0, %v227_v45  ;;  %v239_v32 = vand.u32 2147483647, %v3453_v51 }
  0x97   :  { %v2362_v28 = vpop.eup %2361  ;;  %v263_v50 = vmul.f32 -0.5, %v3466_v33  ;;  %2385 = vlog2.f32 %v269_v42  ;;  %vm3528_vm4 = vcmp.lt.f32.partialorder %v221_v30, 0.0004427343  ;;  %v237_v13 = vadd.f32 1.0, %v236_v18 }
  0x98   :  { %v2364_v59 = vpop.eup %2363  ;;  %v246_v19 = vadd.f32 1.0, %v245_v25  ;;  %v248_v60 = vand.u32 2147483647, %v3458_v9  ;;  %v257_v27 = vand.u32 2147483647, %v3461_v14  ;;  %v255_v7 = vadd.f32 1.0, %v254_v56 }
  0x99   :  { %v2366_v44 = vpop.eup %2365  ;;  %v266_v45 = vand.u32 2147483647, %v3466_v33  ;;  %2387 = vlog2.f32 %v278_v63  ;;  %v296_v5 = vadd.f32 1.0, %v3506_v22  ;;  %v3538_v42 = vmul.f32 0.6931472, %v2362_v28 }
  0x9a   :  { %v2368_v38 = vpop.eup %2367  ;;  %v3540_v30 = vmul.f32 0.6931472, %v2364_v59  ;;  %v272_v18 = vmul.f32 -0.5, %v3473_v57  ;;  %2389 = vlog2.f32 %v287_v8  ;;  %v3544_v25 = vmul.f32 %v3448_v21, %v228_v61 }
  0x9b   :  { %v3536_v2 = vpop.eup %2369  ;;  %vm3546_vm5 = vcmp.lt.f32.partialorder %v230_v58, 0.0004427343  ;;  %vm3550_vm6 = vcmp.lt.f32.partialorder %v239_v32, 0.0004427343  ;;  %v264_v63 = vadd.f32 1.0, %v263_v50  ;;  %v3559_v31 = vmul.f32 %v3453_v51, %v237_v13 }
  0x9c   :  { %v2372_v55 = vpop.eup %2371  ;;  %v3554_v28 = vmul.f32 0.6931472, %v2366_v44  ;;  %v3556_v59 = vmul.f32 0.6931472, %v2368_v38  ;;  %v275_v61 = vand.u32 2147483647, %v3473_v57  ;;  %v3565_v21 = vmul.f32 %v3458_v9, %v246_v19 }
  0x9d   :  { %v3562_v8 = vpop.eup %2373  ;;  %vm3567_vm7 = vcmp.lt.f32.partialorder %v248_v60, 0.0004427343  ;;  %v3572_v50 = vmul.f32 %v3461_v14, %v255_v7  ;;  %vm3574_vm8 = vcmp.lt.f32.partialorder %v257_v27, 0.0004427343  ;;  %2391 = vlog2.f32 %v296_v5 }
  0x9e   :  { %v2376_v51 = vpop.eup %2375  ;;  %v187_v58 = vsel %vm3490_vm0, %v3477_v12, %v3538_v42  ;;  %v196_v9 = vsel %vm3494_vm1, %v3486_v24, %v3540_v30  ;;  %vm3586_vm9 = vcmp.lt.f32.partialorder %v266_v45, 0.0004427343  ;;  %v273_v7 = vadd.f32 1.0, %v272_v18 }
  0x9f   :  { %v281_v14 = vmul.f32 -0.5, %v3483_v0  ;;  %v2378_v13 = vpop.eup %2377  ;;  %v217_v5 = vmul.f32 0.6931472, %v2372_v55  ;;  %v3592_v19 = vmul.f32 %v3466_v33, %v264_v63  ;;  %v290_v4 = vmul.f32 -0.5, %v3488_v1 }
  0xa0   :  { %v305_v12 = vadd.f32 1.0, %v3536_v2  ;;  %v2380_v60 = vpop.eup %2379  ;;  %v205_v24 = vsel %vm3508_vm2, %v3499_v46, %v3554_v28  ;;  %v214_v35 = vsel %vm3512_vm3, %v3519_v23, %v3556_v59  ;;  %vm3604_vm10 = vcmp.lt.f32.partialorder %v275_v61, 0.0004427343 }
  0xa1   :  { %v299_v33 = vmul.f32 -0.5, %v3506_v22  ;;  %v2382_v27 = vpop.eup %2381  ;;  %v226_v45 = vmul.f32 0.6931472, %v2376_v51  ;;  %v284_v42 = vand.u32 2147483647, %v3483_v0  ;;  %v308_v30 = vmul.f32 -0.5, %v3536_v2 }
  0xa2   :  { %v314_v62 = vadd.f32 1.0, %v3562_v8  ;;  %v2384_v46 = vpop.eup %2383  ;;  %v235_v18 = vmul.f32 0.6931472, %v2378_v13  ;;  %v274_v63 = vmul.f32 %v3473_v57, %v273_v7  ;;  %v282_v17 = vadd.f32 1.0, %v281_v14 }
  0xa3   :  { %v293_v23 = vand.u32 2147483647, %v3488_v1  ;;  %v223_v28 = vsel %vm3528_vm4, %v3522_v10, %v217_v5  ;;  %v291_v59 = vadd.f32 1.0, %v290_v4  ;;  %v302_v61 = vand.u32 2147483647, %v3506_v22 }
  0xa4   :  { %2393 = vlog2.f32 %v305_v12  ;;  %v2386_v51 = vpop.eup %2385  ;;  %v244_v43 = vmul.f32 0.6931472, %v2380_v60  ;;  %v253_v29 = vmul.f32 0.6931472, %v2382_v27  ;;  %v300_v49 = vadd.f32 1.0, %v299_v33 }
  0xa5   :  { %v317_v40 = vmul.f32 -0.5, %v3562_v8  ;;  %v262_v13 = vmul.f32 0.6931472, %v2384_v46  ;;  %vm3619_vm11 = vcmp.lt.f32.partialorder %v284_v42, 0.0004427343  ;;  %v309_v7 = vadd.f32 1.0, %v308_v30 }
  0xa6   :  { %2395 = vlog2.f32 %v314_v62  ;;  %v2388_v14 = vpop.eup %2387  ;;  %v232_v54 = vsel %vm3546_vm5, %v3544_v25, %v226_v45  ;;  %v241_v10 = vsel %vm3550_vm6, %v3559_v31, %v235_v18  ;;  %v283_v5 = vmul.f32 %v3483_v0, %v282_v17 }
  0xa7   :  { %vm3630_vm12 = vcmp.lt.f32.partialorder %v293_v23, 0.0004427343  ;;  %v2390_v12 = vpop.eup %2389  ;;  %v271_v60 = vmul.f32 0.6931472, %v2386_v51  ;;  %v292_v33 = vmul.f32 %v3488_v1, %v291_v59  ;;  %vm3635_vm13 = vcmp.lt.f32.partialorder %v302_v61, 0.0004427343 }
  0xa8   :  { %v311_v52 = vand.u32 2147483647, %v3536_v2  ;;  %v250_v31 = vsel %vm3567_vm7, %v3565_v21, %v244_v43  ;;  %v259_v0 = vsel %vm3574_vm8, %v3572_v50, %v253_v29  ;;  %v301_v25 = vmul.f32 %v3506_v22, %v300_v49  ;;  %v68_v59 = vld [vmem:[%s5256_s29 + $0x8] sm:$0xff]  ;;  %v69_v61 = vld [vmem:[%s5256_s29 + $0x10] sm:$0xff] }
  0xa9   :  { %v318_v56 = vadd.f32 1.0, %v317_v40  ;;  %v268_v1 = vsel %vm3586_vm9, %v3592_v19, %v262_v13  ;;  %v280_v45 = vmul.f32 0.6931472, %v2388_v14  ;;  %v3651_v42 = vmul.f32 %v3536_v2, %v309_v7 }
  0xaa   :  { %v320_v30 = vand.u32 2147483647, %v3562_v8  ;;  %v2392_v62 = vpop.eup %2391  ;;  %v289_v32 = vmul.f32 0.6931472, %v2390_v12  ;;  %v5234_v43 = vmax.f32 %v5195_v53, 0.0  ;;  %v5236_v29 = vmax.f32 %v5197_v41, 0.0 }
  0xab   :  { %v5238_v40 = vmax.f32 %v5200_v15, 0.0  ;;  %v277_v2 = vsel %vm3604_vm10, %v274_v63, %v271_v60  ;;  %v5240_v50 = vmax.f32 %v5202_v3, 0.0  ;;  %v5242_v44 = vmax.f32 %v3324_v34, 0.0  ;;  %v5270_v63 = vld [vmem:[#allocation8_spill] sm:$0xff] }
  0xac   :  { %v3656_v21 = vadd.f32 %v187_v58, %v5234_v43  ;;  %v3660_v49 = vadd.f32 %v196_v9, %v5236_v29  ;;  %v5244_v58 = vmax.f32 %v3337_v6, 0.0  ;;  %vm3680_vm14 = vcmp.lt.f32.partialorder %v311_v52, 0.0004427343 }
  0xad   :  { %v3664_v22 = vadd.f32 %v205_v24, %v5238_v40  ;;  %v3670_v38 = vadd.f32 %v214_v35, %v5240_v50  ;;  %v3674_v53 = vadd.f32 %v223_v28, %v5242_v44  ;;  %v3685_v15 = vmul.f32 %v3562_v8, %v318_v56  ;;  %v76_v50 = vld [vmem:[%s5256_s29 + $0x48] sm:$0xff] }
  0xae   :  { %5235 = vst [vmem:[#allocation10_spill] sm:$0xff] %v3656_v21  ;;  %5237 = vst [vmem:[#allocation11_spill] sm:$0xff] %v3660_v49  ;;  %v3678_v41 = vadd.f32 %v232_v54, %v5244_v58  ;;  %v5248_v19 = vmax.f32 %v3342_v47, 0.0  ;;  %v5250_v24 = vmax.f32 %v3348_v26, 0.0  ;;  %v5252_v35 = vmax.f32 %v3360_v37, 0.0  ;;  %v67_v26 = vld [vmem:[%s5256_s29] sm:$0xff] }
  0xaf   :  { %5239 = vst [vmem:[#allocation13_spill] sm:$0xff] %v3664_v22  ;;  %5241 = vst [vmem:[#allocation9_spill] sm:$0xff] %v3670_v38  ;;  %v286_v55 = vsel %vm3619_vm11, %v283_v5, %v280_v45  ;;  %v298_v46 = vmul.f32 0.6931472, %v2392_v62  ;;  %v5254_v18 = vmax.f32 %v3370_v36, 0.0  ;;  %v3707_v47 = vmul.f32 %v3656_v21, %v3656_v21  ;;  %v71_v54 = vld [vmem:[%s5256_s29 + $0x20] sm:$0xff] }
  0xb0   :  { %5243 = vst [vmem:[#allocation14_spill] sm:$0xff] %v3674_v53  ;;  %5245 = vst [vmem:[#allocation15_spill] sm:$0xff] %v3678_v41  ;;  %v3689_v3 = vadd.f32 %v241_v10, %v5248_v19  ;;  %v3693_v34 = vadd.f32 %v250_v31, %v5250_v24  ;;  %v3697_v6 = vadd.f32 %v259_v0, %v5252_v35  ;;  %vm3714_vm15 = vcmp.lt.f32.partialorder %v320_v30, 0.0004427343  ;;  %v73_v45 = vld [vmem:[%s5256_s29 + $0x30] sm:$0xff]  ;;  %v74_v30 = vld [vmem:[%s5256_s29 + $0x38] sm:$0xff] }
  0xb1   :  { %v3703_v8 = vadd.f32 %v268_v1, %v5254_v18  ;;  %v295_v37 = vsel %vm3630_vm12, %v292_v33, %v289_v32  ;;  %v5259_v17 = vmax.f32 %v3375_v39, 0.0  ;;  %v3724_v23 = vmul.f32 %v3660_v49, %v3660_v49  ;;  %v70_v39 = vld [vmem:[%s5256_s29 + $0x18] sm:$0xff]  ;;  %v2394_v14 = vpop.eup %2393  ;;  %v72_v33 = vld [vmem:[%s5256_s29 + $0x28] sm:$0xff] }
  0xb2   :  { %5249 = vst [vmem:[#allocation16_spill] sm:$0xff] %v3689_v3  ;;  %5251 = vst [vmem:[#allocation18_spill] sm:$0xff] %v3693_v34  ;;  %v3728_v28 = vmul.f32 %v3664_v22, %v3664_v22  ;;  %v3741_v51 = vmul.f32 %v3670_v38, %v3670_v38  ;;  %v3745_v13 = vmul.f32 %v3674_v53, %v3674_v53  ;;  %v5261_v10 = vmax.f32 %v3386_v16, 0.0 }
  0xb3   :  { %5253 = vst [vmem:[#allocation19_spill] sm:$0xff] %v3697_v6  ;;  %5255 = vst [vmem:[#allocation20_spill] sm:$0xff] %v3703_v8  ;;  %v3720_v36 = vadd.f32 %v277_v2, %v5259_v17  ;;  %v3749_v57 = vmul.f32 %v3678_v41, %v3678_v41  ;;  %v3753_v7 = vmul.f32 %v3689_v3, %v3689_v3  ;;  %v5263_v52 = vmax.f32 %v3394_v20, 0.0  ;;  %v2396_v1 = vpop.eup %2395  ;;  %v75_v20 = vld [vmem:[%s5256_s29 + $0x40] sm:$0xff] }
  0xb4   :  { %v3760_v5 = vadd.f32 %v286_v55, %v5261_v10  ;;  %v3764_v4 = vmul.f32 %v3693_v34, %v3693_v34  ;;  %v3768_v12 = vmul.f32 %v3697_v6, %v3697_v6  ;;  %v3772_v60 = vmul.f32 %v3703_v8, %v3703_v8  ;;  %v77_v55 = vld [vmem:[%s5256_s29 + $0x50] sm:$0xff]  ;;  %v3831_v10 = vld [vmem:[%s5267_s0] sm:$0x1] }
  0xb5   :  { %5260 = vst [vmem:[#allocation12_spill] sm:$0xff] %v3720_v36  ;;  %v304_v16 = vsel %vm3635_vm13, %v301_v25, %v298_v46  ;;  %v3781_v31 = vadd.f32 %v295_v37, %v5263_v52  ;;  %v3785_v0 = vmul.f32 %v3720_v36, %v3720_v36  ;;  %v483_v56 = vmul.f32 %v67_v26, %v67_v26  ;;  %v78_v46 = vld [vmem:[%s5256_s29 + $0x58] sm:$0xff] }
  0xb6   :  { %5262 = vst [vmem:[#allocation17_spill] sm:$0xff] %v3760_v5  ;;  %v3798_v27 = vmul.f32 %v3760_v5, %v3760_v5  ;;  %v484_v25 = vmul.f32 %v68_v59, %v68_v59  ;;  %v485_v62 = vmul.f32 %v69_v61, %v69_v61  ;;  %v486_v32 = vmul.f32 %v70_v39, %v70_v39  ;;  %v3822_v61 = vld [vmem:[%s5007_s10] sm:$0x1]  ;;  %s5365_s10 = sld [smem:[#allocation56_spill]] }
  0xb7   :  { %5264 = vst [vmem:[#allocation21_spill] sm:$0xff] %v3781_v31  ;;  %v307_v43 = vmul.f32 0.6931472, %v2394_v14  ;;  %v487_v29 = vmul.f32 %v71_v54, %v71_v54  ;;  %v531_v40 = vmax.f32 %v3656_v21, 1e-30  ;;  %v5265_v44 = vmax.f32 %v3406_v11, 0.0 }
  0xb8   :  { %v532_v2 = vmax.f32 %v3660_v49, 1e-30  ;;  %v488_v19 = vmul.f32 %v72_v33, %v72_v33  ;;  %v533_v24 = vmax.f32 %v3664_v22, 1e-30  ;;  %v534_v35 = vmax.f32 %v3670_v38, 1e-30 }
  0xb9   :  { %v3807_v58 = vadd.f32 %v304_v16, %v5265_v44  ;;  %v316_v18 = vmul.f32 0.6931472, %v2396_v1  ;;  %v489_v26 = vmul.f32 %v73_v45, %v73_v45  ;;  %v535_v37 = vmax.f32 %v3674_v53, 1e-30 }
  0xba   :  { %2397 = vlog2.f32 %v531_v40  ;;  %v490_v11 = vmul.f32 %v74_v30, %v74_v30  ;;  %v491_v17 = vmul.f32 %v75_v20, %v75_v20  ;;  %v536_v59 = vmax.f32 %v3678_v41, 1e-30 }
  0xbb   :  { %5266 = vst [vmem:[#allocation22_spill] sm:$0xff] %v3807_v58  ;;  %2399 = vlog2.f32 %v532_v2  ;;  %v313_v39 = vsel %vm3680_vm14, %v3651_v42, %v307_v43  ;;  %v492_v14 = vmul.f32 %v76_v50, %v76_v50  ;;  %v537_v54 = vmax.f32 %v3689_v3, 1e-30  ;;  %v3841_v42 = vld [vmem:[%s5013_s16] sm:$0x1] }
  0xbc   :  { %2401 = vlog2.f32 %v533_v24  ;;  %v3833_v33 = vmul.f32 %v77_v55, %v77_v55  ;;  %v3835_v16 = vmul.f32 %v78_v46, %v78_v46  ;;  %v538_v52 = vmax.f32 %v3693_v34, 1e-30 }
  0xbd   :  { %2403 = vlog2.f32 %v534_v35  ;;  %v322_v9 = vsel %vm3714_vm15, %v3685_v15, %v316_v18  ;;  %v539_v1 = vmax.f32 %v3697_v6, 1e-30  ;;  %v1249_v45 = vand.u32 2147483647, %v3822_v61 }
  0xbe   :  { %2405 = vlog2.f32 %v535_v37  ;;  %v5268_v30 = vmax.f32 %v3416_v48, 0.0  ;;  %v540_v43 = vmax.f32 %v3703_v8, 1e-30  ;;  %v638_v40 = vand.u32 2147483647, %v3831_v10 }
  0xbf   :  { %2407 = vlog2.f32 %v536_v59  ;;  %v499_v2 = vadd.f32 %v483_v56, %v3707_v47  ;;  %v500_v50 = vadd.f32 %v484_v25, %v3724_v23  ;;  %v1859_v15 = vand.u32 2147483647, %v3841_v42 }
  0xc0   :  { %v3850_v20 = vadd.f32 %v313_v39, %v5268_v30  ;;  %2409 = vlog2.f32 %v537_v54  ;;  %v5271_v44 = vmax.f32 %v5270_v63, 0.0  ;;  %v501_v48 = vadd.f32 %v485_v62, %v3728_v28 }
  0xc1   :  { %v541_v35 = vmax.f32 %v3720_v36, 1e-30  ;;  %2411 = vlog2.f32 %v538_v52  ;;  %v502_v55 = vadd.f32 %v486_v32, %v3741_v51  ;;  %v503_v46 = vadd.f32 %v487_v29, %v3745_v13 }
  0xc2   :  { %5269 = vst [vmem:[#allocation24_spill] sm:$0xff] %v3850_v20  ;;  %v3859_v24 = vadd.f32 %v322_v9, %v5271_v44  ;;  %2413 = vlog2.f32 %v539_v1  ;;  %v1250_v47 = vsub.f32 0.0, %v1249_v45  ;;  %v504_v23 = vadd.f32 %v488_v19, %v3749_v57 }
  0xc3   :  { %v542_v56 = vmax.f32 %v3760_v5, 1e-30  ;;  %2415 = vlog2.f32 %v540_v43  ;;  %v639_v25 = vsub.f32 0.0, %v638_v40  ;;  %v505_v18 = vadd.f32 %v489_v26, %v3753_v7 }
  0xc4   :  { %5272 = vst [vmem:[#allocation25_spill] sm:$0xff] %v3859_v24  ;;  %v506_v37 = vadd.f32 %v490_v11, %v3764_v4  ;;  %v543_v28 = vmax.f32 %v3781_v31, 1e-30  ;;  %v1860_v62 = vsub.f32 0.0, %v1859_v15  ;;  %v507_v59 = vadd.f32 %v491_v17, %v3768_v12 }
  0xc5   :  { %v3872_v51 = vadd.f32 %v492_v14, %v3772_v60  ;;  %v544_v13 = vmax.f32 %v3807_v58, 1e-30  ;;  %2417 = vlog2.f32 %v541_v35  ;;  %v515_v57 = vmul.f32 0.5, %v499_v2 }
  0xc6   :  { %v516_v32 = vmul.f32 0.5, %v500_v50  ;;  %v517_v29 = vmul.f32 0.5, %v501_v48  ;;  %v1251_v19 = vmul.f32 1.442695, %v1250_v47  ;;  %v518_v54 = vmul.f32 0.5, %v502_v55 }
  0xc7   :  { %v2398_v39 = vpop.eup %2397  ;;  %v519_v7 = vmul.f32 0.5, %v503_v46  ;;  %2419 = vlog2.f32 %v542_v56  ;;  %v640_v4 = vmul.f32 1.442695, %v639_v25  ;;  %v520_v11 = vmul.f32 0.5, %v504_v23  ;;  %v79_v46 = vld [vmem:[%s5256_s29 + $0x60] sm:$0xff] }
  0xc8   :  { %v2400_v26 = vpop.eup %2399  ;;  %v548_v52 = vmul.f32 0.6931472, %v2398_v39  ;;  %2421 = vlog2.f32 %v543_v28  ;;  %v1861_v12 = vmul.f32 1.442695, %v1860_v62  ;;  %v3875_v60 = vmul.f32 0.5, %v505_v18 }
  0xc9   :  { %v2402_v17 = vpop.eup %2401  ;;  %v545_v14 = vmax.f32 %v3850_v20, 1e-30  ;;  %v550_v9 = vmul.f32 0.6931472, %v2400_v26  ;;  %2423 = vlog2.f32 %v544_v13  ;;  %v546_v45 = vmax.f32 %v3859_v24, 1e-30 }
  0xca   :  { %v2404_v1 = vpop.eup %2403  ;;  %v552_v30 = vmul.f32 0.6931472, %v2402_v17  ;;  %v579_v43 = vsub.f32 %v515_v57, %v548_v52  ;;  %2425 = vpow2.f32 %v1251_v19  ;;  %v3879_v2 = vmul.f32 0.5, %v506_v37  ;;  %v80_v13 = vld [vmem:[%s5256_s29 + $0x68] sm:$0xff] }
  0xcb   :  { %v2406_v40 = vpop.eup %2405  ;;  %v554_v50 = vmul.f32 0.6931472, %v2404_v1  ;;  %v580_v15 = vsub.f32 %v516_v32, %v550_v9  ;;  %2427 = vpow2.f32 %v640_v4  ;;  %v479_v4 = vmul.f32 %v3781_v31, %v3781_v31 }
  0xcc   :  { %v2408_v63 = vpop.eup %2407  ;;  %v556_v44 = vmul.f32 0.6931472, %v2406_v40  ;;  %v581_v48 = vsub.f32 %v517_v29, %v552_v30  ;;  %v1952_v35 = vadd.f32 -0.5, %v579_v43  ;;  %2429 = vpow2.f32 %v1861_v12 }
  0xcd   :  { %v2410_v55 = vpop.eup %2409  ;;  %v558_v47 = vmul.f32 0.6931472, %v2408_v63  ;;  %2431 = vlog2.f32 %v545_v14  ;;  %v582_v23 = vsub.f32 %v518_v54, %v554_v50  ;;  %v1953_v56 = vadd.f32 -0.5, %v580_v15 }
  0xce   :  { %v2412_v25 = vpop.eup %2411  ;;  %v560_v18 = vmul.f32 0.6931472, %v2410_v55  ;;  %2433 = vlog2.f32 %v546_v45  ;;  %v583_v37 = vsub.f32 %v519_v7, %v556_v44  ;;  %v1954_v28 = vadd.f32 -0.5, %v581_v48  ;;  %v81_v7 = vld [vmem:[%s5256_s29 + $0x70] sm:$0xff] }
  0xcf   :  { %v2414_v62 = vpop.eup %2413  ;;  %v562_v57 = vmul.f32 0.6931472, %v2412_v25  ;;  %v584_v32 = vsub.f32 %v520_v11, %v558_v47  ;;  %v1955_v29 = vadd.f32 -0.5, %v582_v23  ;;  %v611_v19 = vadd.f32 %v1953_v56, %v1952_v35 }
  0xd0   :  { %v2416_v39 = vpop.eup %2415  ;;  %v495_v54 = vmul.f32 %v79_v46, %v79_v46  ;;  %v509_v26 = vadd.f32 %v3833_v33, %v3785_v0  ;;  %v523_v52 = vmul.f32 0.5, %v507_v59  ;;  %v564_v12 = vmul.f32 0.6931472, %v2414_v62  ;;  %v82_v33 = vld [vmem:[%s5256_s29 + $0x78] sm:$0xff] }
  0xd1   :  { %v585_v17 = vsub.f32 %v3875_v60, %v560_v18  ;;  %v1956_v14 = vadd.f32 -0.5, %v583_v37  ;;  %v612_v11 = vadd.f32 %v1954_v28, %v611_v19  ;;  %v480_v1 = vmul.f32 %v3807_v58, %v3807_v58 }
  0xd2   :  { %v2418_v9 = vpop.eup %2417  ;;  %v496_v45 = vmul.f32 %v80_v13, %v80_v13  ;;  %v510_v30 = vadd.f32 %v3835_v16, %v3798_v27  ;;  %v524_v0 = vmul.f32 0.5, %v3872_v51  ;;  %v566_v59 = vmul.f32 0.6931472, %v2416_v39 }
  0xd3   :  { %v586_v43 = vsub.f32 %v3879_v2, %v562_v57  ;;  %v1957_v60 = vadd.f32 -0.5, %v584_v32  ;;  %v613_v40 = vadd.f32 %v1955_v29, %v612_v11  ;;  %v481_v15 = vmul.f32 %v3850_v20, %v3850_v20 }
  0xd4   :  { %v2420_v50 = vpop.eup %2419  ;;  %v497_v63 = vmul.f32 %v81_v7, %v81_v7  ;;  %v511_v44 = vadd.f32 %v495_v54, %v479_v4  ;;  %v525_v48 = vmul.f32 0.5, %v509_v26  ;;  %v568_v27 = vmul.f32 0.6931472, %v2418_v9 }
  0xd5   :  { %v2422_v35 = vpop.eup %2421  ;;  %v587_v16 = vsub.f32 %v523_v52, %v564_v12  ;;  %v1958_v51 = vadd.f32 -0.5, %v585_v17  ;;  %v614_v55 = vadd.f32 %v1956_v14, %v613_v40  ;;  %v482_v47 = vmul.f32 %v3859_v24, %v3859_v24 }
  0xd6   :  { %v2424_v46 = vpop.eup %2423  ;;  %v498_v23 = vmul.f32 %v82_v33, %v82_v33  ;;  %v512_v2 = vadd.f32 %v496_v45, %v480_v1  ;;  %v526_v56 = vmul.f32 0.5, %v510_v30  ;;  %v570_v18 = vmul.f32 0.6931472, %v2420_v50 }
  0xd7   :  { %v2426_v25 = vpop.eup %2425  ;;  %v588_v37 = vsub.f32 %v524_v0, %v566_v59  ;;  %v1959_v28 = vadd.f32 -0.5, %v586_v43  ;;  %v615_v62 = vadd.f32 %v1957_v60, %v614_v55  ;;  %v513_v57 = vadd.f32 %v497_v63, %v481_v15 }
  0xd8   :  { %v3908_v13 = vpop.eup %2427  ;;  %v527_v32 = vmul.f32 0.5, %v511_v44  ;;  %v1253_v29 = vadd.f32 1.0, %v2426_v25  ;;  %v572_v39 = vmul.f32 0.6931472, %v2422_v35  ;;  %v589_v4 = vsub.f32 %v525_v48, %v568_v27 }
  0xd9   :  { %v3910_v19 = vpop.eup %2429  ;;  %v1960_v54 = vadd.f32 -0.5, %v587_v16  ;;  %v616_v26 = vadd.f32 %v1958_v51, %v615_v62  ;;  %v514_v7 = vadd.f32 %v498_v23, %v482_v47  ;;  %v528_v12 = vmul.f32 0.5, %v512_v2 }
  0xda   :  { %v2432_v52 = vpop.eup %2431  ;;  %2435 = vlog2.f32 %v1253_v29  ;;  %v642_v17 = vadd.f32 1.0, %v3908_v13  ;;  %v574_v11 = vmul.f32 0.6931472, %v2424_v46  ;;  %v590_v9 = vsub.f32 %v526_v56, %v570_v18  ;;  %v3919_v18 = vld [vmem:[%s5010_s13] sm:$0xff] }
  0xdb   :  { %v2434_v14 = vpop.eup %2433  ;;  %v1961_v1 = vadd.f32 -0.5, %v588_v37  ;;  %v617_v45 = vadd.f32 %v1959_v28, %v616_v26  ;;  %v529_v30 = vmul.f32 0.5, %v513_v57  ;;  %v1863_v0 = vadd.f32 1.0, %v3910_v19 }
  0xdc   :  { %2437 = vlog2.f32 %v642_v17  ;;  %v576_v33 = vmul.f32 0.6931472, %v2432_v52  ;;  %v591_v59 = vsub.f32 %v527_v32, %v572_v39  ;;  %v1962_v43 = vadd.f32 -0.5, %v589_v4  ;;  %v3926_v4 = vld [vmem:[%s5010_s13 + $0x8] sm:$0xff] }
  0xdd   :  { %v618_v60 = vadd.f32 %v1960_v54, %v617_v45  ;;  %v530_v40 = vmul.f32 0.5, %v514_v7  ;;  %v1256_v50 = vmul.f32 -0.5, %v2426_v25  ;;  %2439 = vlog2.f32 %v1863_v0  ;;  %v3931_v54 = vld [vmem:[%s5010_s13 + $0x10] sm:$0xff] }
  0xde   :  { %v578_v15 = vmul.f32 0.6931472, %v2434_v14  ;;  %v592_v63 = vsub.f32 %v528_v12, %v574_v11  ;;  %v1963_v44 = vadd.f32 -0.5, %v590_v9  ;;  %v645_v35 = vmul.f32 -0.5, %v3908_v13 }
  0xdf   :  { %v619_v48 = vadd.f32 %v1961_v1, %v618_v60  ;;  %v593_v27 = vsub.f32 %v529_v30, %v576_v33  ;;  %v1964_v16 = vadd.f32 -0.5, %v591_v59  ;;  %v1257_v55 = vadd.f32 1.0, %v1256_v50 }
  0xe0   :  { %v1866_v46 = vmul.f32 -0.5, %v3910_v19  ;;  %v594_v47 = vsub.f32 %v530_v40, %v578_v15  ;;  %v1965_v23 = vadd.f32 -0.5, %v592_v63  ;;  %v1259_v56 = vand.u32 2147483647, %v2426_v25 }
  0xe1   :  { %v620_v51 = vadd.f32 %v1962_v43, %v619_v48  ;;  %v646_v37 = vadd.f32 1.0, %v645_v35  ;;  %v1966_v28 = vadd.f32 -0.5, %v593_v27  ;;  %v648_v57 = vand.u32 2147483647, %v3908_v13 }
  0xe2   :  { %v1248_v32 = vmax.f32 %v3822_v61, 0.0  ;;  %v1258_v29 = vmul.f32 %v2426_v25, %v1257_v55  ;;  %v1867_v39 = vadd.f32 1.0, %v1866_v46  ;;  %v1335_v26 = vand.u32 2147483647, %v3919_v18  ;;  %v3942_v25 = vld [vmem:[%s5010_s13 + $0x18] sm:$0xff] }
  0xe3   :  { %v621_v2 = vadd.f32 %v1963_v44, %v620_v51  ;;  %v1967_v7 = vadd.f32 -0.5, %v594_v47  ;;  %vm3934_vm0 = vcmp.lt.f32.partialorder %v1259_v56, 0.0004427343  ;;  %v1869_v61 = vand.u32 2147483647, %v3910_v19  ;;  %v3986_v56 = vld [vmem:[%s5010_s13 + $0x28] sm:$0xff] }
  0xe4   :  { %v637_v11 = vmax.f32 %v3831_v10, 0.0  ;;  %v647_v9 = vmul.f32 %v3908_v13, %v646_v37  ;;  %vm3946_vm1 = vcmp.lt.f32.partialorder %v648_v57, 0.0004427343  ;;  %v1336_v0 = vand.u32 2147483647, %v3926_v4  ;;  %v3958_v10 = vld [vmem:[%s5010_s13 + $0x20] sm:$0xff] }
  0xe5   :  { %v622_v62 = vadd.f32 %v1964_v16, %v621_v2  ;;  %v1337_v33 = vand.u32 2147483647, %v3931_v54  ;;  %v1868_v60 = vmul.f32 %v3910_v19, %v1867_v39  ;;  %v1338_v13 = vand.u32 2147483647, %v3942_v25  ;;  %v1246_v46 = vld [vmem:[%s5006_s9] sm:$0x1] }
  0xe6   :  { %vm3963_vm2 = vcmp.lt.f32.partialorder %v1869_v61, 0.0004427343  ;;  %v1351_v44 = vsub.f32 0.0, %v1335_v26  ;;  %v1858_v19 = vmax.f32 %v3841_v42, 0.0  ;;  %v1339_v51 = vand.u32 2147483647, %v3958_v10 }
  0xe7   :  { %v2436_v52 = vpop.eup %2435  ;;  %v623_v12 = vadd.f32 %v1965_v23, %v622_v62  ;;  %v1352_v55 = vsub.f32 0.0, %v1336_v0  ;;  %v635_v47 = vld [vmem:[%s5281_s26] sm:$0x1]  ;;  %v1353_v23 = vsub.f32 0.0, %v1337_v33  ;;  %v1354_v37 = vsub.f32 0.0, %v1338_v13  ;;  %v3993_v57 = vld [vmem:[%s5010_s13 + $0x30] sm:$0xff] }
  0xe8   :  { %v1255_v14 = vmul.f32 0.6931472, %v2436_v52  ;;  %v1856_v39 = vld [vmem:[%s5012_s15] sm:$0x1]  ;;  %v1355_v52 = vsub.f32 0.0, %v1339_v51  ;;  %vm665_vm3 = vcmask 1040384  }
  0xe9   :  { %v2438_v1 = vpop.eup %2437  ;;  %v624_v45 = vadd.f32 %v1966_v28, %v623_v12  ;;  %v1367_v28 = vmul.f32 1.442695, %v1351_v44  ;;  %v4006_v26 = vld [vmem:[%s5010_s13 + $0x40] sm:$0xff]  ;;  %v657_v12 = vmul.f32 %v635_v47, %v635_v47  ;;  %v1340_v61 = vand.u32 2147483647, %v3986_v56 }
  0xea   :  { %v1261_v59 = vsel %vm3934_vm0, %v1258_v29, %v1255_v14  ;;  %v644_v43 = vmul.f32 0.6931472, %v2438_v1  ;;  %v2440_v40 = vpop.eup %2439  ;;  %v1268_v29 = vmul.f32 %v1246_v46, %v1246_v46  ;;  %v1371_v14 = vmul.f32 1.442695, %v1353_v23 }
  0xeb   :  { %v625_v50 = vadd.f32 %v1967_v7, %v624_v45  ;;  %v3961_v15 = vadd.f32 %v1261_v59, %v1248_v32  ;;  %v1865_v35 = vmul.f32 0.6931472, %v2440_v40  ;;  %v3998_v32 = vld [vmem:[%s5010_s13 + $0x38] sm:$0xff]  ;;  %v1369_v7 = vmul.f32 1.442695, %v1352_v55 }
  0xec   :  { %v650_v48 = vsel %vm3946_vm1, %v647_v9, %v644_v43  ;;  %v4015_v9 = vld [vmem:[%s5010_s13 + $0x48] sm:$0xff]  ;;  %v1341_v1 = vand.u32 2147483647, %v3993_v57  ;;  %v1373_v45 = vmul.f32 1.442695, %v1354_v37  ;;  %v1878_v30 = vmul.f32 %v1856_v39, %v1856_v39  ;;  %v4025_v43 = vld [vmem:[%s5010_s13 + $0x50] sm:$0xff] }
  0xed   :  { %5277 = vst [vmem:[#allocation23_spill] sm:$0xff] %v3961_v15  ;;  %626 = vadd.xlane.f32.xlu0 %v625_v50  ;;  %v1271_v27 = vmax.f32 %v3961_v15, 1e-30  ;;  %v3971_v16 = vadd.f32 %v650_v48, %v637_v11  ;;  %v1871_v42 = vsel %vm3963_vm2, %v1868_v60, %v1865_v35  ;;  %v1267_v11 = vmul.f32 %v3961_v15, %v3961_v15  ;;  %v1296_v15 = vld [vmem:[%s5009_s12 + $0x48] sm:$0xff] }
  0xee   :  { %v3988_v62 = vadd.f32 %v1871_v42, %v1858_v19  ;;  %v1342_v33 = vand.u32 2147483647, %v3998_v32  ;;  %v1343_v60 = vand.u32 2147483647, %v4006_v26  ;;  %v1375_v13 = vmul.f32 1.442695, %v1355_v52 }
  0xef   :  { %5280 = vst [vmem:[#allocation26_spill] sm:$0xff] %v3971_v16  ;;  %2441 = vlog2.f32 %v1271_v27  ;;  %v660_v2 = vmax.f32 %v3971_v16, 1e-30  ;;  %v656_v59 = vmul.f32 %v3971_v16, %v3971_v16  ;;  %v1344_v50 = vand.u32 2147483647, %v4015_v9  ;;  %v4036_v27 = vld [vmem:[%s5010_s13 + $0x58] sm:$0xff] }
  0xf0   :  { %5282 = vst [vmem:[#allocation27_spill] sm:$0xff] %v3988_v62  ;;  %v1881_v17 = vmax.f32 %v3988_v62, 1e-30  ;;  %v1356_v63 = vsub.f32 0.0, %v1340_v61  ;;  %v1269_v44 = vadd.f32 %v1268_v29, %v1267_v11  ;;  %v1357_v19 = vsub.f32 0.0, %v1341_v1 }
  0xf1   :  { %2443 = vlog2.f32 %v660_v2  ;;  %v1877_v35 = vmul.f32 %v3988_v62, %v3988_v62  ;;  %v1345_v55 = vand.u32 2147483647, %v4025_v43  ;;  %v1358_v46 = vsub.f32 0.0, %v1342_v33 }
  0xf2   :  { %2445 = vpow2.f32 %v1367_v28  ;;  %v658_v47 = vadd.f32 %v657_v12, %v656_v59  ;;  %v1359_v23 = vsub.f32 0.0, %v1343_v60  ;;  %v1360_v28 = vsub.f32 0.0, %v1344_v50  ;;  %v4048_v12 = vld [vmem:[%s5010_s13 + $0x60] sm:$0xff] }
  0xf3   :  { %2447 = vlog2.f32 %v1881_v17  ;;  %v1377_v29 = vmul.f32 1.442695, %v1356_v63  ;;  %v1270_v39 = vmul.f32 0.5, %v1269_v44  ;;  %v1379_v17 = vmul.f32 1.442695, %v1357_v19  ;;  %v4055_v63 = vld [vmem:[%s5010_s13 + $0x68] sm:$0xff] }
  0xf4   :  { %2449 = vpow2.f32 %v1369_v7  ;;  %v1346_v7 = vand.u32 2147483647, %v4036_v27  ;;  %v1361_v1 = vsub.f32 0.0, %v1345_v55  ;;  %v659_v59 = vmul.f32 0.5, %v658_v47  ;;  %v4067_v47 = vld [vmem:[%s5010_s13 + $0x78] sm:$0xff] }
  0xf5   :  { %2451 = vpow2.f32 %v1371_v14  ;;  %v1879_v14 = vadd.f32 %v1878_v30, %v1877_v35  ;;  %v1385_v19 = vmul.f32 1.442695, %v1360_v28  ;;  %5284 = vst [vmem:[#allocation41_spill] sm:$0xff] %v4067_v47  ;;  %v1348_v44 = vand.u32 2147483647, %v4055_v63 }
  0xf6   :  { %2453 = vpow2.f32 %v1373_v45  ;;  %v1381_v45 = vmul.f32 1.442695, %v1358_v46  ;;  %v4062_v46 = vld [vmem:[%s5010_s13 + $0x70] sm:$0xff]  ;;  %v1387_v28 = vmul.f32 1.442695, %v1361_v1 }
  0xf7   :  { %2455 = vpow2.f32 %v1375_v13  ;;  %v1383_v13 = vmul.f32 1.442695, %v1359_v23  ;;  %5283 = vst [vmem:[#allocation8_spill] sm:$0xff] %v4062_v46  ;;  %v1362_v23 = vsub.f32 0.0, %v1346_v7  ;;  %v1880_v30 = vmul.f32 0.5, %v1879_v14 }
  0xf8   :  { %2457 = vpow2.f32 %v1377_v29  ;;  %v1347_v29 = vand.u32 2147483647, %v4048_v12  ;;  %v1349_v52 = vand.u32 2147483647, %v4062_v46  ;;  %v1350_v7 = vand.u32 2147483647, %v4067_v47 }
  0xf9   :  { %2459 = vpow2.f32 %v1379_v17  ;;  %v1364_v2 = vsub.f32 0.0, %v1348_v44 }
  0xfa   :  { %2461 = vpow2.f32 %v1381_v45 }
  0xfb   :  { %2463 = vpow2.f32 %v1383_v13 }
  0xfc   :  { %v2442_v61 = vpop.eup %2441  ;;  %2465 = vpow2.f32 %v1385_v19 }
  0xfd   :  { %v1273_v33 = vmul.f32 0.6931472, %v2442_v61  ;;  %2467 = vpow2.f32 %v1387_v28  ;;  %v1288_v28 = vld [vmem:[%s5009_s12 + $0x8] sm:$0xff] }
  0xfe   :  { %v2444_v50 = vpop.eup %2443  ;;  %v4122_v48 = vmul.f32 %v1288_v28, %v1288_v28 }
  0xff   :  { %v1274_v35 = vsub.f32 %v1270_v39, %v1273_v33  ;;  %v662_v55 = vmul.f32 0.6931472, %v2444_v50  ;;  %v4069_v61 = vpop.eup %2445 }
 0x100   :  { %v2448_v39 = vpop.eup %2447  ;;  %v1402_v19 = vmul.f32 -0.5, %v4069_v61 }
 0x101   :  { %v2001_v33 = vadd.f32 -0.5, %v1274_v35  ;;  %v663_v50 = vsub.f32 %v659_v59, %v662_v55  ;;  %v4073_v60 = vpop.eup %2449  ;;  %v1883_v11 = vmul.f32 0.6931472, %v2448_v39  ;;  %v1389_v35 = vmul.f32 1.442695, %v1362_v23  ;;  %v1287_v23 = vld [vmem:[%s5009_s12] sm:$0xff] }
 0x102   :  { %v4077_v17 = vpop.eup %2451  ;;  %v1363_v55 = vsub.f32 0.0, %v1347_v29  ;;  %v1399_v39 = vadd.f32 1.0, %v4069_v61  ;;  %v1408_v42 = vadd.f32 1.0, %v4073_v60  ;;  %v4114_v1 = vmul.f32 %v1287_v23, %v1287_v23 }
 0x103   :  { %v1276_v14 = vsel %vm665_vm3, %v2001_v33, 0.0  ;;  %v1968_v45 = vadd.f32 -0.5, %v663_v50  ;;  %v4081_v59 = vpop.eup %2453  ;;  %v1884_v13 = vsub.f32 %v1880_v30, %v1883_v11  ;;  %v1365_v11 = vsub.f32 0.0, %v1349_v52  ;;  %v1289_v52 = vld [vmem:[%s5009_s12 + $0x10] sm:$0xff] }
 0x104   :  { %1277 = vadd.xlane.f32.xlu1 %v1276_v14  ;;  %v4087_v33 = vpop.eup %2455  ;;  %v1366_v30 = vsub.f32 0.0, %v1350_v7  ;;  %v1417_v29 = vadd.f32 1.0, %v4077_v17  ;;  %2469 = vpow2.f32 %v1389_v35  ;;  %v1290_v7 = vld [vmem:[%s5009_s12 + $0x18] sm:$0xff]  ;;  %v1291_v35 = vld [vmem:[%s5009_s12 + $0x20] sm:$0xff]  ;;  %v1393_v14 = vmul.f32 1.442695, %v1364_v2 }
 0x105   :  { %v666_v37 = vsel %vm665_vm3, %v1968_v45, 0.0  ;;  %v2034_v50 = vadd.f32 -0.5, %v1884_v13  ;;  %v1391_v13 = vmul.f32 1.442695, %v1363_v55  ;;  %2471 = vlog2.f32 %v1399_v39  ;;  %v1293_v55 = vld [vmem:[%s5009_s12 + $0x30] sm:$0xff]  ;;  %v1294_v39 = vld [vmem:[%s5009_s12 + $0x38] sm:$0xff]  ;;  %v4124_v40 = vpop.eup %2457 }
 0x106   :  { %667 = vadd.xlane.f32.xlu0 %v666_v37  ;;  %v1426_v37 = vadd.f32 1.0, %v4081_v59  ;;  %2473 = vlog2.f32 %v1408_v42  ;;  %v1435_v44 = vadd.f32 1.0, %v4087_v33  ;;  %v1397_v51 = vmul.f32 1.442695, %v1366_v30  ;;  %v1295_v42 = vld [vmem:[%s5009_s12 + $0x40] sm:$0xff]  ;;  %v4134_v62 = vpop.eup %2459 }
 0x107   :  { %v1886_v45 = vsel %vm665_vm3, %v2034_v50, 0.0  ;;  %v1292_v50 = vld [vmem:[%s5009_s12 + $0x28] sm:$0xff]  ;;  %2475 = vlog2.f32 %v1417_v29  ;;  %v1411_v2 = vmul.f32 -0.5, %v4073_v60  ;;  %v4130_v23 = vmul.f32 %v1289_v52, %v1289_v52  ;;  %v4140_v28 = vpop.eup %2461 }
 0x108   :  { %1887 = vadd.xlane.f32.xlu1 %v1886_v45  ;;  %v1395_v45 = vmul.f32 1.442695, %v1365_v11  ;;  %2477 = vlog2.f32 %v1426_v37  ;;  %v4132_v0 = vmul.f32 %v1290_v7, %v1290_v7  ;;  %v1403_v11 = vadd.f32 1.0, %v1402_v19  ;;  %v4150_v16 = vpop.eup %2463 }
 0x109   :  { %2479 = vpow2.f32 %v1391_v13  ;;  %v4136_v30 = vmul.f32 %v1291_v35, %v1291_v35  ;;  %v4138_v29 = vmul.f32 %v1292_v50, %v1292_v50  ;;  %v1420_v37 = vmul.f32 -0.5, %v4077_v17  ;;  %v4156_v50 = vpop.eup %2465 }
 0x10a   :  { %2481 = vlog2.f32 %v1435_v44  ;;  %v4146_v52 = vmul.f32 %v1293_v55, %v1293_v55  ;;  %v4148_v7 = vmul.f32 %v1294_v39, %v1294_v39  ;;  %v1405_v19 = vand.u32 2147483647, %v4069_v61  ;;  %v4166_v58 = vpop.eup %2467 }
 0x10b   :  { %5285 = vst [vmem:[#allocation42_spill] sm:$0xff] %v4136_v30  ;;  %5286 = vst [vmem:[#allocation43_spill] sm:$0xff] %v4138_v29  ;;  %2483 = vpow2.f32 %v1393_v14  ;;  %v1444_v13 = vadd.f32 1.0, %v4124_v40  ;;  %v4154_v35 = vmul.f32 %v1295_v42, %v1295_v42  ;;  %v1412_v24 = vadd.f32 1.0, %v1411_v2 }
 0x10c   :  { %5287 = vst [vmem:[#allocation44_spill] sm:$0xff] %v4146_v52  ;;  %5288 = vst [vmem:[#allocation45_spill] sm:$0xff] %v4148_v7  ;;  %2485 = vpow2.f32 %v1395_v45  ;;  %v1414_v20 = vand.u32 2147483647, %v4073_v60  ;;  %v1453_v44 = vadd.f32 1.0, %v4134_v62  ;;  %v4161_v55 = vmul.f32 %v4069_v61, %v1403_v11 }
 0x10d   :  { %5289 = vst [vmem:[#allocation46_spill] sm:$0xff] %v4154_v35  ;;  %2487 = vpow2.f32 %v1397_v51  ;;  %v1462_v14 = vadd.f32 1.0, %v4140_v28  ;;  %v4164_v39 = vmul.f32 %v1296_v15, %v1296_v15  ;;  %v1421_v42 = vadd.f32 1.0, %v1420_v37 }
 0x10e   :  { %v1423_v31 = vand.u32 2147483647, %v4077_v17  ;;  %v1429_v45 = vmul.f32 -0.5, %v4081_v59  ;;  %v1471_v2 = vadd.f32 1.0, %v4150_v16  ;;  %vm4171_vm4 = vcmp.lt.f32.partialorder %v1405_v19, 0.0004427343 }
 0x10f   :  { %5290 = vst [vmem:[#allocation47_spill] sm:$0xff] %v4164_v39  ;;  %v1432_v51 = vand.u32 2147483647, %v4081_v59  ;;  %v1438_v61 = vmul.f32 -0.5, %v4087_v33  ;;  %2489 = vlog2.f32 %v1444_v13  ;;  %v1480_v15 = vadd.f32 1.0, %v4156_v50 }
 0x110   :  { %v4179_v11 = vmul.f32 %v4073_v60, %v1412_v24  ;;  %vm4181_vm5 = vcmp.lt.f32.partialorder %v1414_v20, 0.0004427343  ;;  %v1441_v36 = vand.u32 2147483647, %v4087_v33  ;;  %v1447_v19 = vmul.f32 -0.5, %v4124_v40 }
 0x111   :  { %2491 = vlog2.f32 %v1453_v44  ;;  %v4187_v8 = vpop.eup %2469  ;;  %v1456_v6 = vmul.f32 -0.5, %v4134_v62  ;;  %v1465_v13 = vmul.f32 -0.5, %v4140_v28  ;;  %v1489_v34 = vadd.f32 1.0, %v4166_v58 }
 0x112   :  { %2493 = vlog2.f32 %v1462_v14  ;;  %v2472_v24 = vpop.eup %2471  ;;  %vm4192_vm6 = vcmp.lt.f32.partialorder %v1423_v31, 0.0004427343  ;;  %v1430_v60 = vadd.f32 1.0, %v1429_v45  ;;  %v1474_v3 = vmul.f32 -0.5, %v4150_v16 }
 0x113   :  { %2495 = vlog2.f32 %v1471_v2  ;;  %v2474_v41 = vpop.eup %2473  ;;  %v4198_v44 = vmul.f32 %v4077_v17, %v1421_v42  ;;  %vm4200_vm7 = vcmp.lt.f32.partialorder %v1432_v51, 0.0004427343  ;;  %v1439_v14 = vadd.f32 1.0, %v1438_v61 }
 0x114   :  { %2497 = vlog2.f32 %v1480_v15  ;;  %v2476_v38 = vpop.eup %2475  ;;  %vm4204_vm8 = vcmp.lt.f32.partialorder %v1441_v36, 0.0004427343  ;;  %v1448_v22 = vadd.f32 1.0, %v1447_v19  ;;  %v1450_v45 = vand.u32 2147483647, %v4124_v40 }
 0x115   :  { %v1483_v2 = vmul.f32 -0.5, %v4156_v50  ;;  %v2478_v49 = vpop.eup %2477  ;;  %v1457_v21 = vadd.f32 1.0, %v1456_v6  ;;  %v1459_v17 = vand.u32 2147483647, %v4134_v62  ;;  %v1466_v42 = vadd.f32 1.0, %v1465_v13 }
 0x116   :  { %2499 = vlog2.f32 %v1489_v34  ;;  %v4211_v51 = vpop.eup %2479  ;;  %v4213_v61 = vmul.f32 0.6931472, %v2472_v24  ;;  %v4216_v36 = vmul.f32 %v4081_v59, %v1430_v60  ;;  %v1468_v15 = vand.u32 2147483647, %v4140_v28 }
 0x117   :  { %v1475_v19 = vadd.f32 1.0, %v1474_v3  ;;  %v2482_v39 = vpop.eup %2481  ;;  %v4219_v35 = vmul.f32 0.6931472, %v2474_v41  ;;  %v4222_v7 = vmul.f32 %v4087_v33, %v1439_v14  ;;  %v1477_v6 = vand.u32 2147483647, %v4150_v16 }
 0x118   :  { %v1498_v34 = vadd.f32 1.0, %v4187_v8  ;;  %v4226_v13 = vpop.eup %2483  ;;  %v4228_v24 = vmul.f32 0.6931472, %v2476_v38  ;;  %v4230_v52 = vmul.f32 0.6931472, %v2478_v49  ;;  %v4233_v59 = vmul.f32 %v4124_v40, %v1448_v22 }
 0x119   :  { %vm4235_vm9 = vcmp.lt.f32.partialorder %v1450_v45, 0.0004427343  ;;  %v1484_v41 = vadd.f32 1.0, %v1483_v2  ;;  %v4239_v33 = vpop.eup %2485  ;;  %v4242_v60 = vmul.f32 %v4134_v62, %v1457_v21  ;;  %vm4244_vm10 = vcmp.lt.f32.partialorder %v1459_v17, 0.0004427343 }
 0x11a   :  { %v4249_v49 = vmul.f32 %v4140_v28, %v1466_v42  ;;  %v1507_v22 = vadd.f32 1.0, %v4211_v51  ;;  %v4252_v38 = vpop.eup %2487  ;;  %v1407_v40 = vsel %vm4171_vm4, %v4161_v55, %v4213_v61  ;;  %v4258_v45 = vmul.f32 0.6931472, %v2482_v39 }
 0x11b   :  { %vm4260_vm11 = vcmp.lt.f32.partialorder %v1468_v15, 0.0004427343  ;;  %v4265_v62 = vmul.f32 %v4150_v16, %v1475_v19  ;;  %v1486_v28 = vand.u32 2147483647, %v4156_v50  ;;  %v1416_v2 = vsel %vm4181_vm5, %v4179_v11, %v4219_v35 }
 0x11c   :  { %vm4272_vm12 = vcmp.lt.f32.partialorder %v1477_v6, 0.0004427343  ;;  %v1492_v5 = vmul.f32 -0.5, %v4166_v58  ;;  %2501 = vlog2.f32 %v1498_v34  ;;  %v1516_v55 = vadd.f32 1.0, %v4226_v13  ;;  %v2490_v39 = vpop.eup %2489 }
 0x11d   :  { %v1425_v16 = vsel %vm4192_vm6, %v4198_v44, %v4228_v24  ;;  %v1434_v35 = vsel %vm4200_vm7, %v4216_v36, %v4230_v52  ;;  %v4287_v11 = vmul.f32 %v4156_v50, %v1484_v41  ;;  %v1501_v37 = vmul.f32 -0.5, %v4187_v8 }
 0x11e   :  { %v2492_v42 = vpop.eup %2491  ;;  %v1495_v61 = vand.u32 2147483647, %v4166_v58  ;;  %2503 = vlog2.f32 %v1507_v22  ;;  %v1510_v15 = vmul.f32 -0.5, %v4211_v51  ;;  %v1525_v19 = vadd.f32 1.0, %v4239_v33 }
 0x11f   :  { %v2494_v20 = vpop.eup %2493  ;;  %v1443_v53 = vsel %vm4204_vm8, %v4222_v7, %v4258_v45  ;;  %vm4297_vm13 = vcmp.lt.f32.partialorder %v1486_v28, 0.0004427343  ;;  %v1519_v50 = vmul.f32 -0.5, %v4226_v13  ;;  %v1534_v44 = vadd.f32 1.0, %v4252_v38 }
 0x120   :  { %v2496_v36 = vpop.eup %2495  ;;  %v1446_v6 = vmul.f32 0.6931472, %v2490_v39  ;;  %v1493_v34 = vadd.f32 1.0, %v1492_v5  ;;  %2505 = vlog2.f32 %v1516_v55  ;;  %v1528_v24 = vmul.f32 -0.5, %v4239_v33 }
 0x121   :  { %v2498_v41 = vpop.eup %2497  ;;  %v1455_v22 = vmul.f32 0.6931472, %v2492_v42  ;;  %v1502_v47 = vadd.f32 1.0, %v1501_v37  ;;  %v1504_v31 = vand.u32 2147483647, %v4187_v8  ;;  %v1537_v7 = vmul.f32 -0.5, %v4252_v38 }
 0x122   :  { %v1464_v45 = vmul.f32 0.6931472, %v2494_v20  ;;  %vm4306_vm14 = vcmp.lt.f32.partialorder %v1495_v61, 0.0004427343  ;;  %v1511_v29 = vadd.f32 1.0, %v1510_v15  ;;  %2507 = vlog2.f32 %v1525_v19 }
 0x123   :  { %v2500_v46 = vpop.eup %2499  ;;  %v1473_v39 = vmul.f32 0.6931472, %v2496_v36  ;;  %v1513_v5 = vand.u32 2147483647, %v4211_v51  ;;  %v1520_v55 = vadd.f32 1.0, %v1519_v50  ;;  %2509 = vlog2.f32 %v1534_v44 }
 0x124   :  { %v1452_v37 = vsel %vm4235_vm9, %v4233_v59, %v1446_v6  ;;  %v1482_v42 = vmul.f32 0.6931472, %v2498_v41  ;;  %v1494_v30 = vmul.f32 %v4166_v58, %v1493_v34  ;;  %v1529_v20 = vadd.f32 1.0, %v1528_v24 }
 0x125   :  { %v1461_v61 = vsel %vm4244_vm10, %v4242_v60, %v1455_v22  ;;  %v4319_v15 = vmul.f32 %v4187_v8, %v1502_v47  ;;  %vm4321_vm15 = vcmp.lt.f32.partialorder %v1504_v31, 0.0004427343  ;;  %v1522_v50 = vand.u32 2147483647, %v4226_v13 }
 0x126   :  { %v1538_v44 = vadd.f32 1.0, %v1537_v7  ;;  %v1470_v59 = vsel %vm4260_vm11, %v4249_v49, %v1464_v45  ;;  %v1491_v58 = vmul.f32 0.6931472, %v2500_v46  ;;  %v4330_v3 = vmul.f32 %v4211_v51, %v1511_v29 }
 0x127   :  { %v1531_v60 = vand.u32 2147483647, %v4239_v33  ;;  %v1479_v8 = vsel %vm4272_vm12, %v4265_v62, %v1473_v39  ;;  %vm4336_vm0 = vcmp.lt.f32.partialorder %v1513_v5, 0.0004427343  ;;  %v4341_v14 = vmul.f32 %v4226_v13, %v1520_v55 }
 0x128   :  { %v1540_v21 = vand.u32 2147483647, %v4252_v38  ;;  %v5317_v46 = vmax.f32 %v3919_v18, 0.0  ;;  %v1488_v29 = vsel %vm4297_vm13, %v4287_v11, %v1482_v42  ;;  %v4352_v51 = vmul.f32 %v4239_v33, %v1529_v20 }
 0x129   :  { %v5318_v62 = vmax.f32 %v3926_v4, 0.0  ;;  %v5319_v13 = vmax.f32 %v3931_v54, 0.0  ;;  %v2502_v6 = vpop.eup %2501  ;;  %vm4362_vm1 = vcmp.lt.f32.partialorder %v1522_v50, 0.0004427343  ;;  %v5322_v11 = vmax.f32 %v3942_v25, 0.0 }
 0x12a   :  { %v4346_v49 = vadd.f32 %v1407_v40, %v5317_v46  ;;  %v4367_v40 = vmul.f32 %v4252_v38, %v1538_v44  ;;  %v5323_v4 = vmax.f32 %v3958_v10, 0.0  ;;  %v5324_v54 = vmax.f32 %v3986_v56, 0.0 }
 0x12b   :  { %v4356_v17 = vadd.f32 %v1416_v2, %v5318_v62  ;;  %v4360_v36 = vadd.f32 %v1425_v16, %v5319_v13  ;;  %v4371_v33 = vadd.f32 %v1434_v35, %v5322_v11  ;;  %v1497_v52 = vsel %vm4306_vm14, %v1494_v30, %v1491_v58 }
 0x12c   :  { %v4375_v2 = vadd.f32 %v1443_v53, %v5323_v4  ;;  %v4379_v16 = vadd.f32 %v1452_v37, %v5324_v54  ;;  %v5325_v34 = vmax.f32 %v3993_v57, 0.0  ;;  %v5326_v38 = vmax.f32 %v3998_v32, 0.0  ;;  %v2504_v53 = vpop.eup %2503 }
 0x12d   :  { %v5327_v35 = vmax.f32 %v4006_v26, 0.0  ;;  %vm4395_vm2 = vcmp.lt.f32.partialorder %v1531_v60, 0.0004427343  ;;  %v5330_v41 = vmax.f32 %v4015_v9, 0.0  ;;  %v1687_v57 = vmul.f32 %v4346_v49, %v4346_v49  ;;  %v2506_v28 = vpop.eup %2505 }
 0x12e   :  { %v4385_v24 = vadd.f32 %v1461_v61, %v5325_v34  ;;  %v4389_v25 = vadd.f32 %v1470_v59, %v5326_v38  ;;  %v1688_v32 = vmul.f32 %v4356_v17, %v4356_v17  ;;  %v1689_v26 = vmul.f32 %v4360_v36, %v4360_v36 }
 0x12f   :  { %v4393_v10 = vadd.f32 %v1479_v8, %v5327_v35  ;;  %v4401_v30 = vadd.f32 %v1488_v29, %v5330_v41  ;;  %v1500_v22 = vmul.f32 0.6931472, %v2502_v6  ;;  %vm4409_vm3 = vcmp.lt.f32.partialorder %v1540_v21, 0.0004427343  ;;  %v2508_v44 = vpop.eup %2507  ;;  %v4440_v29 = vld [vmem:[%s5009_s12 + $0x50] sm:$0xff] }
 0x130   :  { %v1690_v7 = vmul.f32 %v4371_v33, %v4371_v33  ;;  %v1691_v9 = vmul.f32 %v4375_v2, %v4375_v2  ;;  %v1751_v45 = vmax.f32 %v4346_v49, 1e-30  ;;  %v5333_v39 = vmax.f32 %v4025_v43, 0.0  ;;  %v2510_v60 = vpop.eup %2509 }
 0x131   :  { %v1692_v55 = vmul.f32 %v4379_v16, %v4379_v16  ;;  %v1752_v37 = vmax.f32 %v4356_v17, 1e-30  ;;  %v1753_v42 = vmax.f32 %v4360_v36, 1e-30  ;;  %v1509_v20 = vmul.f32 0.6931472, %v2504_v53 }
 0x132   :  { %v4420_v5 = vadd.f32 %v1497_v52, %v5333_v39  ;;  %v1754_v61 = vmax.f32 %v4371_v33, 1e-30  ;;  %v1755_v50 = vmax.f32 %v4375_v2, 1e-30  ;;  %2511 = vlog2.f32 %v1751_v45 }
 0x133   :  { %v1693_v59 = vmul.f32 %v4385_v24, %v4385_v24  ;;  %v1694_v43 = vmul.f32 %v4389_v25, %v4389_v25  ;;  %v1756_v58 = vmax.f32 %v4379_v16, 1e-30  ;;  %2513 = vlog2.f32 %v1752_v37 }
 0x134   :  { %v1506_v8 = vsel %vm4321_vm15, %v4319_v15, %v1500_v22  ;;  %v1518_v21 = vmul.f32 0.6931472, %v2506_v28  ;;  %v1757_v46 = vmax.f32 %v4385_v24, 1e-30  ;;  %2515 = vlog2.f32 %v1753_v42  ;;  %v4450_v15 = vld [vmem:[%s5009_s12 + $0x58] sm:$0xff] }
 0x135   :  { %v1695_v62 = vmul.f32 %v4393_v10, %v4393_v10  ;;  %v1696_v13 = vmul.f32 %v4401_v30, %v4401_v30  ;;  %v1758_v6 = vmax.f32 %v4389_v25, 1e-30  ;;  %2517 = vlog2.f32 %v1754_v61  ;;  %v5341_v61 = vld [vmem:[#allocation41_spill] sm:$0xff] }
 0x136   :  { %v1515_v19 = vsel %vm4336_vm0, %v4330_v3, %v1509_v20  ;;  %v1527_v11 = vmul.f32 0.6931472, %v2508_v44  ;;  %v1759_v4 = vmax.f32 %v4393_v10, 1e-30  ;;  %2519 = vlog2.f32 %v1755_v50 }
 0x137   :  { %v1536_v54 = vmul.f32 0.6931472, %v2510_v60  ;;  %v5334_v52 = vmax.f32 %v4036_v27, 0.0  ;;  %v1760_v38 = vmax.f32 %v4401_v30, 1e-30  ;;  %2521 = vlog2.f32 %v1756_v58  ;;  %v5343_v58 = vld [vmem:[#allocation44_spill] sm:$0xff] }
 0x138   :  { %v1524_v35 = vsel %vm4362_vm1, %v4341_v14, %v1518_v21  ;;  %v4466_v47 = vmul.f32 %v4420_v5, %v4420_v5  ;;  %v4470_v3 = vmul.f32 %v4440_v29, %v4440_v29  ;;  %2523 = vlog2.f32 %v1757_v46 }
 0x139   :  { %v4458_v34 = vadd.f32 %v1506_v8, %v5334_v52  ;;  %v5335_v27 = vmax.f32 %v4048_v12, 0.0  ;;  %v4478_v41 = vmul.f32 %v4450_v15, %v4450_v15  ;;  %v1761_v18 = vmax.f32 %v4420_v5, 1e-30 }
 0x13a   :  { %2525 = vlog2.f32 %v1758_v6  ;;  %v1533_v14 = vsel %vm4395_vm2, %v4352_v51, %v1527_v11  ;;  %v1719_v22 = vadd.f32 %v4114_v1, %v1687_v57  ;;  %v1720_v45 = vadd.f32 %v4122_v48, %v1688_v32  ;;  %v5337_v51 = vld [vmem:[#allocation42_spill] sm:$0xff]  ;;  %v5338_v32 = vld [vmem:[#allocation8_spill] sm:$0xff]  ;;  %v5346_v6 = vld [vmem:[#allocation47_spill] sm:$0xff] }
 0x13b   :  { %v4474_v53 = vadd.f32 %v1515_v19, %v5335_v27  ;;  %2527 = vlog2.f32 %v1759_v4  ;;  %v1542_v12 = vsel %vm4409_vm3, %v4367_v40, %v1536_v54  ;;  %v5336_v28 = vmax.f32 %v4055_v63, 0.0  ;;  %v5340_v63 = vld [vmem:[#allocation43_spill] sm:$0xff] }
 0x13c   :  { %v1762_v37 = vmax.f32 %v4458_v34, 1e-30  ;;  %2529 = vlog2.f32 %v1760_v38  ;;  %v4496_v56 = vmul.f32 %v4458_v34, %v4458_v34  ;;  %v1721_v1 = vadd.f32 %v4130_v23, %v1689_v26  ;;  %v5344_v23 = vld [vmem:[#allocation45_spill] sm:$0xff] }
 0x13d   :  { %v4491_v39 = vadd.f32 %v1524_v35, %v5336_v28  ;;  %v1722_v48 = vadd.f32 %v4132_v0, %v1690_v7  ;;  %v1723_v57 = vadd.f32 %v5337_v51, %v1691_v9  ;;  %v5339_v31 = vmax.f32 %v5338_v32, 0.0  ;;  %v5345_v9 = vld [vmem:[#allocation46_spill] sm:$0xff]  ;;  %v4521_v32 = vld [vmem:[%s5009_s12 + $0x60] sm:$0xff] }
 0x13e   :  { %v1724_v42 = vadd.f32 %v5340_v63, %v1692_v55  ;;  %v1763_v20 = vmax.f32 %v4474_v53, 1e-30  ;;  %2531 = vlog2.f32 %v1761_v18  ;;  %v5342_v50 = vmax.f32 %v5341_v61, 0.0 }
 0x13f   :  { %v4503_v40 = vadd.f32 %v1533_v14, %v5339_v31  ;;  %v1725_v60 = vadd.f32 %v5343_v58, %v1693_v59  ;;  %v1726_v26 = vadd.f32 %v5344_v23, %v1694_v43  ;;  %v1735_v0 = vmul.f32 0.5, %v1719_v22  ;;  %v2512_v7 = vpop.eup %2511  ;;  %v4526_v23 = vld [vmem:[%s5009_s12 + $0x68] sm:$0xff] }
 0x140   :  { %v4509_v44 = vadd.f32 %v1542_v12, %v5342_v50  ;;  %v1727_v8 = vadd.f32 %v5345_v9, %v1695_v62  ;;  %v1736_v21 = vmul.f32 0.5, %v1720_v45  ;;  %v1764_v46 = vmax.f32 %v4491_v39, 1e-30  ;;  %v2514_v55 = vpop.eup %2513 }
 0x141   :  { %2533 = vlog2.f32 %v1762_v37  ;;  %v1728_v19 = vadd.f32 %v5346_v6, %v1696_v13  ;;  %v1737_v11 = vmul.f32 0.5, %v1721_v1  ;;  %v1738_v4 = vmul.f32 0.5, %v1722_v48  ;;  %v2516_v52 = vpop.eup %2515 }
 0x142   :  { %v1768_v54 = vmul.f32 0.6931472, %v2512_v7  ;;  %v1739_v38 = vmul.f32 0.5, %v1723_v57  ;;  %v1765_v59 = vmax.f32 %v4503_v40, 1e-30  ;;  %2535 = vlog2.f32 %v1763_v20  ;;  %v2518_v43 = vpop.eup %2517 }
 0x143   :  { %v1770_v35 = vmul.f32 0.6931472, %v2514_v55  ;;  %v1740_v27 = vmul.f32 0.5, %v1724_v42  ;;  %v1766_v62 = vmax.f32 %v4509_v44, 1e-30  ;;  %v2520_v22 = vpop.eup %2519  ;;  %v1741_v45 = vmul.f32 0.5, %v1725_v60 }
 0x144   :  { %v1772_v18 = vmul.f32 0.6931472, %v2516_v52  ;;  %v1799_v14 = vsub.f32 %v1735_v0, %v1768_v54  ;;  %v1774_v12 = vmul.f32 0.6931472, %v2518_v43  ;;  %2537 = vlog2.f32 %v1764_v46  ;;  %v2522_v28 = vpop.eup %2521 }
 0x145   :  { %v1800_v13 = vsub.f32 %v1736_v21, %v1770_v35  ;;  %v1742_v37 = vmul.f32 0.5, %v1726_v26  ;;  %v1776_v1 = vmul.f32 0.6931472, %v2520_v22  ;;  %v2524_v57 = vpop.eup %2523  ;;  %v1778_v31 = vmul.f32 0.6931472, %v2522_v28 }
 0x146   :  { %v1801_v48 = vsub.f32 %v1737_v11, %v1772_v18  ;;  %v2018_v51 = vadd.f32 -0.5, %v1799_v14  ;;  %2539 = vlog2.f32 %v1765_v59  ;;  %v1802_v63 = vsub.f32 %v1738_v4, %v1774_v12  ;;  %v4537_v4 = vld [vmem:[%s5009_s12 + $0x70] sm:$0xff] }
 0x147   :  { %v2019_v42 = vadd.f32 -0.5, %v1800_v13  ;;  %v2526_v20 = vpop.eup %2525  ;;  %v1780_v61 = vmul.f32 0.6931472, %v2524_v57  ;;  %2541 = vlog2.f32 %v1766_v62  ;;  %v1803_v50 = vsub.f32 %v1739_v38, %v1776_v1 }
 0x148   :  { %v2020_v58 = vadd.f32 -0.5, %v1801_v48  ;;  %v2528_v60 = vpop.eup %2527  ;;  %v1782_v26 = vmul.f32 0.6931472, %v2526_v20  ;;  %v1804_v0 = vsub.f32 %v1740_v27, %v1778_v31  ;;  %v2021_v7 = vadd.f32 -0.5, %v1802_v63 }
 0x149   :  { %v1831_v9 = vadd.f32 %v2019_v42, %v2018_v51  ;;  %v2530_v21 = vpop.eup %2529  ;;  %v1699_v46 = vmul.f32 %v4474_v53, %v4474_v53  ;;  %v1715_v55 = vmul.f32 %v4521_v32, %v4521_v32  ;;  %v1729_v6 = vadd.f32 %v4470_v3, %v4466_v47 }
 0x14a   :  { %v1743_v11 = vmul.f32 0.5, %v1727_v8  ;;  %v1784_v54 = vmul.f32 0.6931472, %v2528_v60  ;;  %v1805_v52 = vsub.f32 %v1741_v45, %v1780_v61  ;;  %v2022_v38 = vadd.f32 -0.5, %v1803_v50  ;;  %v4548_v8 = vld [vmem:[%s5009_s12 + $0x78] sm:$0xff] }
 0x14b   :  { %v1832_v59 = vadd.f32 %v2020_v58, %v1831_v9  ;;  %v2532_v35 = vpop.eup %2531  ;;  %v1700_v43 = vmul.f32 %v4491_v39, %v4491_v39  ;;  %v1716_v27 = vmul.f32 %v4526_v23, %v4526_v23  ;;  %v1730_v47 = vadd.f32 %v4478_v41, %v4496_v56 }
 0x14c   :  { %v1744_v3 = vmul.f32 0.5, %v1728_v19  ;;  %v1786_v62 = vmul.f32 0.6931472, %v2530_v21  ;;  %v1806_v18 = vsub.f32 %v1742_v37, %v1782_v26  ;;  %v2023_v14 = vadd.f32 -0.5, %v1804_v0 }
 0x14d   :  { %v1833_v22 = vadd.f32 %v2021_v7, %v1832_v59  ;;  %v1701_v12 = vmul.f32 %v4503_v40, %v4503_v40  ;;  %v1717_v13 = vmul.f32 %v4537_v4, %v4537_v4  ;;  %v1731_v28 = vadd.f32 %v1715_v55, %v1699_v46 }
 0x14e   :  { %v2534_v45 = vpop.eup %2533  ;;  %v1745_v1 = vmul.f32 0.5, %v1729_v6  ;;  %v1788_v41 = vmul.f32 0.6931472, %v2532_v35  ;;  %v1807_v56 = vsub.f32 %v1743_v11, %v1784_v54  ;;  %v2024_v19 = vadd.f32 -0.5, %v1805_v52 }
 0x14f   :  { %v1834_v48 = vadd.f32 %v2022_v38, %v1833_v22  ;;  %v2536_v51 = vpop.eup %2535  ;;  %v1702_v57 = vmul.f32 %v4509_v44, %v4509_v44  ;;  %v1718_v37 = vmul.f32 %v4548_v8, %v4548_v8  ;;  %v1732_v31 = vadd.f32 %v1716_v27, %v1700_v43 }
 0x150   :  { %v1746_v63 = vmul.f32 0.5, %v1730_v47  ;;  %v1790_v42 = vmul.f32 0.6931472, %v2534_v45  ;;  %v1808_v20 = vsub.f32 %v1744_v3, %v1786_v62  ;;  %v2025_v61 = vadd.f32 -0.5, %v1806_v18 }
 0x151   :  { %v1835_v50 = vadd.f32 %v2023_v14, %v1834_v48  ;;  %v2538_v58 = vpop.eup %2537  ;;  %v1733_v60 = vadd.f32 %v1717_v13, %v1701_v12  ;;  %v1747_v26 = vmul.f32 0.5, %v1731_v28  ;;  %v1792_v0 = vmul.f32 0.6931472, %v2536_v51 }
 0x152   :  { %v1809_v7 = vsub.f32 %v1745_v1, %v1788_v41  ;;  %v2026_v9 = vadd.f32 -0.5, %v1807_v56  ;;  %v1734_v55 = vadd.f32 %v1718_v37, %v1702_v57  ;;  %v1748_v6 = vmul.f32 0.5, %v1732_v31 }
 0x153   :  { %v1836_v21 = vadd.f32 %v2024_v19, %v1835_v50  ;;  %v2540_v46 = vpop.eup %2539  ;;  %v1794_v54 = vmul.f32 0.6931472, %v2538_v58  ;;  %v1810_v52 = vsub.f32 %v1746_v63, %v1790_v42  ;;  %v2027_v38 = vadd.f32 -0.5, %v1808_v20  ;;  %v4558_v63 = vpop.xlane.xlu1 %1236  ;;  %v339_v42 = vld [vmem:[%s5347_s5] sm:$0xff]  ;;  %v340_v20 = vld [vmem:[%s5347_s5 + $0x8] sm:$0xff]  ;;  %v342_v50 = vld [vmem:[%s5347_s5 + $0x18] sm:$0xff] }
 0x154   :  { %v2542_v11 = vpop.eup %2541  ;;  %v1749_v35 = vmul.f32 0.5, %v1733_v60  ;;  %v1796_v43 = vmul.f32 0.6931472, %v2540_v46  ;;  %v1811_v27 = vsub.f32 %v1747_v26, %v1792_v0  ;;  %v2028_v47 = vadd.f32 -0.5, %v1809_v7  ;;  %v343_v58 = vld [vmem:[%s5347_s5 + $0x20] sm:$0xff]  ;;  %v344_v60 = vld [vmem:[%s5347_s5 + $0x28] sm:$0xff] }
 0x155   :  { %v1837_v59 = vadd.f32 %v2025_v61, %v1836_v21  ;;  %v1750_v62 = vmul.f32 0.5, %v1734_v55  ;;  %v1798_v18 = vmul.f32 0.6931472, %v2542_v11  ;;  %v1812_v14 = vsub.f32 %v1748_v6, %v1794_v54  ;;  %v341_v61 = vld [vmem:[%s5347_s5 + $0x10] sm:$0xff]  ;;  %v5348_v26 = vld [vmem:[#allocation10_spill] sm:$0xff]  ;;  %v5350_v21 = vld [vmem:[#allocation13_spill] sm:$0xff] }
 0x156   :  { %v2029_v22 = vadd.f32 -0.5, %v1810_v52  ;;  %v1813_v12 = vsub.f32 %v1749_v35, %v1796_v43  ;;  %v2030_v13 = vadd.f32 -0.5, %v1811_v27  ;;  %v355_v0 = vmul.f32 %v339_v42, %v5348_v26  ;;  %v5349_v7 = vld [vmem:[#allocation11_spill] sm:$0xff]  ;;  %v346_v6 = vld [vmem:[%s5347_s5 + $0x38] sm:$0xff]  ;;  %v347_v11 = vld [vmem:[%s5347_s5 + $0x40] sm:$0xff] }
 0x157   :  { %v1838_v3 = vadd.f32 %v2026_v9, %v1837_v59  ;;  %v1814_v1 = vsub.f32 %v1750_v62, %v1798_v18  ;;  %v2031_v41 = vadd.f32 -0.5, %v1812_v14  ;;  %v356_v9 = vmul.f32 %v340_v20, %v5349_v7  ;;  %v345_v55 = vld [vmem:[%s5347_s5 + $0x30] sm:$0xff]  ;;  %v5351_v54 = vld [vmem:[#allocation9_spill] sm:$0xff]  ;;  %v350_v62 = vld [vmem:[%s5347_s5 + $0x58] sm:$0xff] }
 0x158   :  { %v2032_v19 = vadd.f32 -0.5, %v1813_v12  ;;  %v357_v46 = vmul.f32 %v341_v61, %v5350_v21  ;;  %v358_v52 = vmul.f32 %v342_v50, %v5351_v54  ;;  %v5353_v35 = vld [vmem:[#allocation15_spill] sm:$0xff]  ;;  %v1238_v27 = vrot.slane %v4558_v63, 4  ;;  %v5354_v18 = vld [vmem:[#allocation16_spill] sm:$0xff]  ;;  %v2544_v20 = vld [vmem:[%s5256_s29 + $0x8] sm:$0xff] }
 0x159   :  { %v1839_v45 = vadd.f32 %v2027_v38, %v1838_v3  ;;  %v2033_v51 = vadd.f32 -0.5, %v1814_v1  ;;  %v5352_v38 = vld [vmem:[#allocation14_spill] sm:$0xff]  ;;  %v360_v43 = vmul.f32 %v344_v60, %v5353_v35  ;;  %v349_v3 = vld [vmem:[%s5347_s5 + $0x50] sm:$0xff]  ;;  %v361_v14 = vmul.f32 %v345_v55, %v5354_v18  ;;  %v354_v50 = vld [vmem:[%s5347_s5 + $0x78] sm:$0xff] }
 0x15a   :  { %v359_v59 = vmul.f32 %v343_v58, %v5352_v38  ;;  %v5356_v12 = vld [vmem:[#allocation19_spill] sm:$0xff]  ;;  %v372_v61 = vadd.f32 %v2544_v20, %v356_v9  ;;  %v5360_v58 = vld [vmem:[#allocation21_spill] sm:$0xff]  ;;  %v5361_v26 = vld [vmem:[#allocation22_spill] sm:$0xff] }
 0x15b   :  { %v1840_v28 = vadd.f32 %v2028_v47, %v1839_v45  ;;  %v348_v47 = vld [vmem:[%s5347_s5 + $0x48] sm:$0xff]  ;;  %v5362_v7 = vld [vmem:[#allocation24_spill] sm:$0xff]  ;;  %v2545_v55 = vld [vmem:[%s5256_s29 + $0x10] sm:$0xff] }
 0x15c   :  { %v2546_v9 = vld [vmem:[%s5256_s29 + $0x18] sm:$0xff]  ;;  %v2547_v35 = vld [vmem:[%s5256_s29 + $0x20] sm:$0xff] }
 0x15d   :  { %v1841_v56 = vadd.f32 %v2029_v22, %v1840_v28  ;;  %v5355_v22 = vld [vmem:[#allocation18_spill] sm:$0xff]  ;;  %v2543_v28 = vld [vmem:[%s5256_s29] sm:$0xff]  ;;  %v374_v38 = vadd.f32 %v2546_v9, %v358_v52  ;;  %v2558_v20 = vld [vmem:[%s5256_s29 + $0x78] sm:$0xff] }
 0x15e   :  { %v362_v45 = vmul.f32 %v346_v6, %v5355_v22  ;;  %v371_v1 = vadd.f32 %v2543_v28, %v355_v0  ;;  %v373_v6 = vadd.f32 %v2545_v55, %v357_v46  ;;  %v2549_v46 = vld [vmem:[%s5256_s29 + $0x30] sm:$0xff]  ;;  %v2550_v22 = vld [vmem:[%s5256_s29 + $0x38] sm:$0xff]  ;;  %v2552_v28 = vld [vmem:[%s5256_s29 + $0x48] sm:$0xff] }
 0x15f   :  { %v1842_v48 = vadd.f32 %v2030_v13, %v1841_v56  ;;  %v363_v13 = vmul.f32 %v347_v11, %v5356_v12  ;;  %v352_v56 = vld [vmem:[%s5347_s5 + $0x68] sm:$0xff]  ;;  %v5363_v11 = vld [vmem:[#allocation25_spill] sm:$0xff]  ;;  %v377_v18 = vadd.f32 %v2549_v46, %v361_v14  ;;  %v956_v46 = vld [vmem:[%s5365_s10 + $0x38] sm:$0xff] }
 0x160   :  { %v368_v0 = vmul.f32 %v352_v56, %v5361_v26  ;;  %v370_v54 = vmul.f32 %v354_v50, %v5363_v11  ;;  %v378_v52 = vadd.f32 %v2550_v22, %v362_v45  ;;  %v2551_v12 = vld [vmem:[%s5256_s29 + $0x40] sm:$0xff]  ;;  %v2554_v56 = vld [vmem:[%s5256_s29 + $0x58] sm:$0xff]  ;;  %v950_v26 = vld [vmem:[%s5365_s10 + $0x8] sm:$0xff] }
 0x161   :  { %v1843_v57 = vadd.f32 %v2031_v41, %v1842_v48  ;;  %v351_v41 = vld [vmem:[%s5347_s5 + $0x60] sm:$0xff]  ;;  %v5357_v48 = vld [vmem:[#allocation20_spill] sm:$0xff]  ;;  %v958_v22 = vld [vmem:[%s5365_s10 + $0x48] sm:$0xff] }
 0x162   :  { %v367_v60 = vmul.f32 %v351_v41, %v5360_v58  ;;  %v2553_v41 = vld [vmem:[%s5256_s29 + $0x50] sm:$0xff]  ;;  %v386_v50 = vadd.f32 %v2558_v20, %v370_v54  ;;  %v2086_v58 = vpack.c.bf16 %v372_v61, %v371_v1  ;;  %v2101_v11 = vpack.c.bf16 %v378_v52, %v377_v18  ;;  %v953_v1 = vld [vmem:[%s5365_s10 + $0x20] sm:$0xff]  ;;  %v954_v61 = vld [vmem:[%s5365_s10 + $0x28] sm:$0xff] }
 0x163   :  { %v1844_v37 = vadd.f32 %v2032_v19, %v1843_v57  ;;  %v353_v19 = vld [vmem:[%s5347_s5 + $0x70] sm:$0xff]  ;;  %v5358_v57 = vld [vmem:[#allocation12_spill] sm:$0xff]  ;;  %v957_v18 = vld [vmem:[%s5365_s10 + $0x40] sm:$0xff] }
 0x164   :  { %v369_v21 = vmul.f32 %v353_v19, %v5362_v7  ;;  %v2555_v19 = vld [vmem:[%s5256_s29 + $0x60] sm:$0xff]  ;;  %v952_v7 = vld [vmem:[%s5365_s10 + $0x18] sm:$0xff]  ;;  %2087 = vst [vmem:[%s5015_s18] sm:$0xff] %v2086_v58   ;;  %2205 = vst [vmem:[%s5015_s18 + $0x18] sm:$0xff] %v2101_v11  }
 0x165   :  { %v1845_v31 = vadd.f32 %v2033_v51, %v1844_v37  ;;  %v364_v51 = vmul.f32 %v348_v47, %v5357_v48  ;;  %v365_v37 = vmul.f32 %v349_v3, %v5358_v57  ;;  %v375_v47 = vadd.f32 %v2547_v35, %v359_v59  ;;  %v2548_v3 = vld [vmem:[%s5256_s29 + $0x28] sm:$0xff]  ;;  %v652_v57 = vld [vmem:[%s5364_s1] sm:$0x1]  ;;  %v959_v52 = vld [vmem:[%s5365_s10 + $0x50] sm:$0xff] }
 0x166   :  { %v379_v59 = vadd.f32 %v2551_v12, %v363_v13  ;;  %v383_v13 = vadd.f32 %v2555_v19, %v367_v60  ;;  %v2556_v48 = vld [vmem:[%s5256_s29 + $0x68] sm:$0xff]  ;;  %v2091_v60 = vpack.c.bf16 %v374_v38, %v373_v6  ;;  %v955_v6 = vld [vmem:[%s5365_s10 + $0x30] sm:$0xff]  ;;  %v960_v12 = vld [vmem:[%s5365_s10 + $0x58] sm:$0xff] }
 0x167   :  { %1846 = vadd.xlane.f32.xlu0 %v1845_v31  ;;  %v5359_v31 = vld [vmem:[#allocation17_spill] sm:$0xff]  ;;  %v381_v14 = vadd.f32 %v2553_v41, %v365_v37  ;;  %v5370_v19 = vld [vmem:[#allocation31_spill] sm:$0xff]  ;;  %v5371_v20 = vld [vmem:[#allocation32_spill] sm:$0xff] }
 0x168   :  { %v366_v42 = vmul.f32 %v350_v62, %v5359_v31  ;;  %v376_v62 = vadd.f32 %v2548_v3, %v360_v43  ;;  %v380_v43 = vadd.f32 %v2552_v28, %v364_v51  ;;  %v384_v51 = vadd.f32 %v2556_v48, %v368_v0  ;;  %v949_v37 = vld [vmem:[%s5365_s10] sm:$0xff]  ;;  %v2557_v31 = vld [vmem:[%s5256_s29 + $0x70] sm:$0xff]  ;;  %2203 = vst [vmem:[%s5015_s18 + $0x8] sm:$0xff] %v2091_v60   ;;  %v5366_v3 = vld [vmem:[#allocation26_spill] sm:$0xff] }
 0x169   :  { %v951_v0 = vld [vmem:[%s5365_s10 + $0x10] sm:$0xff]  ;;  %v5367_v28 = vld [vmem:[#allocation28_spill] sm:$0xff]  ;;  %v5368_v41 = vld [vmem:[#allocation29_spill] sm:$0xff] }
 0x16a   :  { %v382_v45 = vadd.f32 %v2554_v56, %v366_v42  ;;  %v385_v42 = vadd.f32 %v2557_v31, %v369_v21  ;;  %v2096_v55 = vpack.c.bf16 %v376_v62, %v375_v47  ;;  %v2106_v9 = vpack.c.bf16 %v380_v43, %v379_v59  ;;  %v961_v59 = vld [vmem:[%s5365_s10 + $0x60] sm:$0xff]  ;;  %v5369_v56 = vld [vmem:[#allocation30_spill] sm:$0xff]  ;;  %v963_v31 = vld [vmem:[%s5365_s10 + $0x70] sm:$0xff] }
 0x16b   :  { %v2116_v54 = vpack.c.bf16 %v384_v51, %v383_v13  ;;  %v653_v62 = vmul.f32 %v652_v57, %v5366_v3  ;;  %v965_v43 = vmul.f32 %v949_v37, %v5367_v28  ;;  %v968_v13 = vmul.f32 %v952_v7, %v5370_v19  ;;  %v2559_v51 = vld [vmem:[%s5281_s26] sm:$0x1]  ;;  %v962_v37 = vld [vmem:[%s5365_s10 + $0x68] sm:$0xff]  ;;  %v5374_v7 = vld [vmem:[#allocation35_spill] sm:$0xff] }
 0x16c   :  { %v2111_v35 = vpack.c.bf16 %v382_v45, %v381_v14  ;;  %v2121_v38 = vpack.c.bf16 %v386_v50, %v385_v42  ;;  %2204 = vst [vmem:[%s5015_s18 + $0x10] sm:$0xff] %v2096_v55   ;;  %2206 = vst [vmem:[%s5015_s18 + $0x20] sm:$0xff] %v2106_v9   ;;  %v966_v14 = vmul.f32 %v950_v26, %v5368_v41  ;;  %v964_v42 = vld [vmem:[%s5365_s10 + $0x78] sm:$0xff]  ;;  %v5372_v58 = vld [vmem:[#allocation33_spill] sm:$0xff] }
 0x16d   :  { %v967_v45 = vmul.f32 %v951_v0, %v5369_v56  ;;  %2208 = vst [vmem:[%s5015_s18 + $0x30] sm:$0xff] %v2116_v54   ;;  %v654_v57 = vadd.f32 %v2559_v51, %v653_v62  ;;  %v969_v50 = vmul.f32 %v953_v1, %v5371_v20  ;;  %v970_v60 = vmul.f32 %v954_v61, %v5372_v58  ;;  %v5373_v26 = vld [vmem:[#allocation34_spill] sm:$0xff]  ;;  %v5375_v55 = vld [vmem:[#allocation36_spill] sm:$0xff]  ;;  %v5376_v9 = vld [vmem:[#allocation37_spill] sm:$0xff] }
 0x16e   :  { %2207 = vst [vmem:[%s5015_s18 + $0x28] sm:$0xff] %v2111_v35   ;;  %2209 = vst [vmem:[%s5015_s18 + $0x38] sm:$0xff] %v2121_v38   ;;  %v971_v0 = vmul.f32 %v955_v6, %v5373_v26  ;;  %v973_v11 = vmul.f32 %v957_v18, %v5375_v55  ;;  %v974_v35 = vmul.f32 %v958_v22, %v5376_v9  ;;  %v5377_v38 = vld [vmem:[#allocation38_spill] sm:$0xff]  ;;  %v5378_v3 = vld [vmem:[#allocation39_spill] sm:$0xff] }
 0x16f   :  { %655 = vst [vmem:[%s5016_s19] sm:$0x1] %v654_v57  ;;  %v976_v62 = vmul.f32 %v960_v12, %v5378_v3  ;;  %v5379_v1 = vld [vmem:[#allocation40_spill] sm:$0xff]  ;;  %v5380_v61 = vld [vmem:[#allocation5_spill] sm:$0xff]  ;;  %v5381_v6 = vld [vmem:[#allocation6_spill] sm:$0xff] }
 0x170   :  { %v977_v28 = vmul.f32 %v961_v59, %v5379_v1  ;;  %v978_v41 = vmul.f32 %v962_v37, %v5380_v61  ;;  %v979_v56 = vmul.f32 %v963_v31, %v5381_v6  ;;  %v2560_v18 = vld [vmem:[%s5088_s4] sm:$0xff]  ;;  %v2562_v12 = vld [vmem:[%s5088_s4 + $0x10] sm:$0xff]  ;;  %v2563_v37 = vld [vmem:[%s5088_s4 + $0x18] sm:$0xff] }
 0x171   :  { %v981_v22 = vadd.f32 %v2560_v18, %v965_v43  ;;  %v983_v59 = vadd.f32 %v2562_v12, %v967_v45  ;;  %v984_v31 = vadd.f32 %v2563_v37, %v968_v13  ;;  %v2564_v43 = vld [vmem:[%s5088_s4 + $0x20] sm:$0xff]  ;;  %v2566_v20 = vld [vmem:[%s5088_s4 + $0x30] sm:$0xff]  ;;  %v2567_v58 = vld [vmem:[%s5088_s4 + $0x38] sm:$0xff] }
 0x172   :  { %v987_v45 = vadd.f32 %v2566_v20, %v971_v0  ;;  %v2570_v0 = vld [vmem:[%s5088_s4 + $0x50] sm:$0xff]  ;;  %v1559_v6 = vld [vmem:[%s5011_s14] sm:$0xff]  ;;  %v1562_v12 = vld [vmem:[%s5011_s14 + $0x18] sm:$0xff] }
 0x173   :  { %v1563_v37 = vld [vmem:[%s5011_s14 + $0x20] sm:$0xff] }
 0x176   :  { %v627_v21 = vpop.xlane.xlu0 %626 }
 0x177   :  { %v628_v47 = vrot.slane %v627_v21, 4 }
 0x179   :  { %v629_v48 = vadd.f32 %v628_v47, %v627_v21  ;;  %v972_v21 = vmul.f32 %v956_v46, %v5374_v7  ;;  %v975_v47 = vmul.f32 %v959_v52, %v5377_v38  ;;  %v5382_v46 = vld [vmem:[#allocation7_spill] sm:$0xff]  ;;  %v2561_v52 = vld [vmem:[%s5088_s4 + $0x8] sm:$0xff] }
 0x17a   :  { %v980_v19 = vmul.f32 %v964_v42, %v5382_v46  ;;  %v982_v57 = vadd.f32 %v2561_v52, %v966_v14  ;;  %v2565_v42 = vld [vmem:[%s5088_s4 + $0x28] sm:$0xff] }
 0x17b   :  { %v630_v54 = vrot.slane %v629_v48, 2  ;;  %v986_v14 = vadd.f32 %v2565_v42, %v970_v60  ;;  %v988_v13 = vadd.f32 %v2567_v58, %v972_v21  ;;  %v2569_v60 = vld [vmem:[%s5088_s4 + $0x48] sm:$0xff]  ;;  %v991_v9 = vadd.f32 %v2570_v0, %v975_v47  ;;  %v1263_v21 = vld [vmem:[%s5008_s11] sm:$0x1]  ;;  %v2574_v47 = vld [vmem:[%s5088_s4 + $0x70] sm:$0xff] }
 0x17c   :  { %v990_v55 = vadd.f32 %v2569_v60, %v974_v35  ;;  %v2573_v35 = vld [vmem:[%s5088_s4 + $0x68] sm:$0xff]  ;;  %v995_v61 = vadd.f32 %v2574_v47, %v979_v56  ;;  %v2126_v52 = vpack.c.bf16 %v982_v57, %v981_v22  ;;  %v2131_v56 = vpack.c.bf16 %v984_v31, %v983_v59  ;;  %v1566_v22 = vld [vmem:[%s5011_s14 + $0x38] sm:$0xff]  ;;  %v1567_v57 = vld [vmem:[%s5011_s14 + $0x40] sm:$0xff] }
 0x17d   :  { %v631_v51 = vadd.f32 %v630_v54, %v629_v48  ;;  %v985_v48 = vadd.f32 %v2564_v43, %v969_v50  ;;  %v2568_v50 = vld [vmem:[%s5088_s4 + $0x40] sm:$0xff]  ;;  %v2571_v54 = vld [vmem:[%s5088_s4 + $0x58] sm:$0xff]  ;;  %v994_v1 = vadd.f32 %v2573_v35, %v978_v41  ;;  %v1564_v43 = vld [vmem:[%s5011_s14 + $0x28] sm:$0xff]  ;;  %v2141_v42 = vpack.c.bf16 %v988_v13, %v987_v45 }
 0x17e   :  { %v989_v7 = vadd.f32 %v2568_v50, %v973_v11  ;;  %v992_v38 = vadd.f32 %v2571_v54, %v976_v62  ;;  %v2572_v11 = vld [vmem:[%s5088_s4 + $0x60] sm:$0xff]  ;;  %v1560_v62 = vld [vmem:[%s5011_s14 + $0x8] sm:$0xff]  ;;  %v2575_v41 = vld [vmem:[%s5088_s4 + $0x78] sm:$0xff]  ;;  %2127 = vst [vmem:[%s5017_s20] sm:$0xff] %v2126_v52   ;;  %v1575_v60 = vmul.f32 %v1559_v6, %v4346_v49 }
 0x17f   :  { %v632_v26 = vrot.slane %v631_v51, 1  ;;  %v993_v3 = vadd.f32 %v2572_v11, %v977_v28  ;;  %v1561_v28 = vld [vmem:[%s5011_s14 + $0x10] sm:$0xff]  ;;  %v996_v18 = vadd.f32 %v2575_v41, %v980_v19  ;;  %2210 = vst [vmem:[%s5017_s20 + $0x8] sm:$0xff] %v2131_v56   ;;  %v1568_v13 = vld [vmem:[%s5011_s14 + $0x48] sm:$0xff]  ;;  %v1570_v50 = vld [vmem:[%s5011_s14 + $0x58] sm:$0xff]  ;;  %v1583_v11 = vmul.f32 %v1567_v57, %v4393_v10 }
 0x180   :  { %v2146_v20 = vpack.c.bf16 %v990_v55, %v989_v7  ;;  %v2151_v58 = vpack.c.bf16 %v992_v38, %v991_v9  ;;  %v1565_v19 = vld [vmem:[%s5011_s14 + $0x30] sm:$0xff]  ;;  %2212 = vst [vmem:[%s5017_s20 + $0x18] sm:$0xff] %v2141_v42   ;;  %v1576_v55 = vmul.f32 %v1560_v62, %v4356_v17  ;;  %v1577_v0 = vmul.f32 %v1561_v28, %v4360_v36  ;;  %v1574_v49 = vld [vmem:[%s5011_s14 + $0x78] sm:$0xff]  ;;  %v2577_v10 = vld [vmem:[%s5009_s12] sm:$0xff] }
 0x181   :  { %v633_v46 = vadd.f32 %v632_v26, %v631_v51  ;;  %v2136_v51 = vpack.c.bf16 %v986_v14, %v985_v48  ;;  %v2156_v59 = vpack.c.bf16 %v994_v1, %v993_v3  ;;  %v2161_v31 = vpack.c.bf16 %v996_v18, %v995_v61  ;;  %v5383_v14 = vld [vmem:[#allocation23_spill] sm:$0xff]  ;;  %v2582_v6 = vld [vmem:[%s5009_s12 + $0x28] sm:$0xff]  ;;  %v2584_v41 = vld [vmem:[%s5009_s12 + $0x38] sm:$0xff] }
 0x182   :  { %v4858_v48 = vadd.f32 %v1238_v27, %v4558_v63  ;;  %v1264_v45 = vmul.f32 %v1263_v21, %v5383_v14  ;;  %v1569_v26 = vld [vmem:[%s5011_s14 + $0x50] sm:$0xff]  ;;  %2213 = vst [vmem:[%s5017_s20 + $0x20] sm:$0xff] %v2146_v20   ;;  %2214 = vst [vmem:[%s5017_s20 + $0x28] sm:$0xff] %v2151_v58   ;;  %v1571_v63 = vld [vmem:[%s5011_s14 + $0x60] sm:$0xff]  ;;  %v1578_v9 = vmul.f32 %v1562_v12, %v4371_v33 }
 0x183   :  { %2224 = vpush %v633_v46  ;;  %2211 = vst [vmem:[%s5017_s20 + $0x10] sm:$0xff] %v2136_v51   ;;  %v1572_v27 = vld [vmem:[%s5011_s14 + $0x68] sm:$0xff]  ;;  %v1573_v7 = vld [vmem:[%s5011_s14 + $0x70] sm:$0xff]  ;;  %v1579_v17 = vmul.f32 %v1563_v37, %v4375_v2  ;;  %v1580_v36 = vmul.f32 %v1564_v43, %v4379_v16  ;;  %v1581_v33 = vmul.f32 %v1565_v19, %v4385_v24 }
 0x184   :  { %2215 = vst [vmem:[%s5017_s20 + $0x30] sm:$0xff] %v2156_v59   ;;  %2216 = vst [vmem:[%s5017_s20 + $0x38] sm:$0xff] %v2161_v31   ;;  %v2576_v21 = vld [vmem:[%s5006_s9] sm:$0x1]  ;;  %v1582_v38 = vmul.f32 %v1566_v22, %v4389_v25  ;;  %v1584_v3 = vmul.f32 %v1568_v13, %v4401_v30  ;;  %v1585_v35 = vmul.f32 %v1569_v26, %v4420_v5  ;;  %v2578_v5 = vld [vmem:[%s5009_s12 + $0x8] sm:$0xff] }
 0x185   :  { %v1265_v54 = vadd.f32 %v2576_v21, %v1264_v45  ;;  %v1586_v1 = vmul.f32 %v1570_v50, %v4458_v34  ;;  %v1587_v2 = vmul.f32 %v1571_v63, %v4474_v53  ;;  %v1588_v16 = vmul.f32 %v1572_v27, %v4491_v39  ;;  %v2579_v34 = vld [vmem:[%s5009_s12 + $0x10] sm:$0xff]  ;;  %v2580_v39 = vld [vmem:[%s5009_s12 + $0x18] sm:$0xff]  ;;  %v2585_v52 = vld [vmem:[%s5009_s12 + $0x40] sm:$0xff] }
 0x186   :  { %v1589_v24 = vmul.f32 %v1573_v7, %v4503_v40  ;;  %v1590_v25 = vmul.f32 %v1574_v49, %v4509_v44  ;;  %v1591_v30 = vadd.f32 %v2577_v10, %v1575_v60  ;;  %v1592_v47 = vadd.f32 %v2578_v5, %v1576_v55  ;;  %v2581_v44 = vld [vmem:[%s5009_s12 + $0x20] sm:$0xff]  ;;  %v2583_v28 = vld [vmem:[%s5009_s12 + $0x30] sm:$0xff]  ;;  %v2586_v12 = vld [vmem:[%s5009_s12 + $0x48] sm:$0xff] }
 0x187   :  { %1266 = vst [vmem:[%s5018_s21] sm:$0x1] %v1265_v54  ;;  %v1593_v53 = vadd.f32 %v2579_v34, %v1577_v0  ;;  %v1594_v40 = vadd.f32 %v2580_v39, %v1578_v9  ;;  %v1595_v61 = vadd.f32 %v2581_v44, %v1579_v17  ;;  %v1596_v62 = vadd.f32 %v2582_v6, %v1580_v36  ;;  %v1873_v19 = vld [vmem:[%s5014_s17] sm:$0x1] }
 0x188   :  { %v1597_v46 = vadd.f32 %v2583_v28, %v1581_v33  ;;  %v1598_v18 = vadd.f32 %v2584_v41, %v1582_v38  ;;  %v1599_v56 = vadd.f32 %v2585_v52, %v1583_v11  ;;  %v1600_v37 = vadd.f32 %v2586_v12, %v1584_v3  ;;  %v2587_v7 = vld [vmem:[%s5012_s15] sm:$0x1] }
 0x189   :  { %v1601_v43 = vadd.f32 %v1585_v35, %v4440_v29  ;;  %v1602_v51 = vadd.f32 %v1586_v1, %v4450_v15  ;;  %v1603_v42 = vadd.f32 %v1587_v2, %v4521_v32  ;;  %v1604_v20 = vadd.f32 %v1588_v16, %v4526_v23  ;;  %v5384_v23 = vld [vmem:[#allocation27_spill] sm:$0xff] }
 0x18a   :  { %v1605_v58 = vadd.f32 %v1589_v24, %v4537_v4  ;;  %v1606_v22 = vadd.f32 %v1590_v25, %v4548_v8  ;;  %v2166_v57 = vpack.c.bf16 %v1592_v47, %v1591_v30  ;;  %v2171_v59 = vpack.c.bf16 %v1594_v40, %v1593_v53 }
 0x18b   :  { %v2176_v31 = vpack.c.bf16 %v1596_v62, %v1595_v61  ;;  %v2181_v45 = vpack.c.bf16 %v1598_v18, %v1597_v46  ;;  %v2186_v29 = vpack.c.bf16 %v1600_v37, %v1599_v56  ;;  %v2191_v13 = vpack.c.bf16 %v1602_v51, %v1601_v43 }
 0x18c   :  { %v2196_v15 = vpack.c.bf16 %v1604_v20, %v1603_v42  ;;  %2167 = vst [vmem:[%s5019_s22] sm:$0xff] %v2166_v57   ;;  %2217 = vst [vmem:[%s5019_s22 + $0x8] sm:$0xff] %v2171_v59   ;;  %v2201_v32 = vpack.c.bf16 %v1606_v22, %v1605_v58  ;;  %v1874_v4 = vmul.f32 %v1873_v19, %v5384_v23  ;;  %v1240_v50 = vrot.slane %v4858_v48, 2 }
 0x18d   :  { %v1278_v14 = vpop.xlane.xlu1 %1277  ;;  %2218 = vst [vmem:[%s5019_s22 + $0x10] sm:$0xff] %v2176_v31   ;;  %2219 = vst [vmem:[%s5019_s22 + $0x18] sm:$0xff] %v2181_v45  }
 0x18e   :  { %v1279_v26 = vrot.slane %v1278_v14, 4  ;;  %2220 = vst [vmem:[%s5019_s22 + $0x20] sm:$0xff] %v2186_v29   ;;  %2221 = vst [vmem:[%s5019_s22 + $0x28] sm:$0xff] %v2191_v13   ;;  %v1875_v60 = vadd.f32 %v2587_v7, %v1874_v4  ;;  %v1241_v9 = vadd.f32 %v1240_v50, %v4858_v48 }
 0x18f   :  { %v668_v8 = vpop.xlane.xlu0 %667  ;;  %2222 = vst [vmem:[%s5019_s22 + $0x30] sm:$0xff] %v2196_v15   ;;  %2223 = vst [vmem:[%s5019_s22 + $0x38] sm:$0xff] %v2201_v32  }
 0x190   :  { %v669_v63 = vrot.slane %v668_v8, 4  ;;  %v1280_v27 = vadd.f32 %v1279_v26, %v1278_v14  ;;  %1876 = vst [vmem:[%s5020_s23] sm:$0x1] %v1875_v60  ;;  %v1242_v36 = vrot.slane %v1241_v9, 1 }
 0x191   :  { %v1888_v35 = vpop.xlane.xlu1 %1887 }
 0x192   :  { %v670_v55 = vadd.f32 %v669_v63, %v668_v8  ;;  %v1281_v0 = vrot.slane %v1280_v27, 2  ;;  %v1243_v3 = vadd.f32 %v1242_v36, %v1241_v9  ;;  %v1889_v1 = vrot.slane %v1888_v35, 4 }
 0x194   :  { %v671_v21 = vrot.slane %v670_v55, 2  ;;  %v1282_v54 = vadd.f32 %v1281_v0, %v1280_v27  ;;  %v1890_v2 = vadd.f32 %v1889_v1, %v1888_v35 }
 0x196   :  { %v672_v49 = vadd.f32 %v671_v21, %v670_v55  ;;  %v1283_v17 = vrot.slane %v1282_v54, 1  ;;  %v1891_v16 = vrot.slane %v1890_v2, 2 }
 0x198   :  { %v673_v33 = vrot.slane %v672_v49, 1  ;;  %v1284_v11 = vadd.f32 %v1283_v17, %v1282_v54  ;;  %v1892_v10 = vadd.f32 %v1891_v16, %v1890_v2 }
 0x19a   :  { %v674_v38 = vadd.f32 %v673_v33, %v672_v49  ;;  %v1893_v5 = vrot.slane %v1892_v10, 1 }
 0x19c   :  { %2226 = vpush %v674_v38  ;;  %v1894_v53 = vadd.f32 %v1893_v5, %v1892_v10 }
 0x19d   :  { %2228 = vpush %v1243_v3 }
 0x19e   :  { %2230 = vpush %v1284_v11 }
 0x1b4   :  { %s2225_s15 = spop %2224 }
 0x1cd   :  { %s2227_s22 = spop %2226 }
 0x1ce   :  { %s676_s23 = sadd.f32 %s2227_s22, %s2225_s15  ;;  %s2229_s13 = spop %2228 }
 0x1cf   :  { %s2231_s25 = spop %2230 }
 0x1d0   :  { %s1245_s5 = sadd.f32 %s2229_s13, %s676_s23 }
 0x1d2   :  { %s1286_s18 = sadd.f32 %s2231_s25, %s1245_s5 }
 0x1f0   :  { %v1847_v24 = vpop.xlane.xlu0 %1846 }
 0x1f1   :  { %v1848_v25 = vrot.slane %v1847_v24, 4 }
 0x1f3   :  { %v1849_v48 = vadd.f32 %v1848_v25, %v1847_v24 }
 0x1f5   :  { %v1850_v30 = vrot.slane %v1849_v48, 2 }
 0x1f7   :  { %v1851_v47 = vadd.f32 %v1850_v30, %v1849_v48 }
 0x1f9   :  { %v1852_v34 = vrot.slane %v1851_v47, 1 }
 0x1fb   :  { %v1853_v39 = vadd.f32 %v1852_v34, %v1851_v47 }
 0x1fd   :  { %2232 = vpush %v1853_v39 }
 0x1fe   :  { %2234 = vpush %v1894_v53 }
 0x22e   :  { %s2233_s26 = spop %2232 }
 0x22f   :  { %s1855_s10 = sadd.f32 %s2233_s26, %s1286_s18  ;;  %s2235_s27 = spop %2234 }
 0x231   :  { %s1896_s12 = sadd.f32 %s2235_s27, %s1855_s10 }
 0x233   :  { %1898 = sst [smem:[#allocation2]] %s1896_s12 }
 0x234   :  { %1918 = dma.smem_to_hbm %s2598_s8, 16, %s5021_s24, [#allocation3]  }
 0x235   :  { %2596 = dma.done.wait [#allocation3], 16  }
 0x236   :  { %2597 = vsyncadd [#allocation3], 4294967280 }
 0x237   :  { %1934 = sfence }
 0x238   :  { %1935 = vsyncpa [#allocation3], 1 }

</bundles_post_ra>
